<compile_context>
chip_gen: v6e
topology: v6e:2x2x1
jax: 0.10.0
libtpu: 0.0.40
codegen_flags: <defaults>
</compile_context>

<pallas_src>
import functools

import jax
import jax.numpy as jnp
from jax import lax
from jax.experimental import pallas as pl
from jax.experimental.pallas import tpu as pltpu


# --------------------------------------------------------------------------
# Pallas kernel
# --------------------------------------------------------------------------
def _residual_block_kernel(x_ref, w1_ref, b1_ref, w2_ref, b2_ref, *rest,
                           stride, tile_rows, Wo, has_projection):
    """One (batch element, output-row tile) per grid step.

    x_ref  : (H + 2 + 2*stride, W + 2, Cin_p)  padded input (resident per batch)
    w1_ref : (3, 3, Cin_p, Cout_p)  bf16, BN1 scale folded in
    b1_ref : (1, Cout_p)            f32 BN1 bias
    w2_ref : (3, 3, Cout_p, Cout_p) bf16, BN2 scale folded in
    b2_ref : (1, Cout_p)            f32 BN2 bias
    ws_ref : (Cin_p, Cout_p)        bf16 1x1 projection (only if has_projection)
    o_ref  : (TH, Wo, Cout_p)       output row tile
    hpad   : (TH+2, Wo+2, Cout_p)   f32 scratch: conv1 rows (+conv2 halo/pad)
    """
    if has_projection:
        ws_ref, o_ref, hpad_ref = rest
    else:
        o_ref, hpad_ref = rest

    t = pl.program_id(1)
    n_tiles = pl.num_programs(1)
    cin_p = x_ref.shape[-1]
    cout_p = o_ref.shape[-1]
    TH = tile_rows
    THh = TH + 2                      # conv1 rows per tile incl. conv2 halo
    cdt = jnp.bfloat16                # MXU operand dtype (f32 accumulation)

    # ---- conv1 (BN1 scale pre-folded) over TH+2 virtual rows ---------------
    # virtual conv1 row r = t*TH - 1 + i, i in [0, TH+2).  The input was padded
    # by (1 + stride) rows top/bottom, so padded row index for tap kh is
    #   t*TH*stride + i*stride + kh.
    row0 = t * (TH * stride)
    acc1 = jnp.zeros((THh * Wo, cout_p), jnp.float32)
    for kh in range(3):
        for kw in range(3):
            if stride == 1:
                patch = x_ref[pl.ds(row0 + kh, THh), pl.ds(kw, Wo), :]
            else:
                # TODO(synk): strided ref reads; not exercised in __main__.
                patch = x_ref[pl.ds(row0 + kh, THh, stride),
                              pl.ds(kw, Wo, stride), :]
            acc1 = acc1 + jnp.dot(
                patch.reshape(THh * Wo, cin_p).astype(cdt),
                w1_ref[kh, kw],
                preferred_element_type=jnp.float32)

    # ---- BN1 bias + ReLU; stash rows into the zero-padded halo scratch -----
    h = jnp.maximum(acc1 + b1_ref[...], 0.0)
    # zero-pad columns (cheap: 2 x (TH+2) x Cout_p) - interior is overwritten.
    hpad_ref[:, 0:1, :] = jnp.zeros((THh, 1, cout_p), jnp.float32)
    hpad_ref[:, Wo + 1:Wo + 2, :] = jnp.zeros((THh, 1, cout_p), jnp.float32)
    hpad_ref[:, 1:Wo + 1, :] = h.reshape(THh, Wo, cout_p)

    # conv2's zero padding above the first / below the last output row.
    @pl.when(t == 0)
    def _():
        hpad_ref[0:1, :, :] = jnp.zeros((1, Wo + 2, cout_p), jnp.float32)

    @pl.when(t == n_tiles - 1)
    def _():
        hpad_ref[THh - 1:THh, :, :] = jnp.zeros((1, Wo + 2, cout_p), jnp.float32)

    # ---- conv2 (BN2 scale pre-folded), stride 1, padding 1 -----------------
    acc2 = jnp.zeros((TH * Wo, cout_p), jnp.float32)
    for kh in range(3):
        for kw in range(3):
            patch = hpad_ref[kh:kh + TH, kw:kw + Wo, :]
            acc2 = acc2 + jnp.dot(
                patch.reshape(TH * Wo, cout_p).astype(cdt),
                w2_ref[kh, kw],
                preferred_element_type=jnp.float32)
    out = acc2 + b2_ref[...]

    # ---- shortcut -----------------------------------------------------------
    if has_projection:
        if stride == 1:
            xs = x_ref[pl.ds(row0 + 1 + stride, TH), pl.ds(1, Wo), :]
        else:
            xs = x_ref[pl.ds(row0 + 1 + stride, TH, stride),
                       pl.ds(1, Wo, stride), :]
        sc = jnp.dot(xs.reshape(TH * Wo, cin_p).astype(cdt), ws_ref[...],
                     preferred_element_type=jnp.float32)
    else:
        # identity shortcut: plain residual add, no matmul (stride == 1 here).
        xs = x_ref[pl.ds(row0 + 2, TH), pl.ds(1, Wo), :]
        sc = xs.reshape(TH * Wo, cin_p)

    o_ref[...] = jnp.maximum(out + sc, 0.0).reshape(TH, Wo, cout_p).astype(o_ref.dtype)


# --------------------------------------------------------------------------
# Parameter preparation (BN folding, channel padding, dtype cast)
# --------------------------------------------------------------------------
def _round_up(x, m):
    return (x + m - 1) // m * m


def _fold_bn(gamma, beta, running_mean, running_var, eps=1e-5):
    scale = gamma / jnp.sqrt(running_var + eps)
    bias = beta - running_mean * scale
    return scale, bias


def _prep_params(params, stride, compute_dtype, eps=1e-5):
    """Fold BN scales into the conv weights, pad channels to a multiple of 128
    (lane width) and cast the matmul operands to `compute_dtype`."""
    del stride  # layout is stride-independent
    cout, cin = params["w1"].shape[0], params["w1"].shape[1]
    cin_p, cout_p = _round_up(cin, 128), _round_up(cout, 128)

    s1, b1 = _fold_bn(params["g1"], params["be1"], params["rm1"], params["rv1"], eps)
    s2, b2 = _fold_bn(params["g2"], params["be2"], params["rm2"], params["rv2"], eps)

    # PyTorch OIHW -> HWIO, fold per-output-channel BN scale, cast.
    w1 = (jnp.transpose(params["w1"], (2, 3, 1, 0)) * s1).astype(compute_dtype)
    w2 = (jnp.transpose(params["w2"], (2, 3, 1, 0)) * s2).astype(compute_dtype)

    w1p = jnp.zeros((3, 3, cin_p, cout_p), compute_dtype).at[:, :, :cin, :cout].set(w1)
    w2p = jnp.zeros((3, 3, cout_p, cout_p), compute_dtype).at[:, :, :cout, :cout].set(w2)
    b1p = jnp.zeros((1, cout_p), jnp.float32).at[0, :cout].set(b1)
    b2p = jnp.zeros((1, cout_p), jnp.float32).at[0, :cout].set(b2)

    wsp = None
    if "ws" in params:
        ws = jnp.transpose(params["ws"][:, :, 0, 0], (1, 0)).astype(compute_dtype)
        wsp = jnp.zeros((cin_p, cout_p), compute_dtype).at[:cin, :cout].set(ws)

    return {"w1": w1p, "b1": b1p, "w2": w2p, "b2": b2p, "ws": wsp,
            "cin": cin, "cout": cout, "cin_p": cin_p, "cout_p": cout_p}


def _pick_tile_rows(ho, target):
    th = max(1, min(target, ho))
    while ho % th:
        th -= 1
    return th


# --------------------------------------------------------------------------
# Wrapper
# --------------------------------------------------------------------------
@functools.partial(jax.jit, static_argnames=("stride", "block_rows"))
def residual_block_pallas(x_nchw, params, *, stride=1, block_rows=8):
    """Forward pass of the ResidualBlock.  x_nchw: (N, Cin, H, W) float32."""
    N, cin, H, W = x_nchw.shape
    cout = params["w1"].shape[0]
    Ho = (H + 2 - 3) // stride + 1
    Wo = (W + 2 - 3) // stride + 1
    has_projection = (stride != 1) or (cin != cout)

    prep = _prep_params(params, stride, jnp.bfloat16)
    cin_p, cout_p = prep["cin_p"], prep["cout_p"]

    # NCHW -> NHWC; pad rows by (1 + stride) (conv pad + halo recompute rows),
    # cols by 1, and channels with zeros up to the padded lane width.
    x_nhwc = jnp.transpose(x_nchw, (0, 2, 3, 1))
    x_pad = jnp.pad(x_nhwc, ((0, 0), (1 + stride, 1 + stride), (1, 1),
                             (0, cin_p - cin)))
    Hp, Wp = x_pad.shape[1], x_pad.shape[2]

    TH = _pick_tile_rows(Ho, block_rows)
    grid = (N, Ho // TH)

    kernel = functools.partial(
        _residual_block_kernel, stride=stride, tile_rows=TH, Wo=Wo,
        has_projection=has_projection)

    in_specs = [
        # whole padded image; block index ignores the row-tile axis, so it
        # stays resident in VMEM across row tiles of the same batch element.
        pl.BlockSpec((None, Hp, Wp, cin_p), lambda b, t: (b, 0, 0, 0)),
        pl.BlockSpec((3, 3, cin_p, cout_p), lambda b, t: (0, 0, 0, 0)),
        pl.BlockSpec((1, cout_p), lambda b, t: (0, 0)),
        pl.BlockSpec((3, 3, cout_p, cout_p), lambda b, t: (0, 0, 0, 0)),
        pl.BlockSpec((1, cout_p), lambda b, t: (0, 0)),
    ]
    args = [x_pad, prep["w1"], prep["b1"], prep["w2"], prep["b2"]]
    if has_projection:
        in_specs.append(pl.BlockSpec((cin_p, cout_p), lambda b, t: (0, 0)))
        args.append(prep["ws"])

    out_nhwc = pl.pallas_call(
        kernel,
        out_shape=jax.ShapeDtypeStruct((N, Ho, Wo, cout_p), jnp.float32),
        grid_spec=pltpu.PrefetchScalarGridSpec(
            num_scalar_prefetch=0,
            grid=grid,
            in_specs=in_specs,
            out_specs=pl.BlockSpec((None, TH, Wo, cout_p),
                                   lambda b, t: (b, t, 0, 0)),
            scratch_shapes=[pltpu.VMEM((TH + 2, Wo + 2, cout_p), jnp.float32)],
        ),
        compiler_params=pltpu.CompilerParams(
            dimension_semantics=("parallel", "parallel")),
    )(*args)

    # drop channel padding, back to NCHW
    return jnp.transpose(out_nhwc[..., :cout], (0, 3, 1, 2))


# --------------------------------------------------------------------------
# References (verification only)
# --------------------------------------------------------------------------
def residual_block_reference(x, p, *, stride=1, eps=1e-5):
    """Independent pure-f32 NCHW reference implementing the PyTorch module."""
    def conv(v, w, s, pad):
        return lax.conv_general_dilated(
            v, w, (s, s), [(pad, pad), (pad, pad)],
            dimension_numbers=("NCHW", "OIHW", "NCHW"))

    def bn(v, g, be, rm, rv):
        return ((v - rm[None, :, None, None]) /
                jnp.sqrt(rv[None, :, None, None] + eps) *
                g[None, :, None, None] + be[None, :, None, None])

    cin, cout = x.shape[1], p["w1"].shape[0]
    out = jax.nn.relu(bn(conv(x, p["w1"], stride, 1),
                         p["g1"], p["be1"], p["rm1"], p["rv1"]))
    out = bn(conv(out, p["w2"], 1, 1), p["g2"], p["be2"], p["rm2"], p["rv2"])
    sc = conv(x, p["ws"], stride, 0) if (stride != 1 or cin != cout) else x
    return jax.nn.relu(out + sc)


def residual_block_folded_reference(x_nchw, prep, *, stride=1):
    """lax.conv reference using the *same* folded / padded / cast operands as
    the Pallas kernel (tight check of the kernel's tiling, halos, indexing)."""
    dt = prep["w1"].dtype
    x = jnp.transpose(x_nchw, (0, 2, 3, 1))
    x = jnp.pad(x, ((0, 0), (0, 0), (0, 0), (0, prep["cin_p"] - prep["cin"])))

    def conv(v, w, s, pad):
        return lax.conv_general_dilated(
            v.astype(dt), w, (s, s), [(pad, pad), (pad, pad)],
            dimension_numbers=("NHWC", "HWIO", "NHWC"),
            preferred_element_type=jnp.float32)

    h = jax.nn.relu(conv(x, prep["w1"], stride, 1) + prep["b1"][0])
    out = conv(h, prep["w2"], 1, 1) + prep["b2"][0]
    sc = (conv(x, prep["ws"][None, None], stride, 0)
          if prep["ws"] is not None else x)
    out = jax.nn.relu(out + sc)
    return jnp.transpose(out[..., :prep["cout"]], (0, 3, 1, 2))


def make_params(key, in_channels, out_channels, stride):
    ks = jax.random.split(key, 11)
    p = {
        "w1": 0.1 * jax.random.normal(ks[0], (out_channels, in_channels, 3, 3), jnp.float32),
        "g1": jax.random.uniform(ks[1], (out_channels,), jnp.float32, 0.5, 1.5),
        "be1": 0.1 * jax.random.normal(ks[2], (out_channels,), jnp.float32),
        "rm1": 0.1 * jax.random.normal(ks[3], (out_channels,), jnp.float32),
        "rv1": jax.random.uniform(ks[4], (out_channels,), jnp.float32, 0.5, 1.5),
        "w2": 0.1 * jax.random.normal(ks[5], (out_channels, out_channels, 3, 3), jnp.float32),
        "g2": jax.random.uniform(ks[6], (out_channels,), jnp.float32, 0.5, 1.5),
        "be2": 0.1 * jax.random.normal(ks[7], (out_channels,), jnp.float32),
        "rm2": 0.1 * jax.random.normal(ks[8], (out_channels,), jnp.float32),
        "rv2": jax.random.uniform(ks[9], (out_channels,), jnp.float32, 0.5, 1.5),
    }
    if stride != 1 or in_channels != out_channels:
        p["ws"] = 0.1 * jax.random.normal(
            ks[10], (out_channels, in_channels, 1, 1), jnp.float32)
    return p


if __name__ == "__main__":
    key = jax.random.PRNGKey(0)

    configs = [
        # (N, Cin, Cout, H, W, stride)
        (2, 4, 8, 16, 16, 1),   # projection (1x1 conv) shortcut; 2 row tiles
        (2, 8, 8, 16, 16, 1),   # identity shortcut (no matmul on the shortcut)
    ]
    for i, (N, cin, cout, H, W, stride) in enumerate(configs):
        kx, kp, key = jax.random.split(key, 3)
        x = jax.random.normal(kx, (N, cin, H, W), jnp.float32)
        params = make_params(kp, cin, cout, stride)

        out = jax.block_until_ready(
            residual_block_pallas(x, params, stride=stride, block_rows=8))

        # (1) BN folding / channel padding algebra vs. the independent f32 module.
        ref_f32 = residual_block_reference(x, params, stride=stride)
        folded_f32 = residual_block_folded_reference(
            x, _prep_params(params, stride, jnp.float32), stride=stride)
        err_fold = float(jnp.max(jnp.abs(folded_f32 - ref_f32)))
        assert err_fold < 1e-4, f"cfg{i}: BN folding mismatch {err_fold}"

        # (2) Pallas kernel vs. a reference using identical bf16 operands (tight,
        # up to f32 summation order and one bf16 ulp on the intermediate).
        matched = residual_block_folded_reference(
            x, _prep_params(params, stride, jnp.bfloat16), stride=stride)
        assert out.shape == ref_f32.shape, (out.shape, ref_f32.shape)
        err_kernel = float(jnp.max(jnp.abs(out - matched)))
        assert err_kernel < 1e-2, f"cfg{i}: kernel mismatch {err_kernel}"

        # (3) Sanity vs. the pure-f32 module (loose, bf16 rounding budget).
        err_full = float(jnp.max(jnp.abs(out - ref_f32)))
        assert err_full < 6e-2, f"cfg{i}: end-to-end mismatch {err_full}"

    print("KERNEL_OK")
</pallas_src>

<mosaic_0001>
module attributes {stable_mosaic.version = 11 : i64} {
  func.func @_residual_block_kernel(%arg0: i32, %arg1: i32, %arg2: memref<1x20x18x128xf32, #tpu.memory_space<vmem>>, %arg3: memref<3x3x128x128xbf16, #tpu.memory_space<vmem>>, %arg4: memref<1x128xf32, #tpu.memory_space<vmem>>, %arg5: memref<3x3x128x128xbf16, #tpu.memory_space<vmem>>, %arg6: memref<1x128xf32, #tpu.memory_space<vmem>>, %arg7: memref<128x128xbf16, #tpu.memory_space<vmem>>, %arg8: memref<1x8x16x128xf32, #tpu.memory_space<vmem>>, %arg9: memref<10x18x128xf32, #tpu.memory_space<vmem>>) attributes {dimension_semantics = [#tpu.dimension_semantics<parallel>, #tpu.dimension_semantics<parallel>], iteration_bounds = array<i64: 2, 2>, scalar_prefetch = 0 : i64, scratch_operands = 1 : i64, tpu.core_type = #tpu.core_type<tc>, window_params = [{transform_indices = @transform_0, window_bounds = array<i64: 1, 20, 18, 128>}, {pipeline_mode = #tpu.pipeline_mode<synchronous>, transform_indices = @transform_1, window_bounds = array<i64: 3, 3, 128, 128>}, {pipeline_mode = #tpu.pipeline_mode<synchronous>, transform_indices = @transform_2, window_bounds = array<i64: 1, 128>}, {pipeline_mode = #tpu.pipeline_mode<synchronous>, transform_indices = @transform_3, window_bounds = array<i64: 3, 3, 128, 128>}, {pipeline_mode = #tpu.pipeline_mode<synchronous>, transform_indices = @transform_4, window_bounds = array<i64: 1, 128>}, {pipeline_mode = #tpu.pipeline_mode<synchronous>, transform_indices = @transform_5, window_bounds = array<i64: 128, 128>}, {transform_indices = @transform_6, window_bounds = array<i64: 1, 8, 16, 128>}]} {
    %c8_i32 = arith.constant 8 : i32
    %0 = arith.muli %arg1, %c8_i32 : i32
    %cst = arith.constant 0.000000e+00 : f32
    %1 = vector.broadcast %cst : f32 to vector<160x128xf32>
    %c0_i32 = arith.constant 0 : i32
    %2 = arith.addi %0, %c0_i32 : i32
    %c0 = arith.constant 0 : index
    %3 = arith.index_cast %2 : i32 to index
    %c0_0 = arith.constant 0 : index
    %c0_1 = arith.constant 0 : index
    %4 = vector.load %arg2[%c0, %3, %c0_0, %c0_1] : memref<1x20x18x128xf32, #tpu.memory_space<vmem>>, vector<1x10x16x128xf32>
    %5 = vector.shape_cast %4 : vector<1x10x16x128xf32> to vector<10x16x128xf32>
    %6 = vector.shape_cast %5 : vector<10x16x128xf32> to vector<160x128xf32>
    %7 = arith.truncf %6 : vector<160x128xf32> to vector<160x128xbf16>
    %c0_2 = arith.constant 0 : index
    %c0_3 = arith.constant 0 : index
    %c0_4 = arith.constant 0 : index
    %c0_5 = arith.constant 0 : index
    %8 = vector.load %arg3[%c0_2, %c0_3, %c0_4, %c0_5] : memref<3x3x128x128xbf16, #tpu.memory_space<vmem>>, vector<1x1x128x128xbf16>
    %9 = vector.shape_cast %8 : vector<1x1x128x128xbf16> to vector<128x128xbf16>
    %cst_6 = arith.constant dense<0.000000e+00> : vector<160x128xf32>
    %10 = tpu.matmul %7, %9, %cst_6 {dimension_numbers = #tpu.dot_dimension_numbers<[1], [0], [0], [1], [0, 0, 1, 1], [], []>} : vector<160x128xbf16>, vector<128x128xbf16>, vector<160x128xf32> -> vector<160x128xf32>
    %11 = arith.addf %1, %10 : vector<160x128xf32>
    %c0_i32_7 = arith.constant 0 : i32
    %12 = arith.addi %0, %c0_i32_7 : i32
    %c0_8 = arith.constant 0 : index
    %13 = arith.index_cast %12 : i32 to index
    %c1 = arith.constant 1 : index
    %c0_9 = arith.constant 0 : index
    %14 = vector.load %arg2[%c0_8, %13, %c1, %c0_9] : memref<1x20x18x128xf32, #tpu.memory_space<vmem>>, vector<1x10x16x128xf32>
    %15 = vector.shape_cast %14 : vector<1x10x16x128xf32> to vector<10x16x128xf32>
    %16 = vector.shape_cast %15 : vector<10x16x128xf32> to vector<160x128xf32>
    %17 = arith.truncf %16 : vector<160x128xf32> to vector<160x128xbf16>
    %c0_10 = arith.constant 0 : index
    %c1_11 = arith.constant 1 : index
    %c0_12 = arith.constant 0 : index
    %c0_13 = arith.constant 0 : index
    %18 = vector.load %arg3[%c0_10, %c1_11, %c0_12, %c0_13] : memref<3x3x128x128xbf16, #tpu.memory_space<vmem>>, vector<1x1x128x128xbf16>
    %19 = vector.shape_cast %18 : vector<1x1x128x128xbf16> to vector<128x128xbf16>
    %cst_14 = arith.constant dense<0.000000e+00> : vector<160x128xf32>
    %20 = tpu.matmul %17, %19, %cst_14 {dimension_numbers = #tpu.dot_dimension_numbers<[1], [0], [0], [1], [0, 0, 1, 1], [], []>} : vector<160x128xbf16>, vector<128x128xbf16>, vector<160x128xf32> -> vector<160x128xf32>
    %21 = arith.addf %11, %20 : vector<160x128xf32>
    %c0_i32_15 = arith.constant 0 : i32
    %22 = arith.addi %0, %c0_i32_15 : i32
    %c0_16 = arith.constant 0 : index
    %23 = arith.index_cast %22 : i32 to index
    %c2 = arith.constant 2 : index
    %c0_17 = arith.constant 0 : index
    %24 = vector.load %arg2[%c0_16, %23, %c2, %c0_17] : memref<1x20x18x128xf32, #tpu.memory_space<vmem>>, vector<1x10x16x128xf32>
    %25 = vector.shape_cast %24 : vector<1x10x16x128xf32> to vector<10x16x128xf32>
    %26 = vector.shape_cast %25 : vector<10x16x128xf32> to vector<160x128xf32>
    %27 = arith.truncf %26 : vector<160x128xf32> to vector<160x128xbf16>
    %c0_18 = arith.constant 0 : index
    %c2_19 = arith.constant 2 : index
    %c0_20 = arith.constant 0 : index
    %c0_21 = arith.constant 0 : index
    %28 = vector.load %arg3[%c0_18, %c2_19, %c0_20, %c0_21] : memref<3x3x128x128xbf16, #tpu.memory_space<vmem>>, vector<1x1x128x128xbf16>
    %29 = vector.shape_cast %28 : vector<1x1x128x128xbf16> to vector<128x128xbf16>
    %cst_22 = arith.constant dense<0.000000e+00> : vector<160x128xf32>
    %30 = tpu.matmul %27, %29, %cst_22 {dimension_numbers = #tpu.dot_dimension_numbers<[1], [0], [0], [1], [0, 0, 1, 1], [], []>} : vector<160x128xbf16>, vector<128x128xbf16>, vector<160x128xf32> -> vector<160x128xf32>
    %31 = arith.addf %21, %30 : vector<160x128xf32>
    %c1_i32 = arith.constant 1 : i32
    %32 = arith.addi %0, %c1_i32 : i32
    %c0_23 = arith.constant 0 : index
    %33 = arith.index_cast %32 : i32 to index
    %c0_24 = arith.constant 0 : index
    %c0_25 = arith.constant 0 : index
    %34 = vector.load %arg2[%c0_23, %33, %c0_24, %c0_25] : memref<1x20x18x128xf32, #tpu.memory_space<vmem>>, vector<1x10x16x128xf32>
    %35 = vector.shape_cast %34 : vector<1x10x16x128xf32> to vector<10x16x128xf32>
    %36 = vector.shape_cast %35 : vector<10x16x128xf32> to vector<160x128xf32>
    %37 = arith.truncf %36 : vector<160x128xf32> to vector<160x128xbf16>
    %c1_26 = arith.constant 1 : index
    %c0_27 = arith.constant 0 : index
    %c0_28 = arith.constant 0 : index
    %c0_29 = arith.constant 0 : index
    %38 = vector.load %arg3[%c1_26, %c0_27, %c0_28, %c0_29] : memref<3x3x128x128xbf16, #tpu.memory_space<vmem>>, vector<1x1x128x128xbf16>
    %39 = vector.shape_cast %38 : vector<1x1x128x128xbf16> to vector<128x128xbf16>
    %cst_30 = arith.constant dense<0.000000e+00> : vector<160x128xf32>
    %40 = tpu.matmul %37, %39, %cst_30 {dimension_numbers = #tpu.dot_dimension_numbers<[1], [0], [0], [1], [0, 0, 1, 1], [], []>} : vector<160x128xbf16>, vector<128x128xbf16>, vector<160x128xf32> -> vector<160x128xf32>
    %41 = arith.addf %31, %40 : vector<160x128xf32>
    %c1_i32_31 = arith.constant 1 : i32
    %42 = arith.addi %0, %c1_i32_31 : i32
    %c0_32 = arith.constant 0 : index
    %43 = arith.index_cast %42 : i32 to index
    %c1_33 = arith.constant 1 : index
    %c0_34 = arith.constant 0 : index
    %44 = vector.load %arg2[%c0_32, %43, %c1_33, %c0_34] : memref<1x20x18x128xf32, #tpu.memory_space<vmem>>, vector<1x10x16x128xf32>
    %45 = vector.shape_cast %44 : vector<1x10x16x128xf32> to vector<10x16x128xf32>
    %46 = vector.shape_cast %45 : vector<10x16x128xf32> to vector<160x128xf32>
    %47 = arith.truncf %46 : vector<160x128xf32> to vector<160x128xbf16>
    %c1_35 = arith.constant 1 : index
    %c1_36 = arith.constant 1 : index
    %c0_37 = arith.constant 0 : index
    %c0_38 = arith.constant 0 : index
    %48 = vector.load %arg3[%c1_35, %c1_36, %c0_37, %c0_38] : memref<3x3x128x128xbf16, #tpu.memory_space<vmem>>, vector<1x1x128x128xbf16>
    %49 = vector.shape_cast %48 : vector<1x1x128x128xbf16> to vector<128x128xbf16>
    %cst_39 = arith.constant dense<0.000000e+00> : vector<160x128xf32>
    %50 = tpu.matmul %47, %49, %cst_39 {dimension_numbers = #tpu.dot_dimension_numbers<[1], [0], [0], [1], [0, 0, 1, 1], [], []>} : vector<160x128xbf16>, vector<128x128xbf16>, vector<160x128xf32> -> vector<160x128xf32>
    %51 = arith.addf %41, %50 : vector<160x128xf32>
    %c1_i32_40 = arith.constant 1 : i32
    %52 = arith.addi %0, %c1_i32_40 : i32
    %c0_41 = arith.constant 0 : index
    %53 = arith.index_cast %52 : i32 to index
    %c2_42 = arith.constant 2 : index
    %c0_43 = arith.constant 0 : index
    %54 = vector.load %arg2[%c0_41, %53, %c2_42, %c0_43] : memref<1x20x18x128xf32, #tpu.memory_space<vmem>>, vector<1x10x16x128xf32>
    %55 = vector.shape_cast %54 : vector<1x10x16x128xf32> to vector<10x16x128xf32>
    %56 = vector.shape_cast %55 : vector<10x16x128xf32> to vector<160x128xf32>
    %57 = arith.truncf %56 : vector<160x128xf32> to vector<160x128xbf16>
    %c1_44 = arith.constant 1 : index
    %c2_45 = arith.constant 2 : index
    %c0_46 = arith.constant 0 : index
    %c0_47 = arith.constant 0 : index
    %58 = vector.load %arg3[%c1_44, %c2_45, %c0_46, %c0_47] : memref<3x3x128x128xbf16, #tpu.memory_space<vmem>>, vector<1x1x128x128xbf16>
    %59 = vector.shape_cast %58 : vector<1x1x128x128xbf16> to vector<128x128xbf16>
    %cst_48 = arith.constant dense<0.000000e+00> : vector<160x128xf32>
    %60 = tpu.matmul %57, %59, %cst_48 {dimension_numbers = #tpu.dot_dimension_numbers<[1], [0], [0], [1], [0, 0, 1, 1], [], []>} : vector<160x128xbf16>, vector<128x128xbf16>, vector<160x128xf32> -> vector<160x128xf32>
    %61 = arith.addf %51, %60 : vector<160x128xf32>
    %c2_i32 = arith.constant 2 : i32
    %62 = arith.addi %0, %c2_i32 : i32
    %c0_49 = arith.constant 0 : index
    %63 = arith.index_cast %62 : i32 to index
    %c0_50 = arith.constant 0 : index
    %c0_51 = arith.constant 0 : index
    %64 = vector.load %arg2[%c0_49, %63, %c0_50, %c0_51] : memref<1x20x18x128xf32, #tpu.memory_space<vmem>>, vector<1x10x16x128xf32>
    %65 = vector.shape_cast %64 : vector<1x10x16x128xf32> to vector<10x16x128xf32>
    %66 = vector.shape_cast %65 : vector<10x16x128xf32> to vector<160x128xf32>
    %67 = arith.truncf %66 : vector<160x128xf32> to vector<160x128xbf16>
    %c2_52 = arith.constant 2 : index
    %c0_53 = arith.constant 0 : index
    %c0_54 = arith.constant 0 : index
    %c0_55 = arith.constant 0 : index
    %68 = vector.load %arg3[%c2_52, %c0_53, %c0_54, %c0_55] : memref<3x3x128x128xbf16, #tpu.memory_space<vmem>>, vector<1x1x128x128xbf16>
    %69 = vector.shape_cast %68 : vector<1x1x128x128xbf16> to vector<128x128xbf16>
    %cst_56 = arith.constant dense<0.000000e+00> : vector<160x128xf32>
    %70 = tpu.matmul %67, %69, %cst_56 {dimension_numbers = #tpu.dot_dimension_numbers<[1], [0], [0], [1], [0, 0, 1, 1], [], []>} : vector<160x128xbf16>, vector<128x128xbf16>, vector<160x128xf32> -> vector<160x128xf32>
    %71 = arith.addf %61, %70 : vector<160x128xf32>
    %c2_i32_57 = arith.constant 2 : i32
    %72 = arith.addi %0, %c2_i32_57 : i32
    %c0_58 = arith.constant 0 : index
    %73 = arith.index_cast %72 : i32 to index
    %c1_59 = arith.constant 1 : index
    %c0_60 = arith.constant 0 : index
    %74 = vector.load %arg2[%c0_58, %73, %c1_59, %c0_60] : memref<1x20x18x128xf32, #tpu.memory_space<vmem>>, vector<1x10x16x128xf32>
    %75 = vector.shape_cast %74 : vector<1x10x16x128xf32> to vector<10x16x128xf32>
    %76 = vector.shape_cast %75 : vector<10x16x128xf32> to vector<160x128xf32>
    %77 = arith.truncf %76 : vector<160x128xf32> to vector<160x128xbf16>
    %c2_61 = arith.constant 2 : index
    %c1_62 = arith.constant 1 : index
    %c0_63 = arith.constant 0 : index
    %c0_64 = arith.constant 0 : index
    %78 = vector.load %arg3[%c2_61, %c1_62, %c0_63, %c0_64] : memref<3x3x128x128xbf16, #tpu.memory_space<vmem>>, vector<1x1x128x128xbf16>
    %79 = vector.shape_cast %78 : vector<1x1x128x128xbf16> to vector<128x128xbf16>
    %cst_65 = arith.constant dense<0.000000e+00> : vector<160x128xf32>
    %80 = tpu.matmul %77, %79, %cst_65 {dimension_numbers = #tpu.dot_dimension_numbers<[1], [0], [0], [1], [0, 0, 1, 1], [], []>} : vector<160x128xbf16>, vector<128x128xbf16>, vector<160x128xf32> -> vector<160x128xf32>
    %81 = arith.addf %71, %80 : vector<160x128xf32>
    %c2_i32_66 = arith.constant 2 : i32
    %82 = arith.addi %0, %c2_i32_66 : i32
    %c0_67 = arith.constant 0 : index
    %83 = arith.index_cast %82 : i32 to index
    %c2_68 = arith.constant 2 : index
    %c0_69 = arith.constant 0 : index
    %84 = vector.load %arg2[%c0_67, %83, %c2_68, %c0_69] : memref<1x20x18x128xf32, #tpu.memory_space<vmem>>, vector<1x10x16x128xf32>
    %85 = vector.shape_cast %84 : vector<1x10x16x128xf32> to vector<10x16x128xf32>
    %86 = vector.shape_cast %85 : vector<10x16x128xf32> to vector<160x128xf32>
    %87 = arith.truncf %86 : vector<160x128xf32> to vector<160x128xbf16>
    %c2_70 = arith.constant 2 : index
    %c2_71 = arith.constant 2 : index
    %c0_72 = arith.constant 0 : index
    %c0_73 = arith.constant 0 : index
    %88 = vector.load %arg3[%c2_70, %c2_71, %c0_72, %c0_73] : memref<3x3x128x128xbf16, #tpu.memory_space<vmem>>, vector<1x1x128x128xbf16>
    %89 = vector.shape_cast %88 : vector<1x1x128x128xbf16> to vector<128x128xbf16>
    %cst_74 = arith.constant dense<0.000000e+00> : vector<160x128xf32>
    %90 = tpu.matmul %87, %89, %cst_74 {dimension_numbers = #tpu.dot_dimension_numbers<[1], [0], [0], [1], [0, 0, 1, 1], [], []>} : vector<160x128xbf16>, vector<128x128xbf16>, vector<160x128xf32> -> vector<160x128xf32>
    %91 = arith.addf %81, %90 : vector<160x128xf32>
    %c0_75 = arith.constant 0 : index
    %c0_76 = arith.constant 0 : index
    %92 = vector.load %arg4[%c0_75, %c0_76] : memref<1x128xf32, #tpu.memory_space<vmem>>, vector<1x128xf32>
    %93 = vector.broadcast %92 : vector<1x128xf32> to vector<160x128xf32>
    %94 = arith.addf %91, %93 : vector<160x128xf32>
    %cst_77 = arith.constant 0.000000e+00 : f32
    %95 = vector.broadcast %cst_77 : f32 to vector<160x128xf32>
    %96 = arith.maximumf %94, %95 : vector<160x128xf32>
    %cst_78 = arith.constant 0.000000e+00 : f32
    %97 = vector.broadcast %cst_78 : f32 to vector<10x1x128xf32>
    %c0_79 = arith.constant 0 : index
    %c0_80 = arith.constant 0 : index
    %c0_81 = arith.constant 0 : index
    %98 = vector.load %arg9[%c0_79, %c0_80, %c0_81] : memref<10x18x128xf32, #tpu.memory_space<vmem>>, vector<10x1x128xf32>
    tpu.vector_store %arg9[%c0_79, %c0_80, %c0_81], %97 {strides = array<i32>} : memref<10x18x128xf32, #tpu.memory_space<vmem>>, vector<10x1x128xf32>,
    %cst_82 = arith.constant 0.000000e+00 : f32
    %99 = vector.broadcast %cst_82 : f32 to vector<10x1x128xf32>
    %c0_83 = arith.constant 0 : index
    %c17 = arith.constant 17 : index
    %c0_84 = arith.constant 0 : index
    %100 = vector.load %arg9[%c0_83, %c17, %c0_84] : memref<10x18x128xf32, #tpu.memory_space<vmem>>, vector<10x1x128xf32>
    tpu.vector_store %arg9[%c0_83, %c17, %c0_84], %99 {strides = array<i32>} : memref<10x18x128xf32, #tpu.memory_space<vmem>>, vector<10x1x128xf32>,
    %101 = vector.shape_cast %96 : vector<160x128xf32> to vector<10x16x128xf32>
    %c0_85 = arith.constant 0 : index
    %c1_86 = arith.constant 1 : index
    %c0_87 = arith.constant 0 : index
    %102 = vector.load %arg9[%c0_85, %c1_86, %c0_87] : memref<10x18x128xf32, #tpu.memory_space<vmem>>, vector<10x16x128xf32>
    tpu.vector_store %arg9[%c0_85, %c1_86, %c0_87], %101 {strides = array<i32>} : memref<10x18x128xf32, #tpu.memory_space<vmem>>, vector<10x16x128xf32>,
    %c0_i32_88 = arith.constant 0 : i32
    %103 = arith.cmpi eq, %arg1, %c0_i32_88 : i32
    %104 = arith.extui %103 : i1 to i32
    %c0_i32_89 = arith.constant 0 : i32
    %105 = arith.cmpi ne, %104, %c0_i32_89 : i32
    scf.if %105 {
      %cst_180 = arith.constant 0.000000e+00 : f32
      %192 = vector.broadcast %cst_180 : f32 to vector<1x18x128xf32>
      %c0_181 = arith.constant 0 : index
      %c0_182 = arith.constant 0 : index
      %c0_183 = arith.constant 0 : index
      %193 = vector.load %arg9[%c0_181, %c0_182, %c0_183] : memref<10x18x128xf32, #tpu.memory_space<vmem>>, vector<1x18x128xf32>
      tpu.vector_store %arg9[%c0_181, %c0_182, %c0_183], %192 {strides = array<i32>} : memref<10x18x128xf32, #tpu.memory_space<vmem>>, vector<1x18x128xf32>,
    } else {
    }
    %c1_i32_90 = arith.constant 1 : i32
    %106 = arith.cmpi eq, %arg1, %c1_i32_90 : i32
    %107 = arith.extui %106 : i1 to i32
    %c0_i32_91 = arith.constant 0 : i32
    %108 = arith.cmpi ne, %107, %c0_i32_91 : i32
    scf.if %108 {
      %cst_180 = arith.constant 0.000000e+00 : f32
      %192 = vector.broadcast %cst_180 : f32 to vector<1x18x128xf32>
      %c9 = arith.constant 9 : index
      %c0_181 = arith.constant 0 : index
      %c0_182 = arith.constant 0 : index
      %193 = vector.load %arg9[%c9, %c0_181, %c0_182] : memref<10x18x128xf32, #tpu.memory_space<vmem>>, vector<1x18x128xf32>
      tpu.vector_store %arg9[%c9, %c0_181, %c0_182], %192 {strides = array<i32>} : memref<10x18x128xf32, #tpu.memory_space<vmem>>, vector<1x18x128xf32>,
    } else {
    }
    %cst_92 = arith.constant 0.000000e+00 : f32
    %109 = vector.broadcast %cst_92 : f32 to vector<128x128xf32>
    %c0_93 = arith.constant 0 : index
    %c0_94 = arith.constant 0 : index
    %c0_95 = arith.constant 0 : index
    %110 = vector.load %arg9[%c0_93, %c0_94, %c0_95] : memref<10x18x128xf32, #tpu.memory_space<vmem>>, vector<8x16x128xf32>
    %111 = vector.shape_cast %110 : vector<8x16x128xf32> to vector<128x128xf32>
    %112 = arith.truncf %111 : vector<128x128xf32> to vector<128x128xbf16>
    %c0_96 = arith.constant 0 : index
    %c0_97 = arith.constant 0 : index
    %c0_98 = arith.constant 0 : index
    %c0_99 = arith.constant 0 : index
    %113 = vector.load %arg5[%c0_96, %c0_97, %c0_98, %c0_99] : memref<3x3x128x128xbf16, #tpu.memory_space<vmem>>, vector<1x1x128x128xbf16>
    %114 = vector.shape_cast %113 : vector<1x1x128x128xbf16> to vector<128x128xbf16>
    %cst_100 = arith.constant dense<0.000000e+00> : vector<128x128xf32>
    %115 = tpu.matmul %112, %114, %cst_100 {dimension_numbers = #tpu.dot_dimension_numbers<[1], [0], [0], [1], [0, 0, 1, 1], [], []>} : vector<128x128xbf16>, vector<128x128xbf16>, vector<128x128xf32> -> vector<128x128xf32>
    %116 = arith.addf %109, %115 : vector<128x128xf32>
    %c0_101 = arith.constant 0 : index
    %c1_102 = arith.constant 1 : index
    %c0_103 = arith.constant 0 : index
    %117 = vector.load %arg9[%c0_101, %c1_102, %c0_103] : memref<10x18x128xf32, #tpu.memory_space<vmem>>, vector<8x16x128xf32>
    %118 = vector.shape_cast %117 : vector<8x16x128xf32> to vector<128x128xf32>
    %119 = arith.truncf %118 : vector<128x128xf32> to vector<128x128xbf16>
    %c0_104 = arith.constant 0 : index
    %c1_105 = arith.constant 1 : index
    %c0_106 = arith.constant 0 : index
    %c0_107 = arith.constant 0 : index
    %120 = vector.load %arg5[%c0_104, %c1_105, %c0_106, %c0_107] : memref<3x3x128x128xbf16, #tpu.memory_space<vmem>>, vector<1x1x128x128xbf16>
    %121 = vector.shape_cast %120 : vector<1x1x128x128xbf16> to vector<128x128xbf16>
    %cst_108 = arith.constant dense<0.000000e+00> : vector<128x128xf32>
    %122 = tpu.matmul %119, %121, %cst_108 {dimension_numbers = #tpu.dot_dimension_numbers<[1], [0], [0], [1], [0, 0, 1, 1], [], []>} : vector<128x128xbf16>, vector<128x128xbf16>, vector<128x128xf32> -> vector<128x128xf32>
    %123 = arith.addf %116, %122 : vector<128x128xf32>
    %c0_109 = arith.constant 0 : index
    %c2_110 = arith.constant 2 : index
    %c0_111 = arith.constant 0 : index
    %124 = vector.load %arg9[%c0_109, %c2_110, %c0_111] : memref<10x18x128xf32, #tpu.memory_space<vmem>>, vector<8x16x128xf32>
    %125 = vector.shape_cast %124 : vector<8x16x128xf32> to vector<128x128xf32>
    %126 = arith.truncf %125 : vector<128x128xf32> to vector<128x128xbf16>
    %c0_112 = arith.constant 0 : index
    %c2_113 = arith.constant 2 : index
    %c0_114 = arith.constant 0 : index
    %c0_115 = arith.constant 0 : index
    %127 = vector.load %arg5[%c0_112, %c2_113, %c0_114, %c0_115] : memref<3x3x128x128xbf16, #tpu.memory_space<vmem>>, vector<1x1x128x128xbf16>
    %128 = vector.shape_cast %127 : vector<1x1x128x128xbf16> to vector<128x128xbf16>
    %cst_116 = arith.constant dense<0.000000e+00> : vector<128x128xf32>
    %129 = tpu.matmul %126, %128, %cst_116 {dimension_numbers = #tpu.dot_dimension_numbers<[1], [0], [0], [1], [0, 0, 1, 1], [], []>} : vector<128x128xbf16>, vector<128x128xbf16>, vector<128x128xf32> -> vector<128x128xf32>
    %130 = arith.addf %123, %129 : vector<128x128xf32>
    %c1_117 = arith.constant 1 : index
    %c0_118 = arith.constant 0 : index
    %c0_119 = arith.constant 0 : index
    %131 = vector.load %arg9[%c1_117, %c0_118, %c0_119] : memref<10x18x128xf32, #tpu.memory_space<vmem>>, vector<8x16x128xf32>
    %132 = vector.shape_cast %131 : vector<8x16x128xf32> to vector<128x128xf32>
    %133 = arith.truncf %132 : vector<128x128xf32> to vector<128x128xbf16>
    %c1_120 = arith.constant 1 : index
    %c0_121 = arith.constant 0 : index
    %c0_122 = arith.constant 0 : index
    %c0_123 = arith.constant 0 : index
    %134 = vector.load %arg5[%c1_120, %c0_121, %c0_122, %c0_123] : memref<3x3x128x128xbf16, #tpu.memory_space<vmem>>, vector<1x1x128x128xbf16>
    %135 = vector.shape_cast %134 : vector<1x1x128x128xbf16> to vector<128x128xbf16>
    %cst_124 = arith.constant dense<0.000000e+00> : vector<128x128xf32>
    %136 = tpu.matmul %133, %135, %cst_124 {dimension_numbers = #tpu.dot_dimension_numbers<[1], [0], [0], [1], [0, 0, 1, 1], [], []>} : vector<128x128xbf16>, vector<128x128xbf16>, vector<128x128xf32> -> vector<128x128xf32>
    %137 = arith.addf %130, %136 : vector<128x128xf32>
    %c1_125 = arith.constant 1 : index
    %c1_126 = arith.constant 1 : index
    %c0_127 = arith.constant 0 : index
    %138 = vector.load %arg9[%c1_125, %c1_126, %c0_127] : memref<10x18x128xf32, #tpu.memory_space<vmem>>, vector<8x16x128xf32>
    %139 = vector.shape_cast %138 : vector<8x16x128xf32> to vector<128x128xf32>
    %140 = arith.truncf %139 : vector<128x128xf32> to vector<128x128xbf16>
    %c1_128 = arith.constant 1 : index
    %c1_129 = arith.constant 1 : index
    %c0_130 = arith.constant 0 : index
    %c0_131 = arith.constant 0 : index
    %141 = vector.load %arg5[%c1_128, %c1_129, %c0_130, %c0_131] : memref<3x3x128x128xbf16, #tpu.memory_space<vmem>>, vector<1x1x128x128xbf16>
    %142 = vector.shape_cast %141 : vector<1x1x128x128xbf16> to vector<128x128xbf16>
    %cst_132 = arith.constant dense<0.000000e+00> : vector<128x128xf32>
    %143 = tpu.matmul %140, %142, %cst_132 {dimension_numbers = #tpu.dot_dimension_numbers<[1], [0], [0], [1], [0, 0, 1, 1], [], []>} : vector<128x128xbf16>, vector<128x128xbf16>, vector<128x128xf32> -> vector<128x128xf32>
    %144 = arith.addf %137, %143 : vector<128x128xf32>
    %c1_133 = arith.constant 1 : index
    %c2_134 = arith.constant 2 : index
    %c0_135 = arith.constant 0 : index
    %145 = vector.load %arg9[%c1_133, %c2_134, %c0_135] : memref<10x18x128xf32, #tpu.memory_space<vmem>>, vector<8x16x128xf32>
    %146 = vector.shape_cast %145 : vector<8x16x128xf32> to vector<128x128xf32>
    %147 = arith.truncf %146 : vector<128x128xf32> to vector<128x128xbf16>
    %c1_136 = arith.constant 1 : index
    %c2_137 = arith.constant 2 : index
    %c0_138 = arith.constant 0 : index
    %c0_139 = arith.constant 0 : index
    %148 = vector.load %arg5[%c1_136, %c2_137, %c0_138, %c0_139] : memref<3x3x128x128xbf16, #tpu.memory_space<vmem>>, vector<1x1x128x128xbf16>
    %149 = vector.shape_cast %148 : vector<1x1x128x128xbf16> to vector<128x128xbf16>
    %cst_140 = arith.constant dense<0.000000e+00> : vector<128x128xf32>
    %150 = tpu.matmul %147, %149, %cst_140 {dimension_numbers = #tpu.dot_dimension_numbers<[1], [0], [0], [1], [0, 0, 1, 1], [], []>} : vector<128x128xbf16>, vector<128x128xbf16>, vector<128x128xf32> -> vector<128x128xf32>
    %151 = arith.addf %144, %150 : vector<128x128xf32>
    %c2_141 = arith.constant 2 : index
    %c0_142 = arith.constant 0 : index
    %c0_143 = arith.constant 0 : index
    %152 = vector.load %arg9[%c2_141, %c0_142, %c0_143] : memref<10x18x128xf32, #tpu.memory_space<vmem>>, vector<8x16x128xf32>
    %153 = vector.shape_cast %152 : vector<8x16x128xf32> to vector<128x128xf32>
    %154 = arith.truncf %153 : vector<128x128xf32> to vector<128x128xbf16>
    %c2_144 = arith.constant 2 : index
    %c0_145 = arith.constant 0 : index
    %c0_146 = arith.constant 0 : index
    %c0_147 = arith.constant 0 : index
    %155 = vector.load %arg5[%c2_144, %c0_145, %c0_146, %c0_147] : memref<3x3x128x128xbf16, #tpu.memory_space<vmem>>, vector<1x1x128x128xbf16>
    %156 = vector.shape_cast %155 : vector<1x1x128x128xbf16> to vector<128x128xbf16>
    %cst_148 = arith.constant dense<0.000000e+00> : vector<128x128xf32>
    %157 = tpu.matmul %154, %156, %cst_148 {dimension_numbers = #tpu.dot_dimension_numbers<[1], [0], [0], [1], [0, 0, 1, 1], [], []>} : vector<128x128xbf16>, vector<128x128xbf16>, vector<128x128xf32> -> vector<128x128xf32>
    %158 = arith.addf %151, %157 : vector<128x128xf32>
    %c2_149 = arith.constant 2 : index
    %c1_150 = arith.constant 1 : index
    %c0_151 = arith.constant 0 : index
    %159 = vector.load %arg9[%c2_149, %c1_150, %c0_151] : memref<10x18x128xf32, #tpu.memory_space<vmem>>, vector<8x16x128xf32>
    %160 = vector.shape_cast %159 : vector<8x16x128xf32> to vector<128x128xf32>
    %161 = arith.truncf %160 : vector<128x128xf32> to vector<128x128xbf16>
    %c2_152 = arith.constant 2 : index
    %c1_153 = arith.constant 1 : index
    %c0_154 = arith.constant 0 : index
    %c0_155 = arith.constant 0 : index
    %162 = vector.load %arg5[%c2_152, %c1_153, %c0_154, %c0_155] : memref<3x3x128x128xbf16, #tpu.memory_space<vmem>>, vector<1x1x128x128xbf16>
    %163 = vector.shape_cast %162 : vector<1x1x128x128xbf16> to vector<128x128xbf16>
    %cst_156 = arith.constant dense<0.000000e+00> : vector<128x128xf32>
    %164 = tpu.matmul %161, %163, %cst_156 {dimension_numbers = #tpu.dot_dimension_numbers<[1], [0], [0], [1], [0, 0, 1, 1], [], []>} : vector<128x128xbf16>, vector<128x128xbf16>, vector<128x128xf32> -> vector<128x128xf32>
    %165 = arith.addf %158, %164 : vector<128x128xf32>
    %c2_157 = arith.constant 2 : index
    %c2_158 = arith.constant 2 : index
    %c0_159 = arith.constant 0 : index
    %166 = vector.load %arg9[%c2_157, %c2_158, %c0_159] : memref<10x18x128xf32, #tpu.memory_space<vmem>>, vector<8x16x128xf32>
    %167 = vector.shape_cast %166 : vector<8x16x128xf32> to vector<128x128xf32>
    %168 = arith.truncf %167 : vector<128x128xf32> to vector<128x128xbf16>
    %c2_160 = arith.constant 2 : index
    %c2_161 = arith.constant 2 : index
    %c0_162 = arith.constant 0 : index
    %c0_163 = arith.constant 0 : index
    %169 = vector.load %arg5[%c2_160, %c2_161, %c0_162, %c0_163] : memref<3x3x128x128xbf16, #tpu.memory_space<vmem>>, vector<1x1x128x128xbf16>
    %170 = vector.shape_cast %169 : vector<1x1x128x128xbf16> to vector<128x128xbf16>
    %cst_164 = arith.constant dense<0.000000e+00> : vector<128x128xf32>
    %171 = tpu.matmul %168, %170, %cst_164 {dimension_numbers = #tpu.dot_dimension_numbers<[1], [0], [0], [1], [0, 0, 1, 1], [], []>} : vector<128x128xbf16>, vector<128x128xbf16>, vector<128x128xf32> -> vector<128x128xf32>
    %172 = arith.addf %165, %171 : vector<128x128xf32>
    %c0_165 = arith.constant 0 : index
    %c0_166 = arith.constant 0 : index
    %173 = vector.load %arg6[%c0_165, %c0_166] : memref<1x128xf32, #tpu.memory_space<vmem>>, vector<1x128xf32>
    %174 = vector.broadcast %173 : vector<1x128xf32> to vector<128x128xf32>
    %175 = arith.addf %172, %174 : vector<128x128xf32>
    %c1_i32_167 = arith.constant 1 : i32
    %176 = arith.addi %0, %c1_i32_167 : i32
    %c1_i32_168 = arith.constant 1 : i32
    %177 = arith.addi %176, %c1_i32_168 : i32
    %c0_169 = arith.constant 0 : index
    %178 = arith.index_cast %177 : i32 to index
    %c1_170 = arith.constant 1 : index
    %c0_171 = arith.constant 0 : index
    %179 = vector.load %arg2[%c0_169, %178, %c1_170, %c0_171] : memref<1x20x18x128xf32, #tpu.memory_space<vmem>>, vector<1x8x16x128xf32>
    %180 = vector.shape_cast %179 : vector<1x8x16x128xf32> to vector<8x16x128xf32>
    %181 = vector.shape_cast %180 : vector<8x16x128xf32> to vector<128x128xf32>
    %182 = arith.truncf %181 : vector<128x128xf32> to vector<128x128xbf16>
    %c0_172 = arith.constant 0 : index
    %c0_173 = arith.constant 0 : index
    %183 = vector.load %arg7[%c0_172, %c0_173] : memref<128x128xbf16, #tpu.memory_space<vmem>>, vector<128x128xbf16>
    %cst_174 = arith.constant dense<0.000000e+00> : vector<128x128xf32>
    %184 = tpu.matmul %182, %183, %cst_174 {dimension_numbers = #tpu.dot_dimension_numbers<[1], [0], [0], [1], [0, 0, 1, 1], [], []>} : vector<128x128xbf16>, vector<128x128xbf16>, vector<128x128xf32> -> vector<128x128xf32>
    %185 = arith.addf %175, %184 : vector<128x128xf32>
    %cst_175 = arith.constant 0.000000e+00 : f32
    %186 = vector.broadcast %cst_175 : f32 to vector<128x128xf32>
    %187 = arith.maximumf %185, %186 : vector<128x128xf32>
    %188 = vector.shape_cast %187 : vector<128x128xf32> to vector<8x16x128xf32>
    %c0_176 = arith.constant 0 : index
    %c0_177 = arith.constant 0 : index
    %c0_178 = arith.constant 0 : index
    %c0_179 = arith.constant 0 : index
    %189 = vector.load %arg8[%c0_176, %c0_177, %c0_178, %c0_179] : memref<1x8x16x128xf32, #tpu.memory_space<vmem>>, vector<1x8x16x128xf32>
    %190 = vector.shape_cast %189 : vector<1x8x16x128xf32> to vector<8x16x128xf32>
    %191 = vector.shape_cast %188 : vector<8x16x128xf32> to vector<1x8x16x128xf32>
    tpu.vector_store %arg8[%c0_176, %c0_177, %c0_178, %c0_179], %191 {strides = array<i32>} : memref<1x8x16x128xf32, #tpu.memory_space<vmem>>, vector<1x8x16x128xf32>,
    return
  }
  func.func @transform_0(%arg0: i32, %arg1: i32) -> (i32, i32, i32, i32) {
    %c0_i32 = arith.constant 0 : i32
    %c0_i32_0 = arith.constant 0 : i32
    %c0_i32_1 = arith.constant 0 : i32
    %c0_i32_2 = arith.constant 0 : i32
    return %arg0, %c0_i32, %c0_i32_0, %c0_i32_1 : i32, i32, i32, i32
  }
  func.func @transform_1(%arg0: i32, %arg1: i32) -> (i32, i32, i32, i32) {
    %c0_i32 = arith.constant 0 : i32
    %c0_i32_0 = arith.constant 0 : i32
    %c0_i32_1 = arith.constant 0 : i32
    %c0_i32_2 = arith.constant 0 : i32
    %c0_i32_3 = arith.constant 0 : i32
    return %c0_i32, %c0_i32_0, %c0_i32_1, %c0_i32_2 : i32, i32, i32, i32
  }
  func.func @transform_2(%arg0: i32, %arg1: i32) -> (i32, i32) {
    %c0_i32 = arith.constant 0 : i32
    %c0_i32_0 = arith.constant 0 : i32
    %c0_i32_1 = arith.constant 0 : i32
    return %c0_i32, %c0_i32_0 : i32, i32
  }
  func.func @transform_3(%arg0: i32, %arg1: i32) -> (i32, i32, i32, i32) {
    %c0_i32 = arith.constant 0 : i32
    %c0_i32_0 = arith.constant 0 : i32
    %c0_i32_1 = arith.constant 0 : i32
    %c0_i32_2 = arith.constant 0 : i32
    %c0_i32_3 = arith.constant 0 : i32
    return %c0_i32, %c0_i32_0, %c0_i32_1, %c0_i32_2 : i32, i32, i32, i32
  }
  func.func @transform_4(%arg0: i32, %arg1: i32) -> (i32, i32) {
    %c0_i32 = arith.constant 0 : i32
    %c0_i32_0 = arith.constant 0 : i32
    %c0_i32_1 = arith.constant 0 : i32
    return %c0_i32, %c0_i32_0 : i32, i32
  }
  func.func @transform_5(%arg0: i32, %arg1: i32) -> (i32, i32) {
    %c0_i32 = arith.constant 0 : i32
    %c0_i32_0 = arith.constant 0 : i32
    %c0_i32_1 = arith.constant 0 : i32
    return %c0_i32, %c0_i32_0 : i32, i32
  }
  func.func @transform_6(%arg0: i32, %arg1: i32) -> (i32, i32, i32, i32) {
    %c0_i32 = arith.constant 0 : i32
    %c0_i32_0 = arith.constant 0 : i32
    %c0_i32_1 = arith.constant 0 : i32
    return %arg0, %arg1, %c0_i32, %c0_i32_0 : i32, i32, i32, i32
  }
}

</mosaic_0001>

<bundles_post_ra>
// kernel: residual_block_pallas.1
= control target key start
LH: loop header
LB: loop body
LE: loop exit
PB: predicated region body
PF: predicated region fallthrough
CT: control target
= control target key end

     0   :  { %s6365_s21 = smov 0   ;;  %s6367_s22 = smov 0   ;;  %s7750_s0 = inlined_call_operand.vmem [shape: f32[2,20,18,128], index: 0, kind: input, shape index: {}]   ;;  %s7751_s1 = inlined_call_operand.vmem [shape: bf16[3,3,128,128], index: 1, kind: input, shape index: {}]   ;;  %s7752_s2 = inlined_call_operand.vmem [shape: f32[1,128], index: 2, kind: input, shape index: {}]   ;;  %s7753_s3 = inlined_call_operand.vmem [shape: bf16[3,3,128,128], index: 3, kind: input, shape index: {}]   ;;  %s7754_s4 = inlined_call_operand.vmem [shape: f32[1,128], index: 4, kind: input, shape index: {}]   ;;  %s7755_s5 = inlined_call_operand.vmem [shape: bf16[128,128], index: 5, kind: input, shape index: {}]   ;;  %s7756_s6 = inlined_call_operand.vmem [shape: f32[2,16,16,128], index: 6, kind: output, shape index: {}]  }
   0x1   :  { %s6369_s23 = smov 0   ;;  %s6371_s24 = smov 0  }
   0x2   :  { %s6373_s25 = smov 0  }
   0x3 LB: > { %s25_s26 = sadd.s32 1, %s6317_s23  ;;  %s28_s27 = sadd.s32 1, %s6321_s24  ;;  %s6325_s25 = sphi %s6373_s25, %s16_s25   ;;  %s6321_s24 = sphi %s6371_s24, %s7788_s24   ;;  %s6317_s23 = sphi %s6369_s23, %s7787_s23   ;;  %s6313_s22 = sphi %s6367_s22, %s7786_s22   ;;  %s6309_s21 = sphi %s6365_s21, %s7785_s21  }
   0x4   : > { %p26_p0 = scmp.ge.s32.totalorder %s25_s26, 2  ;;  %p4547_p1 = scmp.ge.s32.totalorder %s6325_s25, 1 }
   0x5   : > { %p226_p2 = scmp.lt.s32.totalorder %s6325_s25, 5 }
   0x6   : > { %s7790_s26 = smov (%p26_p0, %s25_s26), 0  ;;  %s7792_s27 = smov (!%p26_p0, %s28_s27), %s6321_s24 }
   0x7   : > { %p227_p3 = pnand %p4547_p1, %p226_p2  ;;  %p30_p4 = scmp.ge.s32.totalorder %s7792_s27, 2 }
   0x9   : > { %s7794_s27 = smov (%p30_p4, %s7792_s27), 0  ;;  %230 = sbr.rel (%p227_p3) target bundleno = 871 (0x367), region = 44 }
   0xe   : > { %v6135_v0 = vld [vmem:[%s7751_s1 + $0x78] sm:$0xff]   ;;  %p261_p5 = scmp.lt.s32.totalorder %s6313_s22, 1  ;;  %s4549_s8 = sshll.u32 %s6309_s21, 3  ;;  %v6137_v2 = vld [vmem:[%s7751_s1 + $0x70] sm:$0xff]   ;;  %v6139_v4 = vld [vmem:[%s7751_s1 + $0x68] sm:$0xff]  }
   0xf   : > { %v6136_v1 = vld [vmem:[%s7751_s1 + $0x38] sm:$0xff]   ;;  %5431 = vmatprep.subr.bf16.mxu0 %v6135_v0  ;;  %v6138_v3 = vld [vmem:[%s7751_s1 + $0x30] sm:$0xff]   ;;  %p269_p6 = scmp.lt.s32.totalorder %s4549_s8, 15  ;;  %v6140_v5 = vld [vmem:[%s7751_s1 + $0x28] sm:$0xff]   ;;  %s4554_s10 = smul.u32 192, %s6309_s21 }
  0x10   : > { %s7796_s22 = smov (!%p261_p5, %s6313_s22), 1  ;;  %5467 = vmatprep.subr.bf16.mxu1 %v6136_v1  ;;  %5432 = vmatpush3.bf16.msra.mxu0 %v6135_v0  ;;  %v6141_v6 = vld [vmem:[%s7751_s1 + $0x60] sm:$0xff]   ;;  %v6143_v8 = vld [vmem:[%s7751_s1 + $0x58] sm:$0xff]   ;;  %v6145_v10 = vld [vmem:[%s7751_s1 + $0x50] sm:$0xff]   ;;  %p4880_p7 = scmp.ne.s32.totalorder %s6309_s21, 0 }
  0x11   : > { %5468 = vmatpush3.bf16.msra.mxu1 %v6136_v1  ;;  %5433 = vmatprep.subr.bf16.mxu0 %v6137_v2  ;;  %s7798_s8 = smov (!%p269_p6, %s4549_s8), 15  ;;  %s6091_s17 = smul.u32 480, %s7796_s22  ;;  %v6142_v7 = vld [vmem:[%s7751_s1 + $0x20] sm:$0xff]   ;;  %v6144_v9 = vld [vmem:[%s7751_s1 + $0x18] sm:$0xff]   ;;  %v6146_v14 = vld [vmem:[%s7751_s1 + $0x10] sm:$0xff]  }
  0x12   : > { %5469 = vmatprep.subr.bf16.mxu1 %v6138_v3  ;;  %s4551_s18 = sshll.u32 %s7796_s22, 5  ;;  %s4550_s28 = sshll.u32 %s7798_s8, 1  ;;  %v6147_v18 = vld [vmem:[%s7751_s1 + $0x48] sm:$0xff]   ;;  %v6149_v20 = vld [vmem:[%s7751_s1 + $0x40] sm:$0xff]   ;;  %v6151_v26 = vld [vmem:[%s7751_s1 + $0xb8] sm:$0xff]  }
  0x13   : > { %s273_s7 = sadd.s32 %s4551_s18, %s4550_s28  ;;  %s265_s22 = scalar_lea.vmem %s7750_s0, %s6091_s17  ;;  %v6148_v19 = vld [vmem:[%s7751_s1 + $0x8] sm:$0xff]   ;;  %v6150_v21 = vld [vmem:[%s7751_s1] sm:$0xff]   ;;  %v6154_v30 = vld [vmem:[%s7751_s1 + $0xf8] sm:$0xff]  }
  0x14   : > { %5434 = vmatpush3.bf16.msra.mxu0 %v6137_v2  ;;  %s4552_s9 = sshll.u32 %s273_s7, 3  ;;  %s6437_s20 = scalar_lea.vmem %s265_s22, %s4554_s10  ;;  %v6152_v34 = vld [vmem:[%s7751_s1 + $0xb0] sm:$0xff]   ;;  %v6153_v41 = vld [vmem:[%s7751_s1 + $0xa8] sm:$0xff]   ;;  %v6156_v52 = vld [vmem:[%s7751_s1 + $0xa0] sm:$0xff]  }
  0x15   : > { %5470 = vmatpush3.bf16.msra.mxu1 %v6138_v3  ;;  %5435 = vmatprep.subr.bf16.mxu0 %v6139_v4  ;;  %s6429_s15 = scalar_lea.vmem %s7756_s6, %s4552_s9  ;;  %v327_v11 = vld [vmem:[%s6437_s20 + $0x1] sm:$0xff]  ;;  %v328_v12 = vld [vmem:[%s6437_s20 + $0x9] sm:$0xff]  ;;  %v329_v22 = vld [vmem:[%s6437_s20 + $0x19] sm:$0xff] }
  0x16   : > { %5471 = vmatprep.subr.bf16.mxu1 %v6140_v5  ;;  %v281_v13 = vld [vmem:[%s6437_s20] sm:$0xff]  ;;  %v347_v15 = vpack.c.bf16 %v328_v12, %v327_v11  ;;  %v282_v16 = vld [vmem:[%s6437_s20 + $0x8] sm:$0xff]  ;;  %v283_v24 = vld [vmem:[%s6437_s20 + $0x18] sm:$0xff] }
  0x17   : > { %v301_v17 = vpack.c.bf16 %v282_v16, %v281_v13  ;;  %v330_v23 = vld [vmem:[%s6437_s20 + $0x21] sm:$0xff]  ;;  %v331_v27 = vld [vmem:[%s6437_s20 + $0x31] sm:$0xff]  ;;  %v332_v28 = vld [vmem:[%s6437_s20 + $0x39] sm:$0xff] }
  0x18   : > { %5436 = vmatpush3.bf16.msra.mxu0 %v6139_v4  ;;  %5447 = vmatprep.mubr.bf16.mxu0 %v347_v15  ;;  %v284_v25 = vld [vmem:[%s6437_s20 + $0x20] sm:$0xff]  ;;  %v285_v29 = vld [vmem:[%s6437_s20 + $0x30] sm:$0xff]  ;;  %v6474_v31 = vpack.c.bf16 %v330_v23, %v329_v22  ;;  %v286_v32 = vld [vmem:[%s6437_s20 + $0x38] sm:$0xff]  ;;  %v6482_v35 = vpack.c.bf16 %v332_v28, %v331_v27 }
  0x19   : > { %5472 = vmatpush3.bf16.msra.mxu1 %v6140_v5  ;;  %5437 = vmatprep.subr.bf16.mxu0 %v6141_v6  ;;  %v6477_v33 = vpack.c.bf16 %v284_v25, %v283_v24  ;;  %v6484_v36 = vpack.c.bf16 %v286_v32, %v285_v29  ;;  %v333_v37 = vld [vmem:[%s6437_s20 + $0x49] sm:$0xff]  ;;  %v334_v38 = vld [vmem:[%s6437_s20 + $0x51] sm:$0xff]  ;;  %v335_v43 = vld [vmem:[%s6437_s20 + $0x61] sm:$0xff] }
  0x1a   : > { %5473 = vmatprep.subr.bf16.mxu1 %v6142_v7  ;;  %5483 = vmatprep.mubr.bf16.mxu1 %v301_v17  ;;  %v287_v39 = vld [vmem:[%s6437_s20 + $0x48] sm:$0xff]  ;;  %v288_v40 = vld [vmem:[%s6437_s20 + $0x50] sm:$0xff]  ;;  %v289_v45 = vld [vmem:[%s6437_s20 + $0x60] sm:$0xff]  ;;  %v6504_v47 = vpack.c.bf16 %v334_v38, %v333_v37 }
  0x1b   : > { %v6155_v42 = vld [vmem:[%s7751_s1 + $0xf0] sm:$0xff]   ;;  %v290_v46 = vld [vmem:[%s6437_s20 + $0x68] sm:$0xff]  ;;  %v6509_v49 = vpack.c.bf16 %v288_v40, %v287_v39  ;;  %v337_v53 = vld [vmem:[%s6437_s20 + $0x79] sm:$0xff] }
  0x1c   : > { %5438 = vmatpush3.bf16.msra.mxu0 %v6141_v6  ;;  %v336_v44 = vld [vmem:[%s6437_s20 + $0x69] sm:$0xff]  ;;  %v6513_v51 = vpack.c.bf16 %v290_v46, %v289_v45  ;;  %v338_v54 = vld [vmem:[%s6437_s20 + $0x81] sm:$0xff]  ;;  %v291_v55 = vld [vmem:[%s6437_s20 + $0x78] sm:$0xff] }
  0x1d   : > { %5474 = vmatpush3.bf16.msra.mxu1 %v6142_v7  ;;  %5439 = vmatprep.subr.bf16.mxu0 %v6143_v8  ;;  %v6157_v48 = vld [vmem:[%s7751_s1 + $0xe8] sm:$0xff]   ;;  %v6511_v50 = vpack.c.bf16 %v336_v44, %v335_v43  ;;  %v292_v56 = vld [vmem:[%s6437_s20 + $0x80] sm:$0xff]  ;;  %v6158_v58 = vld [vmem:[%s7751_s1 + $0x98] sm:$0xff]   ;;  %v6536_v63 = vpack.c.bf16 %v338_v54, %v337_v53 }
  0x1e   : > { %5475 = vmatprep.subr.bf16.mxu1 %v6144_v9  ;;  %v6159_v57 = vld [vmem:[%s7751_s1 + $0xe0] sm:$0xff]   ;;  %v339_v59 = vld [vmem:[%s6437_s20 + $0x91] sm:$0xff]  ;;  %v6541_v1 = vpack.c.bf16 %v292_v56, %v291_v55  ;;  %v341_v4 = vld [vmem:[%s6437_s20 + $0xa9] sm:$0xff] }
  0x1f   : > { %v340_v60 = vld [vmem:[%s6437_s20 + $0x99] sm:$0xff]  ;;  %v293_v61 = vld [vmem:[%s6437_s20 + $0x90] sm:$0xff]  ;;  %v295_v7 = vld [vmem:[%s6437_s20 + $0xa8] sm:$0xff] }
  0x20   : > { %5440 = vmatpush3.bf16.msra.mxu0 %v6143_v8  ;;  %v294_v62 = vld [vmem:[%s6437_s20 + $0x98] sm:$0xff]  ;;  %v6543_v2 = vpack.c.bf16 %v340_v60, %v339_v59  ;;  %v6160_v6 = vld [vmem:[%s7751_s1 + $0x90] sm:$0xff]   ;;  %v343_v11 = vld [vmem:[%s6437_s20 + $0xc1] sm:$0xff] }
  0x21   : > { %5476 = vmatpush3.bf16.msra.mxu1 %v6144_v9  ;;  %5441 = vmatprep.subr.bf16.mxu0 %v6145_v10  ;;  %v6161_v0 = vld [vmem:[%s7751_s1 + $0xd8] sm:$0xff]   ;;  %v6545_v3 = vpack.c.bf16 %v294_v62, %v293_v61  ;;  %v296_v8 = vld [vmem:[%s6437_s20 + $0xb0] sm:$0xff]  ;;  %v6162_v9 = vld [vmem:[%s7751_s1 + $0x88] sm:$0xff]  }
  0x22   : > { %5477 = vmatprep.subr.bf16.mxu1 %v6146_v14  ;;  %v342_v5 = vld [vmem:[%s6437_s20 + $0xb1] sm:$0xff]  ;;  %v344_v12 = vld [vmem:[%s6437_s20 + $0xc9] sm:$0xff]  ;;  %v297_v13 = vld [vmem:[%s6437_s20 + $0xc0] sm:$0xff]  ;;  %v6573_v17 = vpack.c.bf16 %v296_v8, %v295_v7 }
  0x23   : > { %v6568_v15 = vpack.c.bf16 %v342_v5, %v341_v4  ;;  %v6164_v16 = vld [vmem:[%s7751_s1 + $0xc8] sm:$0xff]   ;;  %v299_v23 = vld [vmem:[%s6437_s20 + $0xd8] sm:$0xff]  ;;  %v6166_v24 = vld [vmem:[%s7751_s1 + $0xc0] sm:$0xff]  }
  0x24   : > { %5442 = vmatpush3.bf16.msra.mxu0 %v6145_v10  ;;  %v6163_v10 = vld [vmem:[%s7751_s1 + $0xd0] sm:$0xff]   ;;  %v346_v22 = vld [vmem:[%s6437_s20 + $0xe1] sm:$0xff]  ;;  %v6167_v28 = vld [vmem:[%s7751_s1 + $0x138] sm:$0xff]  }
  0x25   : > { %5478 = vmatpush3.bf16.msra.mxu1 %v6146_v14  ;;  %5443 = vmatprep.subr.bf16.mxu0 %v6147_v18  ;;  %v298_v14 = vld [vmem:[%s6437_s20 + $0xc8] sm:$0xff]  ;;  %v300_v25 = vld [vmem:[%s6437_s20 + $0xe0] sm:$0xff]  ;;  %v700_v39 = vld [vmem:[%s6437_s20 + $0x32] sm:$0xff] }
  0x26   : > { %5479 = vmatprep.subr.bf16.mxu1 %v6148_v19  ;;  %v697_v27 = vld [vmem:[%s6437_s20 + $0xa] sm:$0xff]  ;;  %v6603_v32 = vpack.c.bf16 %v300_v25, %v299_v23  ;;  %v698_v37 = vld [vmem:[%s6437_s20 + $0x1a] sm:$0xff]  ;;  %v699_v38 = vld [vmem:[%s6437_s20 + $0x22] sm:$0xff] }
  0x27   : > { %v701_v40 = vld [vmem:[%s6437_s20 + $0x3a] sm:$0xff]  ;;  %v702_v44 = vld [vmem:[%s6437_s20 + $0x4a] sm:$0xff]  ;;  %v703_v45 = vld [vmem:[%s6437_s20 + $0x52] sm:$0xff] }
  0x28   : > { %5444 = vmatpush3.bf16.msra.mxu0 %v6147_v18  ;;  %v6575_v18 = vpack.c.bf16 %v344_v12, %v343_v11  ;;  %v6617_v43 = vpack.c.bf16 %v701_v40, %v700_v39  ;;  %v6171_v46 = vld [vmem:[%s7751_s1 + $0x170] sm:$0xff]   ;;  %v6633_v53 = vpack.c.bf16 %v703_v45, %v702_v44  ;;  %v6173_v54 = vld [vmem:[%s7751_s1 + $0x168] sm:$0xff]   ;;  %v6172_v56 = vld [vmem:[%s7751_s1 + $0x120] sm:$0xff]  }
  0x29   : > { %5480 = vmatpush3.bf16.msra.mxu1 %v6148_v19  ;;  %5445 = vmatprep.subr.bf16.mxu0 %v6149_v20  ;;  %v6577_v19 = vpack.c.bf16 %v298_v14, %v297_v13  ;;  %v6175_v59 = vld [vmem:[%s7751_s1 + $0x160] sm:$0xff]   ;;  %v6174_v60 = vld [vmem:[%s7751_s1 + $0x118] sm:$0xff]   ;;  %v6176_v8 = vld [vmem:[%s7751_s1 + $0x110] sm:$0xff]  }
  0x2a   : > { %5481 = vmatprep.subr.bf16.mxu1 %v6150_v21  ;;  %v708_v61 = vld [vmem:[%s6437_s20 + $0x92] sm:$0xff]  ;;  %v709_v62 = vld [vmem:[%s6437_s20 + $0x9a] sm:$0xff]  ;;  %v712_v11 = vld [vmem:[%s6437_s20 + $0xc2] sm:$0xff] }
  0x2b   : > { %v6177_v4 = vld [vmem:[%s7751_s1 + $0x158] sm:$0xff]   ;;  %v6662_v5 = vpack.c.bf16 %v709_v62, %v708_v61  ;;  %v713_v12 = vld [vmem:[%s6437_s20 + $0xca] sm:$0xff]  ;;  %v715_v23 = vld [vmem:[%s6437_s20 + $0xe2] sm:$0xff] }
  0x2c   : > { %5446 = vmatpush3.bf16.msra.mxu0 %v6149_v20  ;;  %v345_v20 = vld [vmem:[%s6437_s20 + $0xd9] sm:$0xff]  ;;  %v6180_v14 = vld [vmem:[%s7751_s1 + $0x148] sm:$0xff]   ;;  %v6192_v44 = vld [vmem:[%s7751_s1 + $0x190] sm:$0xff]  }
  0x2d   : > { %5482 = vmatpush3.bf16.msra.mxu1 %v6150_v21  ;;  %5503 = vmatprep.subr.bf16.mxu0 %v6151_v26  ;;  %v6165_v21 = vld [vmem:[%s7751_s1 + $0x80] sm:$0xff]   ;;  %v6598_v29 = vpack.c.bf16 %v346_v22, %v345_v20  ;;  %v711_v7 = vld [vmem:[%s6437_s20 + $0xb2] sm:$0xff] }
  0x2e   : > { %5539 = vmatprep.subr.bf16.mxu1 %v6154_v30  ;;  %v6181_v20 = vld [vmem:[%s7751_s1 + $0x100] sm:$0xff]   ;;  %v4632_v25 = vld [vmem:[%s6437_s20 + $0xf8] sm:$0xff]  ;;  %v6195_v45 = vld [vmem:[%s7751_s1 + $0x1d0] sm:$0xff]  }
  0x2f   : > { %5448 = vmatmul.mubr.bf16.vlgmr.msra.gmra.mxu0 %v6474_v31  ;;  %v714_v22 = vld [vmem:[%s6437_s20 + $0xda] sm:$0xff]  ;;  %v6200_v62 = vld [vmem:[%s7751_s1 + $0x230] sm:$0xff]  }
  0x30   : > { %5484 = vmatmul.mubr.bf16.vlgmr.msra.gmra.mxu1 %v6477_v33  ;;  %5504 = vmatpush3.bf16.msra.mxu0 %v6151_v26  ;;  %v696_v26 = vld [vmem:[%s6437_s20 + $0x2] sm:$0xff] }
  0x31   : > { %5505 = vmatprep.subr.bf16.mxu0 %v6152_v34  ;;  %5451 = vmatprep.mubr.bf16.mxu0 %v6482_v35  ;;  %v6188_v39 = vld [vmem:[%s7751_s1 + $0x1a0] sm:$0xff]  }
  0x32   : > { %5487 = vmatprep.mubr.bf16.mxu1 %v6484_v36  ;;  %5540 = vmatpush3.bf16.msra.mxu1 %v6154_v30  ;;  %v6170_v30 = vld [vmem:[%s7751_s1 + $0x178] sm:$0xff]   ;;  %v6191_v40 = vld [vmem:[%s7751_s1 + $0x1e0] sm:$0xff]  }
  0x33   : > { %5541 = vmatprep.subr.bf16.mxu1 %v6155_v42 }
  0x34   : > { %5506 = vmatpush3.bf16.msra.mxu0 %v6152_v34  ;;  %v716_v34 = vpack.c.bf16 %v697_v27, %v696_v26  ;;  %v6183_v26 = vld [vmem:[%s7751_s1 + $0x1b8] sm:$0xff]   ;;  %v6705_v27 = vpack.c.bf16 %v715_v23, %v714_v22 }
  0x35   : > { %5507 = vmatprep.subr.bf16.mxu0 %v6153_v41 }
  0x36   : > { %5542 = vmatpush3.bf16.msra.mxu1 %v6155_v42  ;;  %v6168_v42 = vld [vmem:[%s7751_s1 + $0x130] sm:$0xff]  }
  0x37   : > { %5452 = vmatmul.mubr.bf16.gmra.mxu0 %v6504_v47  ;;  %5543 = vmatprep.subr.bf16.mxu1 %v6157_v48 }
  0x38   : > { %5488 = vmatmul.mubr.bf16.gmra.mxu1 %v6509_v49  ;;  %5508 = vmatpush3.bf16.msra.mxu0 %v6153_v41  ;;  %v6612_v41 = vpack.c.bf16 %v699_v38, %v698_v37  ;;  %v6187_v37 = vld [vmem:[%s7751_s1 + $0x1f0] sm:$0xff]   ;;  %v6189_v38 = vld [vmem:[%s7751_s1 + $0x1e8] sm:$0xff]  }
  0x39   : > { %5455 = vmatprep.mubr.bf16.mxu0 %v6511_v50  ;;  %5491 = vmatprep.mubr.bf16.mxu1 %v6513_v51 }
  0x3a   : > { %5509 = vmatprep.subr.bf16.mxu0 %v6156_v52  ;;  %5544 = vmatpush3.bf16.msra.mxu1 %v6157_v48  ;;  %v704_v48 = vld [vmem:[%s6437_s20 + $0x62] sm:$0xff] }
  0x3b   : > { %5545 = vmatprep.subr.bf16.mxu1 %v6159_v57 }
  0x3c   : > { %5510 = vmatpush3.bf16.msra.mxu0 %v6156_v52  ;;  %v705_v52 = vld [vmem:[%s6437_s20 + $0x6a] sm:$0xff] }
  0x3d   : > { %5511 = vmatprep.subr.bf16.mxu0 %v6158_v58  ;;  %v6638_v55 = vpack.c.bf16 %v705_v52, %v704_v48  ;;  %v6197_v48 = vld [vmem:[%s7751_s1 + $0x180] sm:$0xff]  }
  0x3e   : > { %5546 = vmatpush3.bf16.msra.mxu1 %v6159_v57  ;;  %v706_v57 = vld [vmem:[%s6437_s20 + $0x7a] sm:$0xff] }
  0x3f   : > { %5456 = vmatmul.mubr.bf16.gmra.mxu0 %v6536_v63  ;;  %5547 = vmatprep.subr.bf16.mxu1 %v6161_v0  ;;  %v6198_v52 = vld [vmem:[%s7751_s1 + $0x1c0] sm:$0xff]  }
  0x40   : > { %5492 = vmatmul.mubr.bf16.gmra.mxu1 %v6541_v1  ;;  %5512 = vmatpush3.bf16.msra.mxu0 %v6158_v58  ;;  %v707_v58 = vld [vmem:[%s6437_s20 + $0x82] sm:$0xff] }
  0x41   : > { %5459 = vmatprep.mubr.bf16.mxu0 %v6543_v2  ;;  %5495 = vmatprep.mubr.bf16.mxu1 %v6545_v3 }
  0x42   : > { %5513 = vmatprep.subr.bf16.mxu0 %v6160_v6  ;;  %5548 = vmatpush3.bf16.msra.mxu1 %v6161_v0  ;;  %v6657_v0 = vpack.c.bf16 %v707_v58, %v706_v57  ;;  %v4719_v57 = vld [vmem:[%s6437_s20 + $0xf2] sm:$0xff]  ;;  %v4720_v58 = vld [vmem:[%s6437_s20 + $0xfa] sm:$0xff] }
  0x43   : > { %5549 = vmatprep.subr.bf16.mxu1 %v6163_v10  ;;  %v1412_v61 = vpack.c.bf16 %v4720_v58, %v4719_v57 }
  0x44   : > { %5514 = vmatpush3.bf16.msra.mxu0 %v6160_v6  ;;  %v710_v6 = vld [vmem:[%s6437_s20 + $0xaa] sm:$0xff] }
  0x45   : > { %5515 = vmatprep.subr.bf16.mxu0 %v6162_v9  ;;  %v6681_v13 = vpack.c.bf16 %v711_v7, %v710_v6 }
  0x46   : > { %5550 = vmatpush3.bf16.msra.mxu1 %v6163_v10  ;;  %v6179_v10 = vld [vmem:[%s7751_s1 + $0x150] sm:$0xff]  }
  0x47   : > { %5460 = vmatmul.mubr.bf16.gmra.mxu0 %v6568_v15  ;;  %5551 = vmatprep.subr.bf16.mxu1 %v6164_v16 }
  0x48   : > { %5496 = vmatmul.mubr.bf16.gmra.mxu1 %v6573_v17  ;;  %5463 = vmatprep.mubr.bf16.mxu0 %v6575_v18 }
  0x49   : > { %5499 = vmatprep.mubr.bf16.mxu1 %v6577_v19  ;;  %5516 = vmatpush3.bf16.msra.mxu0 %v6162_v9  ;;  %v6178_v9 = vld [vmem:[%s7751_s1 + $0x108] sm:$0xff]  }
  0x4a   : > { %5517 = vmatprep.subr.bf16.mxu0 %v6165_v21  ;;  %5552 = vmatpush3.bf16.msra.mxu1 %v6164_v16  ;;  %v6686_v16 = vpack.c.bf16 %v713_v12, %v712_v11 }
  0x4b   : > { %5553 = vmatprep.subr.bf16.mxu1 %v6166_v24 }
  0x4d   : > { %5518 = vmatpush3.bf16.msra.mxu0 %v6165_v21  ;;  %v6182_v21 = vld [vmem:[%s7751_s1 + $0x140] sm:$0xff]  }
  0x4e   : > { %5554 = vmatpush3.bf16.msra.mxu1 %v6166_v24  ;;  %5575 = vmatprep.subr.bf16.mxu0 %v6167_v28  ;;  %v4631_v24 = vld [vmem:[%s6437_s20 + $0xf0] sm:$0xff] }
  0x4f   : > { %5464 = vmatmul.mubr.bf16.gmra.mxu0 %v6598_v29  ;;  %5611 = vmatprep.subr.bf16.mxu1 %v6170_v30 }
  0x50   : > { %5500 = vmatmul.mubr.bf16.gmra.mxu1 %v6603_v32  ;;  %5519 = vmatprep.mubr.bf16.mxu0 %v716_v34  ;;  %v6184_v34 = vld [vmem:[%s7751_s1 + $0x1b0] sm:$0xff]  }
  0x51   : > { %5555 = vmatprep.mubr.bf16.mxu1 %v6477_v33  ;;  %v6169_v33 = vld [vmem:[%s7751_s1 + $0x128] sm:$0xff]  }
  0x57   : > { %5520 = vmatmul.mubr.bf16.vlgmr.msra.gmra.mxu0 %v6612_v41 }
  0x58   : > { %5576 = vmatpush3.bf16.msra.mxu0 %v6167_v28  ;;  %5556 = vmatmul.mubr.bf16.vlgmr.msra.gmra.mxu1 %v6484_v36  ;;  %v6186_v28 = vld [vmem:[%s7751_s1 + $0x1f8] sm:$0xff]  }
  0x59   : > { %5577 = vmatprep.subr.bf16.mxu0 %v6168_v42  ;;  %5523 = vmatprep.mubr.bf16.mxu0 %v6617_v43 }
  0x5a   : > { %5559 = vmatprep.mubr.bf16.mxu1 %v6509_v49  ;;  %5612 = vmatpush3.bf16.msra.mxu1 %v6170_v30  ;;  %v6710_v30 = vpack.c.bf16 %v4632_v25, %v4631_v24 }
  0x5b   : > { %5613 = vmatprep.subr.bf16.mxu1 %v6171_v46 }
  0x5c   : > { %5578 = vmatpush3.bf16.msra.mxu0 %v6168_v42  ;;  %v6193_v42 = vld [vmem:[%s7751_s1 + $0x1d8] sm:$0xff]  }
  0x5d   : > { %5579 = vmatprep.subr.bf16.mxu0 %v6169_v33 }
  0x5e   : > { %5614 = vmatpush3.bf16.msra.mxu1 %v6171_v46  ;;  %v6194_v46 = vld [vmem:[%s7751_s1 + $0x188] sm:$0xff]  }
  0x5f   : > { %5524 = vmatmul.mubr.bf16.gmra.mxu0 %v6633_v53  ;;  %5615 = vmatprep.subr.bf16.mxu1 %v6173_v54 }
  0x60   : > { %5560 = vmatmul.mubr.bf16.gmra.mxu1 %v6513_v51  ;;  %5580 = vmatpush3.bf16.msra.mxu0 %v6169_v33  ;;  %v6196_v33 = vld [vmem:[%s7751_s1 + $0x1c8] sm:$0xff]  }
  0x61   : > { %5527 = vmatprep.mubr.bf16.mxu0 %v6638_v55  ;;  %5581 = vmatprep.subr.bf16.mxu0 %v6172_v56 }
  0x62   : > { %5563 = vmatprep.mubr.bf16.mxu1 %v6541_v1  ;;  %5616 = vmatpush3.bf16.msra.mxu1 %v6173_v54  ;;  %v4675_v54 = vld [vmem:[%s6437_s20 + $0xf1] sm:$0xff] }
  0x63   : > { %5617 = vmatprep.subr.bf16.mxu1 %v6175_v59 }
  0x64   : > { %5582 = vmatpush3.bf16.msra.mxu0 %v6172_v56  ;;  %v4676_v56 = vld [vmem:[%s6437_s20 + $0xf9] sm:$0xff] }
  0x65   : > { %5583 = vmatprep.subr.bf16.mxu0 %v6174_v60 }
  0x66   : > { %5618 = vmatpush3.bf16.msra.mxu1 %v6175_v59  ;;  %v6199_v59 = vld [vmem:[%s7751_s1 + $0x238] sm:$0xff]  }
  0x67   : > { %5528 = vmatmul.mubr.bf16.gmra.mxu0 %v6657_v0  ;;  %5619 = vmatprep.subr.bf16.mxu1 %v6177_v4 }
  0x68   : > { %5564 = vmatmul.mubr.bf16.gmra.mxu1 %v6545_v3  ;;  %5584 = vmatpush3.bf16.msra.mxu0 %v6174_v60  ;;  %v1184_v60 = vpack.c.bf16 %v4676_v56, %v4675_v54 }
  0x69   : > { %5531 = vmatprep.mubr.bf16.mxu0 %v6662_v5  ;;  %5567 = vmatprep.mubr.bf16.mxu1 %v6573_v17 }
  0x6a   : > { %5585 = vmatprep.subr.bf16.mxu0 %v6176_v8  ;;  %5620 = vmatpush3.bf16.msra.mxu1 %v6177_v4  ;;  %v6201_v4 = vld [vmem:[%s7751_s1 + $0x228] sm:$0xff]  }
  0x6b   : > { %5621 = vmatprep.subr.bf16.mxu1 %v6179_v10 }
  0x6c   : > { %5586 = vmatpush3.bf16.msra.mxu0 %v6176_v8 }
  0x6d   : > { %5587 = vmatprep.subr.bf16.mxu0 %v6178_v9 }
  0x6e   : > { %5622 = vmatpush3.bf16.msra.mxu1 %v6179_v10 }
  0x6f   : > { %5532 = vmatmul.mubr.bf16.gmra.mxu0 %v6681_v13  ;;  %5623 = vmatprep.subr.bf16.mxu1 %v6180_v14 }
  0x70   : > { %5568 = vmatmul.mubr.bf16.gmra.mxu1 %v6577_v19  ;;  %5535 = vmatprep.mubr.bf16.mxu0 %v6686_v16 }
  0x71   : > { %5588 = vmatpush3.bf16.msra.mxu0 %v6178_v9  ;;  %5571 = vmatprep.mubr.bf16.mxu1 %v6603_v32 }
  0x72   : > { %5589 = vmatprep.subr.bf16.mxu0 %v6181_v20  ;;  %5624 = vmatpush3.bf16.msra.mxu1 %v6180_v14 }
  0x73   : > { %5625 = vmatprep.subr.bf16.mxu1 %v6182_v21 }
  0x75   : > { %5590 = vmatpush3.bf16.msra.mxu0 %v6181_v20 }
  0x76   : > { %5626 = vmatpush3.bf16.msra.mxu1 %v6182_v21  ;;  %5647 = vmatprep.subr.bf16.mxu0 %v6183_v26 }
  0x77   : > { %5536 = vmatmul.mubr.bf16.gmra.mxu0 %v6705_v27  ;;  %5683 = vmatprep.subr.bf16.mxu1 %v6186_v28 }
  0x78   : > { %5572 = vmatmul.mubr.bf16.gmra.mxu1 %v6710_v30  ;;  %5591 = vmatprep.mubr.bf16.mxu0 %v6474_v31  ;;  %v6185_v31 = vld [vmem:[%s7751_s1 + $0x1a8] sm:$0xff]  }
  0x79   : > { %5627 = vmatprep.mubr.bf16.mxu1 %v6612_v41  ;;  %v6190_v41 = vld [vmem:[%s7751_s1 + $0x198] sm:$0xff]  }
  0x7f   : > { %5592 = vmatmul.mubr.bf16.vlgmr.msra.gmra.mxu0 %v6482_v35 }
  0x80   : > { %5648 = vmatpush3.bf16.msra.mxu0 %v6183_v26  ;;  %5628 = vmatmul.mubr.bf16.vlgmr.msra.gmra.mxu1 %v6617_v43 }
  0x81   : > { %5649 = vmatprep.subr.bf16.mxu0 %v6184_v34  ;;  %5595 = vmatprep.mubr.bf16.mxu0 %v6504_v47 }
  0x82   : > { %5631 = vmatprep.mubr.bf16.mxu1 %v6633_v53  ;;  %5684 = vmatpush3.bf16.msra.mxu1 %v6186_v28 }
  0x83   : > { %5685 = vmatprep.subr.bf16.mxu1 %v6187_v37 }
  0x84   : > { %5650 = vmatpush3.bf16.msra.mxu0 %v6184_v34 }
  0x85   : > { %5651 = vmatprep.subr.bf16.mxu0 %v6185_v31 }
  0x86   : > { %5686 = vmatpush3.bf16.msra.mxu1 %v6187_v37 }
  0x87   : > { %5596 = vmatmul.mubr.bf16.gmra.mxu0 %v6511_v50  ;;  %5687 = vmatprep.subr.bf16.mxu1 %v6189_v38 }
  0x88   : > { %5632 = vmatmul.mubr.bf16.gmra.mxu1 %v6638_v55  ;;  %5652 = vmatpush3.bf16.msra.mxu0 %v6185_v31 }
  0x89   : > { %5599 = vmatprep.mubr.bf16.mxu0 %v6536_v63  ;;  %5653 = vmatprep.subr.bf16.mxu0 %v6188_v39 }
  0x8a   : > { %5635 = vmatprep.mubr.bf16.mxu1 %v6657_v0  ;;  %5688 = vmatpush3.bf16.msra.mxu1 %v6189_v38 }
  0x8b   : > { %5689 = vmatprep.subr.bf16.mxu1 %v6191_v40 }
  0x8c   : > { %5654 = vmatpush3.bf16.msra.mxu0 %v6188_v39 }
  0x8d   : > { %5655 = vmatprep.subr.bf16.mxu0 %v6190_v41 }
  0x8e   : > { %5690 = vmatpush3.bf16.msra.mxu1 %v6191_v40 }
  0x8f   : > { %5600 = vmatmul.mubr.bf16.gmra.mxu0 %v6543_v2  ;;  %5691 = vmatprep.subr.bf16.mxu1 %v6193_v42 }
  0x90   : > { %5636 = vmatmul.mubr.bf16.gmra.mxu1 %v6662_v5  ;;  %5656 = vmatpush3.bf16.msra.mxu0 %v6190_v41 }
  0x91   : > { %5603 = vmatprep.mubr.bf16.mxu0 %v6568_v15  ;;  %5639 = vmatprep.mubr.bf16.mxu1 %v6681_v13 }
  0x92   : > { %5657 = vmatprep.subr.bf16.mxu0 %v6192_v44  ;;  %5692 = vmatpush3.bf16.msra.mxu1 %v6193_v42 }
  0x93   : > { %5693 = vmatprep.subr.bf16.mxu1 %v6195_v45 }
  0x94   : > { %5658 = vmatpush3.bf16.msra.mxu0 %v6192_v44 }
  0x95   : > { %5659 = vmatprep.subr.bf16.mxu0 %v6194_v46 }
  0x96   : > { %5694 = vmatpush3.bf16.msra.mxu1 %v6195_v45 }
  0x97   : > { %5604 = vmatmul.mubr.bf16.gmra.mxu0 %v6575_v18  ;;  %5695 = vmatprep.subr.bf16.mxu1 %v6196_v33 }
  0x98   : > { %5640 = vmatmul.mubr.bf16.gmra.mxu1 %v6686_v16  ;;  %5607 = vmatprep.mubr.bf16.mxu0 %v6598_v29 }
  0x99   : > { %5660 = vmatpush3.bf16.msra.mxu0 %v6194_v46  ;;  %5643 = vmatprep.mubr.bf16.mxu1 %v6705_v27 }
  0x9a   : > { %5661 = vmatprep.subr.bf16.mxu0 %v6197_v48  ;;  %5696 = vmatpush3.bf16.msra.mxu1 %v6196_v33 }
  0x9b   : > { %5697 = vmatprep.subr.bf16.mxu1 %v6198_v52 }
  0x9d   : > { %5662 = vmatpush3.bf16.msra.mxu0 %v6197_v48 }
  0x9e   : > { %5698 = vmatpush3.bf16.msra.mxu1 %v6198_v52  ;;  %5719 = vmatprep.subr.bf16.mxu0 %v6199_v59 }
  0x9f   : > { %5608 = vmatmul.mubr.bf16.gmra.mxu0 %v1184_v60 }
  0xa0   : > { %5644 = vmatmul.mubr.bf16.gmra.mxu1 %v1412_v61  ;;  %5663 = vmatprep.mubr.bf16.mxu0 %v6484_v36  ;;  %v6203_v36 = vld [vmem:[%s7751_s1 + $0x218] sm:$0xff]  }
  0xa1   : > { %5699 = vmatprep.mubr.bf16.mxu1 %v6482_v35  ;;  %v6202_v35 = vld [vmem:[%s7751_s1 + $0x220] sm:$0xff]  }
  0xa7   : > { %5664 = vmatmul.mubr.bf16.vlgmr.msra.gmra.mxu0 %v6509_v49  ;;  %v6205_v49 = vld [vmem:[%s7751_s1 + $0x208] sm:$0xff]  }
  0xa8   : > { %5720 = vmatpush3.bf16.msra.mxu0 %v6199_v59  ;;  %5700 = vmatmul.mubr.bf16.vlgmr.msra.gmra.mxu1 %v6504_v47  ;;  %v6204_v47 = vld [vmem:[%s7751_s1 + $0x210] sm:$0xff]  }
  0xa9   : > { %5721 = vmatprep.subr.bf16.mxu0 %v6200_v62  ;;  %5667 = vmatprep.mubr.bf16.mxu0 %v6513_v51  ;;  %v4765_v51 = vld [vmem:[%s6437_s20 + $0x108] sm:$0xff] }
  0xaa   : > { %5703 = vmatprep.mubr.bf16.mxu1 %v6511_v50  ;;  %v6206_v50 = vld [vmem:[%s7751_s1 + $0x200] sm:$0xff]  }
  0xac   : > { %5722 = vmatpush3.bf16.msra.mxu0 %v6200_v62 }
  0xad   : > { %5723 = vmatprep.subr.bf16.mxu0 %v6201_v4 }
  0xaf   : > { %5668 = vmatmul.mubr.bf16.gmra.mxu0 %v6541_v1  ;;  %v4809_v1 = vld [vmem:[%s6437_s20 + $0x109] sm:$0xff] }
  0xb0   : > { %5704 = vmatmul.mubr.bf16.gmra.mxu1 %v6536_v63  ;;  %5724 = vmatpush3.bf16.msra.mxu0 %v6201_v4  ;;  %v4766_v63 = vld [vmem:[%s6437_s20 + $0x110] sm:$0xff] }
  0xb1   : > { %5671 = vmatprep.mubr.bf16.mxu0 %v6545_v3  ;;  %5725 = vmatprep.subr.bf16.mxu0 %v6202_v35  ;;  %v1643_v3 = vpack.c.bf16 %v4766_v63, %v4765_v51 }
  0xb2   : > { %5707 = vmatprep.mubr.bf16.mxu1 %v6543_v2  ;;  %v4810_v2 = vld [vmem:[%s6437_s20 + $0x111] sm:$0xff] }
  0xb4   : > { %5726 = vmatpush3.bf16.msra.mxu0 %v6202_v35 }
  0xb5   : > { %5727 = vmatprep.subr.bf16.mxu0 %v6203_v36 }
  0xb7   : > { %5672 = vmatmul.mubr.bf16.gmra.mxu0 %v6573_v17  ;;  %v4853_v17 = vld [vmem:[%s6437_s20 + $0x10a] sm:$0xff] }
  0xb8   : > { %5708 = vmatmul.mubr.bf16.gmra.mxu1 %v6568_v15  ;;  %5728 = vmatpush3.bf16.msra.mxu0 %v6203_v36  ;;  %v1871_v15 = vpack.c.bf16 %v4810_v2, %v4809_v1 }
  0xb9   : > { %5675 = vmatprep.mubr.bf16.mxu0 %v6577_v19  ;;  %5711 = vmatprep.mubr.bf16.mxu1 %v6575_v18  ;;  %v4854_v18 = vld [vmem:[%s6437_s20 + $0x112] sm:$0xff] }
  0xba   : > { %5729 = vmatprep.subr.bf16.mxu0 %v6204_v47  ;;  %v2099_v19 = vpack.c.bf16 %v4854_v18, %v4853_v17 }
  0xbc   : > { %5730 = vmatpush3.bf16.msra.mxu0 %v6204_v47 }
  0xbd   : > { %5731 = vmatprep.subr.bf16.mxu0 %v6205_v49 }
  0xbf   : > { %5676 = vmatmul.mubr.bf16.gmra.mxu0 %v6603_v32 }
  0xc0   : > { %5712 = vmatmul.mubr.bf16.gmra.mxu1 %v6598_v29  ;;  %5679 = vmatprep.mubr.bf16.mxu0 %v6710_v30 }
  0xc1   : > { %5732 = vmatpush3.bf16.msra.mxu0 %v6205_v49  ;;  %5715 = vmatprep.mubr.bf16.mxu1 %v1184_v60 }
  0xc2   : > { %5733 = vmatprep.subr.bf16.mxu0 %v6206_v50 }
  0xc5   : > { %5734 = vmatpush3.bf16.msra.mxu0 %v6206_v50 }
  0xc7   : > { %5680 = vmatmul.mubr.bf16.gmra.mxu0 %v1643_v3 }
  0xc8   : > { %5716 = vmatmul.mubr.bf16.gmra.mxu1 %v1871_v15  ;;  %5735 = vmatprep.mubr.bf16.mxu0 %v6617_v43 }
  0xcf   : > { %5736 = vmatmul.mubr.bf16.vlgmr.msra.gmra.mxu0 %v6633_v53 }
  0xd0   : > { %5739 = vmatprep.mubr.bf16.mxu0 %v6638_v55 }
  0xd7   : > { %5740 = vmatmul.mubr.bf16.gmra.mxu0 %v6657_v0 }
  0xd8   : > { %5743 = vmatprep.mubr.bf16.mxu0 %v6662_v5 }
  0xdf   : > { %5744 = vmatmul.mubr.bf16.gmra.mxu0 %v6681_v13 }
  0xe0   : > { %5747 = vmatprep.mubr.bf16.mxu0 %v6686_v16 }
  0xe7   : > { %5748 = vmatmul.mubr.bf16.gmra.mxu0 %v6705_v27 }
  0xe8   : > { %5751 = vmatprep.mubr.bf16.mxu0 %v1412_v61 }
  0xef   : > { %v5449_v29 = vpop.f32.mrf.mxu0  ;;  %5752 = vmatmul.mubr.bf16.gmra.mxu0 %v2099_v19 }
  0xf0   : > { %v5485_v32 = vpop.f32.mrf.mxu1 }
  0xf1   : > { %v626_v43 = vadd.f32 %v5485_v32, %v5449_v29  ;;  %v456_v53 = vpop.f32.mrf.mxu0 }
  0xf2   : > { %v617_v55 = vpop.f32.mrf.mxu1 }
  0xf3   : > { %v618_v6 = vadd.f32 %v617_v55, %v456_v53  ;;  %v5450_v0 = vpop.f32.mrf.mxu0 }
  0xf4   : > { %v5486_v7 = vpop.f32.mrf.mxu1 }
  0xf5   : > { %v629_v5 = vadd.f32 %v5486_v7, %v5450_v0  ;;  %v459_v8 = vpop.f32.mrf.mxu0 }
  0xf6   : > { %v620_v9 = vpop.f32.mrf.mxu1 }
  0xf7   : > { %v621_v10 = vadd.f32 %v620_v9, %v459_v8  ;;  %v5453_v11 = vpop.f32.mrf.mxu0 }
  0xf8   : > { %v5489_v12 = vpop.f32.mrf.mxu1 }
  0xf9   : > { %v642_v13 = vadd.f32 %v5489_v12, %v5453_v11  ;;  %v472_v14 = vpop.f32.mrf.mxu0 }
  0xfa   : > { %v633_v16 = vpop.f32.mrf.mxu1 }
  0xfb   : > { %v6833_v20 = vadd.f32 %v633_v16, %v472_v14  ;;  %v5454_v21 = vpop.f32.mrf.mxu0 }
  0xfc   : > { %v5490_v22 = vpop.f32.mrf.mxu1 }
  0xfd   : > { %v6835_v23 = vadd.f32 %v5490_v22, %v5454_v21  ;;  %v475_v24 = vpop.f32.mrf.mxu0 }
  0xfe   : > { %v636_v25 = vpop.f32.mrf.mxu1 }
  0xff   : > { %v6837_v26 = vadd.f32 %v636_v25, %v475_v24  ;;  %v5457_v27 = vpop.f32.mrf.mxu0 }
 0x100   : > { %v5493_v28 = vpop.f32.mrf.mxu1 }
 0x101   : > { %v6839_v30 = vadd.f32 %v5493_v28, %v5457_v27  ;;  %v488_v34 = vpop.f32.mrf.mxu0 }
 0x102   : > { %v649_v37 = vpop.f32.mrf.mxu1 }
 0x103   : > { %v6841_v31 = vadd.f32 %v649_v37, %v488_v34  ;;  %v5458_v38 = vpop.f32.mrf.mxu0 }
 0x104   : > { %v5494_v39 = vpop.f32.mrf.mxu1 }
 0x105   : > { %v6843_v40 = vadd.f32 %v5494_v39, %v5458_v38  ;;  %v491_v41 = vpop.f32.mrf.mxu0 }
 0x106   : > { %v652_v42 = vpop.f32.mrf.mxu1 }
 0x107   : > { %v6845_v44 = vadd.f32 %v652_v42, %v491_v41  ;;  %v5461_v45 = vpop.f32.mrf.mxu0 }
 0x108   : > { %v5497_v46 = vpop.f32.mrf.mxu1 }
 0x109   : > { %v6847_v33 = vadd.f32 %v5497_v46, %v5461_v45  ;;  %v504_v48 = vpop.f32.mrf.mxu0 }
 0x10a   : > { %v665_v52 = vpop.f32.mrf.mxu1 }
 0x10b   : > { %v6849_v54 = vadd.f32 %v665_v52, %v504_v48  ;;  %v5462_v56 = vpop.f32.mrf.mxu0 }
 0x10c   : > { %v5498_v57 = vpop.f32.mrf.mxu1 }
 0x10d   : > { %v6851_v58 = vadd.f32 %v5498_v57, %v5462_v56  ;;  %v507_v59 = vpop.f32.mrf.mxu0 }
 0x10e   : > { %v668_v60 = vpop.f32.mrf.mxu1 }
 0x10f   : > { %v6853_v61 = vadd.f32 %v668_v60, %v507_v59  ;;  %v5465_v62 = vpop.f32.mrf.mxu0 }
 0x110   : > { %v5501_v4 = vpop.f32.mrf.mxu1 }
 0x111   : > { %v6855_v35 = vadd.f32 %v5501_v4, %v5465_v62  ;;  %v520_v36 = vpop.f32.mrf.mxu0 }
 0x112   : > { %v681_v47 = vpop.f32.mrf.mxu1 }
 0x113   : > { %v6857_v49 = vadd.f32 %v681_v47, %v520_v36  ;;  %v5466_v50 = vpop.f32.mrf.mxu0 }
 0x114   : > { %v5502_v51 = vpop.f32.mrf.mxu1 }
 0x115   : > { %v6859_v63 = vadd.f32 %v5502_v51, %v5466_v50  ;;  %v523_v1 = vpop.f32.mrf.mxu0 }
 0x116   : > { %v684_v2 = vpop.f32.mrf.mxu1 }
 0x117   : > { %v6861_v3 = vadd.f32 %v684_v2, %v523_v1  ;;  %v5521_v15 = vpop.f32.mrf.mxu0 }
 0x118   : > { %v906_v17 = vadd.f32 %v5521_v15, %v626_v43  ;;  %v5557_v18 = vpop.f32.mrf.mxu1 }
 0x119   : > { %v825_v19 = vpop.f32.mrf.mxu0 }
 0x11a   : > { %v904_v29 = vadd.f32 %v825_v19, %v618_v6  ;;  %v6863_v32 = vadd.f32 %v5557_v18, %v906_v17  ;;  %v1056_v53 = vpop.f32.mrf.mxu1 }
 0x11b   : > { %v5522_v55 = vpop.f32.mrf.mxu0 }
 0x11c   : > { %v907_v0 = vadd.f32 %v5522_v55, %v629_v5  ;;  %v6865_v7 = vadd.f32 %v1056_v53, %v904_v29  ;;  %v5558_v8 = vpop.f32.mrf.mxu1 }
 0x11d   : > { %v828_v9 = vpop.f32.mrf.mxu0 }
 0x11e   : > { %v905_v11 = vadd.f32 %v828_v9, %v621_v10  ;;  %v6867_v12 = vadd.f32 %v5558_v8, %v907_v0  ;;  %v1059_v14 = vpop.f32.mrf.mxu1 }
 0x11f   : > { %v5525_v16 = vpop.f32.mrf.mxu0 }
 0x120   : > { %v910_v21 = vadd.f32 %v5525_v16, %v642_v13  ;;  %v6869_v22 = vadd.f32 %v1059_v14, %v905_v11  ;;  %v5561_v43 = vpop.f32.mrf.mxu1 }
 0x121   : > { %v841_v24 = vpop.f32.mrf.mxu0 }
 0x122   : > { %v908_v6 = vadd.f32 %v841_v24, %v6833_v20  ;;  %v6872_v25 = vadd.f32 %v5561_v43, %v910_v21  ;;  %v1072_v27 = vpop.f32.mrf.mxu1 }
 0x123   : > { %v5526_v5 = vpop.f32.mrf.mxu0 }
 0x124   : > { %v911_v28 = vadd.f32 %v5526_v5, %v6835_v23  ;;  %v6875_v34 = vadd.f32 %v1072_v27, %v908_v6  ;;  %v5562_v10 = vpop.f32.mrf.mxu1  ;;  %v6327_v6 = vmov 0.0  }
 0x125   : > { %v844_v37 = vpop.f32.mrf.mxu0  ;;  %2345 = vst [vmem:[#allocation2] sm:$0x1] %v6327_v6  ;;  %2346 = vst [vmem:[#allocation2 + $0x18] sm:$0x1] %v6327_v6 }
 0x126   : > { %v909_v38 = vadd.f32 %v844_v37, %v6837_v26  ;;  %v6878_v39 = vadd.f32 %v5562_v10, %v911_v28  ;;  %v1075_v13 = vpop.f32.mrf.mxu1  ;;  %2347 = vst [vmem:[#allocation2 + $0x30] sm:$0x1] %v6327_v6  ;;  %2348 = vst [vmem:[#allocation2 + $0x48] sm:$0x1] %v6327_v6 }
 0x127   : > { %v5529_v41 = vpop.f32.mrf.mxu0  ;;  %2349 = vst [vmem:[#allocation2 + $0x60] sm:$0x1] %v6327_v6  ;;  %2350 = vst [vmem:[#allocation2 + $0x78] sm:$0x1] %v6327_v6 }
 0x128   : > { %v914_v42 = vadd.f32 %v5529_v41, %v6839_v30  ;;  %v6881_v45 = vadd.f32 %v1075_v13, %v909_v38  ;;  %v5565_v20 = vpop.f32.mrf.mxu1  ;;  %2351 = vst [vmem:[#allocation2 + $0x90] sm:$0x1] %v6327_v6  ;;  %2352 = vst [vmem:[#allocation2 + $0xa8] sm:$0x1] %v6327_v6 }
 0x129   : > { %v857_v46 = vpop.f32.mrf.mxu0  ;;  %2353 = vst [vmem:[#allocation2 + $0xc0] sm:$0x1] %v6327_v6  ;;  %2354 = vst [vmem:[#allocation2 + $0xd8] sm:$0x1] %v6327_v6 }
 0x12a   : > { %v912_v48 = vadd.f32 %v857_v46, %v6841_v31  ;;  %v6884_v52 = vadd.f32 %v5565_v20, %v914_v42  ;;  %v1088_v23 = vpop.f32.mrf.mxu1  ;;  %2355 = vst [vmem:[#allocation2 + $0x11] sm:$0x1] %v6327_v6  ;;  %2356 = vst [vmem:[#allocation2 + $0x29] sm:$0x1] %v6327_v6 }
 0x12b   : > { %v5530_v56 = vpop.f32.mrf.mxu0  ;;  %2357 = vst [vmem:[#allocation2 + $0x41] sm:$0x1] %v6327_v6  ;;  %2358 = vst [vmem:[#allocation2 + $0x59] sm:$0x1] %v6327_v6 }
 0x12c   : > { %v915_v57 = vadd.f32 %v5530_v56, %v6843_v40  ;;  %v6887_v59 = vadd.f32 %v1088_v23, %v912_v48  ;;  %v5566_v26 = vpop.f32.mrf.mxu1  ;;  %2359 = vst [vmem:[#allocation2 + $0x71] sm:$0x1] %v6327_v6  ;;  %2360 = vst [vmem:[#allocation2 + $0x89] sm:$0x1] %v6327_v6 }
 0x12d   : > { %v860_v60 = vpop.f32.mrf.mxu0  ;;  %2361 = vst [vmem:[#allocation2 + $0xa1] sm:$0x1] %v6327_v6  ;;  %2362 = vst [vmem:[#allocation2 + $0xb9] sm:$0x1] %v6327_v6 }
 0x12e   : > { %v913_v62 = vadd.f32 %v860_v60, %v6845_v44  ;;  %v6890_v4 = vadd.f32 %v5566_v26, %v915_v57  ;;  %v1091_v30 = vpop.f32.mrf.mxu1  ;;  %2363 = vst [vmem:[#allocation2 + $0xd1] sm:$0x1] %v6327_v6  ;;  %2364 = vst [vmem:[#allocation2 + $0xe9] sm:$0x1] %v6327_v6 }
 0x12f   : > { %v5533_v36 = vpop.f32.mrf.mxu0 }
 0x130   : > { %v918_v47 = vadd.f32 %v5533_v36, %v6847_v33  ;;  %v6893_v50 = vadd.f32 %v1091_v30, %v913_v62  ;;  %v5569_v31 = vpop.f32.mrf.mxu1 }
 0x131   : > { %v873_v51 = vpop.f32.mrf.mxu0 }
 0x132   : > { %v916_v1 = vadd.f32 %v873_v51, %v6849_v54  ;;  %v6896_v2 = vadd.f32 %v5569_v31, %v918_v47  ;;  %v1104_v40 = vpop.f32.mrf.mxu1 }
 0x133   : > { %v5534_v15 = vpop.f32.mrf.mxu0 }
 0x134   : > { %v919_v17 = vadd.f32 %v5534_v15, %v6851_v58  ;;  %v6899_v18 = vadd.f32 %v1104_v40, %v916_v1  ;;  %v5570_v44 = vpop.f32.mrf.mxu1 }
 0x135   : > { %v876_v19 = vpop.f32.mrf.mxu0 }
 0x136   : > { %v917_v29 = vadd.f32 %v876_v19, %v6853_v61  ;;  %v6902_v53 = vadd.f32 %v5570_v44, %v919_v17  ;;  %v1107_v33 = vpop.f32.mrf.mxu1 }
 0x137   : > { %v5537_v55 = vpop.f32.mrf.mxu0 }
 0x138   : > { %v922_v0 = vadd.f32 %v5537_v55, %v6855_v35  ;;  %v6905_v8 = vadd.f32 %v1107_v33, %v917_v29  ;;  %v5573_v54 = vpop.f32.mrf.mxu1 }
 0x139   : > { %v889_v9 = vpop.f32.mrf.mxu0 }
 0x13a   : > { %v920_v11 = vadd.f32 %v889_v9, %v6857_v49  ;;  %v6908_v14 = vadd.f32 %v5573_v54, %v922_v0  ;;  %v1120_v58 = vpop.f32.mrf.mxu1 }
 0x13b   : > { %v5538_v16 = vpop.f32.mrf.mxu0 }
 0x13c   : > { %v923_v21 = vadd.f32 %v5538_v16, %v6859_v63  ;;  %v6911_v43 = vadd.f32 %v1120_v58, %v920_v11  ;;  %v5574_v61 = vpop.f32.mrf.mxu1 }
 0x13d   : > { %v892_v24 = vpop.f32.mrf.mxu0 }
 0x13e   : > { %v921_v35 = vadd.f32 %v892_v24, %v6861_v3  ;;  %v1154_v49 = vadd.f32 %v5574_v61, %v923_v21  ;;  %v1123_v63 = vpop.f32.mrf.mxu1 }
 0x13f   : > { %v5593_v27 = vpop.f32.mrf.mxu0 }
 0x140   : > { %v1152_v5 = vadd.f32 %v1123_v63, %v921_v35  ;;  %v6915_v28 = vadd.f32 %v5593_v27, %v6863_v32  ;;  %v6917_v10 = vpop.f32.mrf.mxu1 }
 0x141   : > { %v1284_v37 = vpop.f32.mrf.mxu0 }
 0x142   : > { %v6920_v38 = vadd.f32 %v1284_v37, %v6865_v7  ;;  %v6922_v13 = vpop.f32.mrf.mxu1 }
 0x143   : > { %v5594_v41 = vpop.f32.mrf.mxu0 }
 0x144   : > { %v6925_v42 = vadd.f32 %v5594_v41, %v6867_v12  ;;  %v6927_v3 = vpop.f32.mrf.mxu1 }
 0x145   : > { %v1287_v20 = vpop.f32.mrf.mxu0 }
 0x146   : > { %v6930_v46 = vadd.f32 %v1287_v20, %v6869_v22  ;;  %v6932_v32 = vpop.f32.mrf.mxu1 }
 0x147   : > { %v5597_v48 = vpop.f32.mrf.mxu0 }
 0x148   : > { %v6935_v23 = vadd.f32 %v5597_v48, %v6872_v25  ;;  %v6937_v7 = vpop.f32.mrf.mxu1 }
 0x149   : > { %v1300_v56 = vpop.f32.mrf.mxu0 }
 0x14a   : > { %v6940_v57 = vadd.f32 %v1300_v56, %v6875_v34  ;;  %v6942_v12 = vpop.f32.mrf.mxu1 }
 0x14b   : > { %v5598_v26 = vpop.f32.mrf.mxu0 }
 0x14c   : > { %v6945_v60 = vadd.f32 %v5598_v26, %v6878_v39  ;;  %v6947_v22 = vpop.f32.mrf.mxu1 }
 0x14d   : > { %v1303_v62 = vpop.f32.mrf.mxu0 }
 0x14e   : > { %v6950_v30 = vadd.f32 %v1303_v62, %v6881_v45  ;;  %v6952_v25 = vpop.f32.mrf.mxu1 }
 0x14f   : > { %v5601_v36 = vpop.f32.mrf.mxu0 }
 0x150   : > { %v6955_v47 = vadd.f32 %v5601_v36, %v6884_v52  ;;  %v6957_v34 = vpop.f32.mrf.mxu1 }
 0x151   : > { %v1316_v31 = vpop.f32.mrf.mxu0 }
 0x152   : > { %v6960_v51 = vadd.f32 %v1316_v31, %v6887_v59  ;;  %v6962_v39 = vpop.f32.mrf.mxu1 }
 0x153   : > { %v5602_v1 = vpop.f32.mrf.mxu0 }
 0x154   : > { %v6965_v40 = vadd.f32 %v5602_v1, %v6890_v4  ;;  %v6967_v45 = vpop.f32.mrf.mxu1 }
 0x155   : > { %v1319_v15 = vpop.f32.mrf.mxu0 }
 0x156   : > { %v6970_v17 = vadd.f32 %v1319_v15, %v6893_v50  ;;  %v6972_v52 = vpop.f32.mrf.mxu1 }
 0x157   : > { %v5605_v44 = vpop.f32.mrf.mxu0 }
 0x158   : > { %v6975_v19 = vadd.f32 %v5605_v44, %v6896_v2  ;;  %v6977_v59 = vpop.f32.mrf.mxu1 }
 0x159   : > { %v1332_v29 = vpop.f32.mrf.mxu0 }
 0x15a   : > { %v6980_v33 = vadd.f32 %v1332_v29, %v6899_v18  ;;  %v6982_v4 = vpop.f32.mrf.mxu1 }
 0x15b   : > { %v5606_v55 = vpop.f32.mrf.mxu0 }
 0x15c   : > { %v6985_v0 = vadd.f32 %v5606_v55, %v6902_v53  ;;  %v6987_v50 = vpop.f32.mrf.mxu1 }
 0x15d   : > { %v1335_v54 = vpop.f32.mrf.mxu0 }
 0x15e   : > { %v6990_v9 = vadd.f32 %v1335_v54, %v6905_v8  ;;  %v6992_v2 = vpop.f32.mrf.mxu1 }
 0x15f   : > { %7758 = vst [vmem:[#allocation4_spill] sm:$0xff] %v6992_v2  ;;  %v5609_v11 = vpop.f32.mrf.mxu0 }
 0x160   : > { %7757 = vst [vmem:[#allocation3_spill] sm:$0xff] %v6990_v9  ;;  %v6995_v58 = vadd.f32 %v5609_v11, %v6908_v14  ;;  %v6997_v18 = vpop.f32.mrf.mxu1 }
 0x161   : > { %7760 = vst [vmem:[#allocation6_spill] sm:$0xff] %v6997_v18  ;;  %v1348_v16 = vpop.f32.mrf.mxu0 }
 0x162   : > { %7759 = vst [vmem:[#allocation5_spill] sm:$0xff] %v6995_v58  ;;  %v7000_v21 = vadd.f32 %v1348_v16, %v6911_v43  ;;  %v7002_v53 = vpop.f32.mrf.mxu1 }
 0x163   : > { %7762 = vst [vmem:[#allocation8_spill] sm:$0xff] %v7002_v53  ;;  %v5610_v61 = vpop.f32.mrf.mxu0 }
 0x164   : > { %7761 = vst [vmem:[#allocation7_spill] sm:$0xff] %v7000_v21  ;;  %v7004_v24 = vadd.f32 %v5610_v61, %v1154_v49  ;;  %v7006_v6 = vpop.f32.mrf.mxu1  ;;  %v1591_v21 = vadd.f32 %v6922_v13, %v6920_v38  ;;  %v7059_v13 = vld [vmem:[%s7752_s2] ss:$0 sm:$0xff] }
 0x165   : > { %7764 = vst [vmem:[#allocation10_spill] sm:$0xff] %v7006_v6  ;;  %v1351_v8 = vpop.f32.mrf.mxu0  ;;  %v1593_v6 = vadd.f32 %v6917_v10, %v6915_v28  ;;  %v1592_v28 = vadd.f32 %v6932_v32, %v6930_v46 }
 0x166   : > { %7763 = vst [vmem:[#allocation9_spill] sm:$0xff] %v7004_v24  ;;  %v7008_v35 = vadd.f32 %v1351_v8, %v1152_v5  ;;  %v7010_v63 = vpop.f32.mrf.mxu1 }
 0x167   : > { %7766 = vst [vmem:[#allocation12_spill] sm:$0xff] %v7010_v63  ;;  %v5665_v14 = vpop.f32.mrf.mxu0 }
 0x168   : > { %7765 = vst [vmem:[#allocation11_spill] sm:$0xff] %v7008_v35  ;;  %v5701_v27 = vpop.f32.mrf.mxu1  ;;  %v1824_v18 = vadd.f32 %v5665_v14, %v1593_v6  ;;  %v1595_v6 = vadd.f32 %v6942_v12, %v6940_v57  ;;  %v1596_v57 = vadd.f32 %v6952_v25, %v6950_v30 }
 0x169   : > { %v1743_v37 = vpop.f32.mrf.mxu0 }
 0x16a   : > { %v1971_v41 = vpop.f32.mrf.mxu1  ;;  %v1822_v2 = vadd.f32 %v1743_v37, %v1591_v21  ;;  %v2052_v10 = vadd.f32 %v5701_v27, %v1824_v18 }
 0x16b   : > { %v5666_v20 = vpop.f32.mrf.mxu0 }
 0x16c   : > { %v5702_v43 = vpop.f32.mrf.mxu1 }
 0x16d   : > { %v1746_v48 = vpop.f32.mrf.mxu0 }
 0x16e   : > { %v1974_v26 = vpop.f32.mrf.mxu1 }
 0x16f   : > { %v5669_v56 = vpop.f32.mrf.mxu0 }
 0x170   : > { %v5705_v49 = vpop.f32.mrf.mxu1 }
 0x171   : > { %v1759_v62 = vpop.f32.mrf.mxu0 }
 0x172   : > { %v1987_v15 = vpop.f32.mrf.mxu1  ;;  %v1826_v27 = vadd.f32 %v1759_v62, %v1595_v6 }
 0x173   : > { %v5670_v36 = vpop.f32.mrf.mxu0 }
 0x174   : > { %v7018_v29 = vpop.f32.mrf.mxu1 }
 0x175   : > { %v1762_v31 = vpop.f32.mrf.mxu0 }
 0x176   : > { %v7024_v11 = vpop.f32.mrf.mxu1 }
 0x177   : > { %v7012_v1 = vpop.f32.mrf.mxu0 }
 0x178   : > { %v7030_v8 = vpop.f32.mrf.mxu1 }
 0x179   : > { %v7014_v5 = vpop.f32.mrf.mxu0 }
 0x17a   : > { %v7038_v24 = vpop.f32.mrf.mxu1 }
 0x17b   : > { %v7016_v44 = vpop.f32.mrf.mxu0 }
 0x17d   : > { %v7020_v55 = vpop.f32.mrf.mxu0 }
 0x17f   : > { %v7022_v54 = vpop.f32.mrf.mxu0 }
 0x181   : > { %v7026_v16 = vpop.f32.mrf.mxu0 }
 0x183   : > { %v7028_v61 = vpop.f32.mrf.mxu0 }
 0x184   : > { %7767 = vst [vmem:[#allocation13_spill] sm:$0xff] %v7028_v61  ;;  %v1594_v61 = vadd.f32 %v6927_v3, %v6925_v42  ;;  %v2050_v42 = vadd.f32 %v1971_v41, %v1822_v2  ;;  %v1823_v3 = vadd.f32 %v1746_v48, %v1592_v28 }
 0x185   : > { %v7032_v63 = vpop.f32.mrf.mxu0 }
 0x186   : > { %7768 = vst [vmem:[#allocation14_spill] sm:$0xff] %v7032_v63  ;;  %v7048_v63 = vpop.f32.mrf.mxu1  ;;  %v1825_v9 = vadd.f32 %v5666_v20, %v1594_v61  ;;  %v2051_v61 = vadd.f32 %v1974_v26, %v1823_v3  ;;  %v2054_v26 = vadd.f32 %v1987_v15, %v1826_v27 }
 0x187   : > { %v7034_v35 = vpop.f32.mrf.mxu0 }
 0x188   : > { %7769 = vst [vmem:[#allocation15_spill] sm:$0xff] %v7034_v35  ;;  %v7063_v37 = vpop.f32.mrf.mxu1  ;;  %v2053_v32 = vadd.f32 %v5702_v43, %v1825_v9 }
 0x189   : > { %v7040_v53 = vpop.f32.mrf.mxu0 }
 0x18a   : > { %7770 = vst [vmem:[#allocation16_spill] sm:$0xff] %v7040_v53  ;;  %v1597_v53 = vadd.f32 %v6937_v7, %v6935_v23  ;;  %v1598_v7 = vadd.f32 %v6947_v22, %v6945_v60  ;;  %v1601_v22 = vadd.f32 %v6957_v34, %v6955_v47 }
 0x18b   : > { %v7044_v58 = vpop.f32.mrf.mxu0 }
 0x18c   : > { %v1828_v14 = vadd.f32 %v5669_v56, %v1597_v53  ;;  %v7071_v53 = vpop.f32.mrf.mxu1  ;;  %v1829_v43 = vadd.f32 %v5670_v36, %v1598_v7  ;;  %v1832_v36 = vadd.f32 %v7012_v1, %v1601_v22 }
 0x18d   : > { %v7050_v35 = vpop.f32.mrf.mxu0 }
 0x18e   : > { %v2056_v12 = vadd.f32 %v5705_v49, %v1828_v14  ;;  %v1599_v49 = vadd.f32 %v6962_v39, %v6960_v51 }
 0x18f   : > { %v5737_v38 = vpop.f32.mrf.mxu0 }
 0x190   : > { %v2280_v21 = vadd.f32 %v5737_v38, %v2052_v10  ;;  %v1827_v10 = vadd.f32 %v1762_v31, %v1596_v57  ;;  %v1602_v31 = vadd.f32 %v6967_v45, %v6965_v40  ;;  %v1830_v15 = vadd.f32 %v7014_v5, %v1599_v49 }
 0x191   : > { %v2199_v46 = vpop.f32.mrf.mxu0 }
 0x192   : > { %v2307_v18 = vadd.f32 %v7059_v13, %v2280_v21  ;;  %v2278_v23 = vadd.f32 %v2199_v46, %v2050_v42  ;;  %v2019_v42 = vpop.f32.mrf.mxu1  ;;  %v2057_v21 = vadd.f32 %v7018_v29, %v1829_v43  ;;  %v2055_v46 = vadd.f32 %v7024_v11, %v1827_v10 }
 0x193   : > { %v5738_v20 = vpop.f32.mrf.mxu0  ;;  %v1600_v29 = vadd.f32 %v6972_v52, %v6970_v17  ;;  %v1833_v7 = vadd.f32 %v7016_v44, %v1602_v31  ;;  %v1605_v11 = vadd.f32 %v6977_v59, %v6975_v19  ;;  %v2058_v27 = vadd.f32 %v7038_v24, %v1830_v15  ;;  %v7779_v15 = vld [vmem:[#allocation15_spill] sm:$0xff] }
 0x194   : > { %v2327_v2 = vmax.f32 %v2307_v18, 0.0  ;;  %v2305_v41 = vadd.f32 %v7059_v13, %v2278_v23  ;;  %v2281_v48 = vadd.f32 %v5738_v20, %v2053_v32  ;;  %v2060_v32 = vadd.f32 %v7030_v8, %v1832_v36  ;;  %v5714_v18 = vpop.f32.mrf.mxu1  ;;  %v7776_v36 = vld [vmem:[#allocation14_spill] sm:$0xff] }
 0x195   : > { %v2202_v9 = vpop.f32.mrf.mxu0  ;;  %v1603_v44 = vadd.f32 %v6982_v4, %v6980_v33  ;;  %v2061_v57 = vadd.f32 %v7048_v63, %v1833_v7  ;;  %v7772_v63 = vld [vmem:[#allocation4_spill] sm:$0xff] }
 0x196   : > { %2367 = vst [vmem:[#allocation2 + $0x19] sm:$0xff] %v2327_v2  ;;  %v2325_v56 = vmax.f32 %v2305_v41, 0.0  ;;  %v2308_v28 = vadd.f32 %v7059_v13, %v2281_v48  ;;  %v2279_v60 = vadd.f32 %v2202_v9, %v2051_v61  ;;  %v1831_v61 = vadd.f32 %v7020_v55, %v1600_v29  ;;  %v2022_v41 = vpop.f32.mrf.mxu1 }
 0x197   : > { %v5741_v62 = vpop.f32.mrf.mxu0  ;;  %v1836_v2 = vadd.f32 %v7022_v54, %v1605_v11  ;;  %v1606_v55 = vadd.f32 %v6987_v50, %v6985_v0 }
 0x198   : > { %2365 = vst [vmem:[#allocation2 + $0x1] sm:$0xff] %v2325_v56  ;;  %v2328_v38 = vmax.f32 %v2308_v28, 0.0  ;;  %v2306_v30 = vadd.f32 %v7059_v13, %v2279_v60  ;;  %v2284_v25 = vadd.f32 %v5741_v62, %v2056_v12  ;;  %v1834_v12 = vadd.f32 %v7026_v16, %v1603_v44  ;;  %v7771_v56 = vld [vmem:[#allocation3_spill] sm:$0xff]  ;;  %v5717_v22 = vpop.f32.mrf.mxu1  ;;  %v7773_v62 = vld [vmem:[#allocation13_spill] sm:$0xff] }
 0x199   : > { %v2215_v3 = vpop.f32.mrf.mxu0  ;;  %v2059_v43 = vadd.f32 %v7063_v37, %v1831_v61  ;;  %v1604_v28 = vadd.f32 %v7772_v63, %v7771_v56  ;;  %v2064_v60 = vadd.f32 %v7071_v53, %v1836_v2  ;;  %v1837_v10 = vadd.f32 %v7773_v62, %v1606_v55  ;;  %v7774_v37 = vld [vmem:[#allocation5_spill] sm:$0xff] }
 0x19a   : > { %2368 = vst [vmem:[#allocation2 + $0x21] sm:$0xff] %v2328_v38  ;;  %v2326_v6 = vmax.f32 %v2306_v30, 0.0  ;;  %v2311_v47 = vadd.f32 %v7059_v13, %v2284_v25  ;;  %v2282_v34 = vadd.f32 %v2215_v3, %v2054_v26  ;;  %v7775_v38 = vld [vmem:[#allocation6_spill] sm:$0xff]  ;;  %v2062_v25 = vadd.f32 %v2019_v42, %v1834_v12 }
 0x19b   : > { %v5742_v14 = vpop.f32.mrf.mxu0  ;;  %v1609_v30 = vadd.f32 %v7775_v38, %v7774_v37  ;;  %v1835_v3 = vadd.f32 %v7776_v36, %v1604_v28 }
 0x19c   : > { %2366 = vst [vmem:[#allocation2 + $0x9] sm:$0xff] %v2326_v6  ;;  %v2331_v51 = vmax.f32 %v2311_v47, 0.0  ;;  %v2309_v39 = vadd.f32 %v7059_v13, %v2282_v34  ;;  %v2285_v1 = vadd.f32 %v5742_v14, %v2057_v21  ;;  %v7777_v47 = vld [vmem:[#allocation7_spill] sm:$0xff]  ;;  %v7778_v34 = vld [vmem:[#allocation8_spill] sm:$0xff] }
 0x19d   : > { %v2218_v23 = vpop.f32.mrf.mxu0  ;;  %v1607_v31 = vadd.f32 %v7778_v34, %v7777_v47  ;;  %v1840_v14 = vadd.f32 %v7779_v15, %v1609_v30  ;;  %v2063_v11 = vadd.f32 %v2022_v41, %v1835_v3 }
 0x19e   : > { %2371 = vst [vmem:[#allocation2 + $0x49] sm:$0xff] %v2331_v51  ;;  %v2329_v40 = vmax.f32 %v2309_v39, 0.0  ;;  %v2312_v45 = vadd.f32 %v7059_v13, %v2285_v1  ;;  %v2283_v5 = vadd.f32 %v2218_v23, %v2055_v46  ;;  %v2035_v46 = vpop.f32.mrf.mxu1  ;;  %v2065_v39 = vadd.f32 %v5714_v18, %v1837_v10  ;;  %v7781_v23 = vld [vmem:[#allocation10_spill] sm:$0xff] }
 0x19f   : > { %v5745_v20 = vpop.f32.mrf.mxu0 }
 0x1a0   : > { %2369 = vst [vmem:[#allocation2 + $0x31] sm:$0xff] %v2329_v40  ;;  %v2332_v17 = vmax.f32 %v2312_v45, 0.0  ;;  %v2310_v52 = vadd.f32 %v7059_v13, %v2283_v5  ;;  %v2288_v8 = vadd.f32 %v5745_v20, %v2060_v32  ;;  %v7780_v32 = vld [vmem:[#allocation9_spill] sm:$0xff]  ;;  %v7782_v40 = vld [vmem:[#allocation16_spill] sm:$0xff]  ;;  %v5718_v44 = vpop.f32.mrf.mxu1 }
 0x1a1   : > { %v2231_v48 = vpop.f32.mrf.mxu0  ;;  %v1610_v7 = vadd.f32 %v7781_v23, %v7780_v32  ;;  %v1838_v45 = vadd.f32 %v7782_v40, %v1607_v31 }
 0x1a2   : > { %2372 = vst [vmem:[#allocation2 + $0x51] sm:$0xff] %v2332_v17  ;;  %v2330_v19 = vmax.f32 %v2310_v52, 0.0  ;;  %v2315_v59 = vadd.f32 %v7059_v13, %v2288_v8  ;;  %v2286_v24 = vadd.f32 %v2231_v48, %v2058_v27  ;;  %v7783_v17 = vld [vmem:[#allocation11_spill] sm:$0xff]  ;;  %v7784_v52 = vld [vmem:[#allocation12_spill] sm:$0xff]  ;;  %v2068_v8 = vadd.f32 %v5717_v22, %v1840_v14 }
 0x1a3   : > { %v5746_v9 = vpop.f32.mrf.mxu0  ;;  %v1608_v18 = vadd.f32 %v7784_v52, %v7783_v17  ;;  %v1841_v48 = vadd.f32 %v7044_v58, %v1610_v7 }
 0x1a4   : > { %2370 = vst [vmem:[#allocation2 + $0x39] sm:$0xff] %v2330_v19  ;;  %v2335_v33 = vmax.f32 %v2315_v59, 0.0  ;;  %v2313_v4 = vadd.f32 %v7059_v13, %v2286_v24  ;;  %v2289_v54 = vadd.f32 %v5746_v9, %v2061_v57  ;;  %v2066_v24 = vadd.f32 %v2035_v46, %v1838_v45 }
 0x1a5   : > { %v2234_v26 = vpop.f32.mrf.mxu0  ;;  %v1839_v55 = vadd.f32 %v7050_v35, %v1608_v18 }
 0x1a6   : > { %2375 = vst [vmem:[#allocation2 + $0x79] sm:$0xff] %v2335_v33  ;;  %v2333_v0 = vmax.f32 %v2313_v4, 0.0  ;;  %v2316_v50 = vadd.f32 %v7059_v13, %v2289_v54  ;;  %v2287_v16 = vadd.f32 %v2234_v26, %v2059_v43  ;;  %v2038_v33 = vpop.f32.mrf.mxu1  ;;  %v2069_v54 = vadd.f32 %v5718_v44, %v1841_v48 }
 0x1a7   : > { %v5749_v49 = vpop.f32.mrf.mxu0 }
 0x1a8   : > { %2373 = vst [vmem:[#allocation2 + $0x61] sm:$0xff] %v2333_v0  ;;  %v2336_v21 = vmax.f32 %v2316_v50, 0.0  ;;  %v2314_v53 = vadd.f32 %v7059_v13, %v2287_v16  ;;  %v2292_v6 = vadd.f32 %v5749_v49, %v2064_v60  ;;  %v2067_v60 = vadd.f32 %v2038_v33, %v1839_v55 }
 0x1a9   : > { %v2247_v51 = vpop.f32.mrf.mxu0 }
 0x1aa   : > { %2376 = vst [vmem:[#allocation2 + $0x81] sm:$0xff] %v2336_v21  ;;  %v2334_v1 = vmax.f32 %v2314_v53, 0.0  ;;  %v2319_v42 = vadd.f32 %v7059_v13, %v2292_v6  ;;  %v2290_v29 = vadd.f32 %v2247_v51, %v2062_v25 }
 0x1ab   : > { %v5750_v5 = vpop.f32.mrf.mxu0 }
 0x1ac   : > { %2374 = vst [vmem:[#allocation2 + $0x69] sm:$0xff] %v2334_v1  ;;  %v2339_v27 = vmax.f32 %v2319_v42, 0.0  ;;  %v2317_v20 = vadd.f32 %v7059_v13, %v2290_v29  ;;  %v2293_v61 = vadd.f32 %v5750_v5, %v2065_v39 }
 0x1ad   : > { %v2250_v2 = vpop.f32.mrf.mxu0 }
 0x1ae   : > { %2379 = vst [vmem:[#allocation2 + $0xa9] sm:$0xff] %v2339_v27  ;;  %v2337_v57 = vmax.f32 %v2317_v20, 0.0  ;;  %v2320_v19 = vadd.f32 %v7059_v13, %v2293_v61  ;;  %v2291_v59 = vadd.f32 %v2250_v2, %v2063_v11 }
 0x1af   : > { %v5753_v41 = vpop.f32.mrf.mxu0 }
 0x1b0   : > { %2377 = vst [vmem:[#allocation2 + $0x91] sm:$0xff] %v2337_v57  ;;  %v2340_v12 = vmax.f32 %v2320_v19, 0.0  ;;  %v2318_v9 = vadd.f32 %v7059_v13, %v2291_v59  ;;  %v2296_v43 = vadd.f32 %v5753_v41, %v2068_v8 }
 0x1b1   : > { %v2263_v4 = vpop.f32.mrf.mxu0 }
 0x1b2   : > { %2380 = vst [vmem:[#allocation2 + $0xb1] sm:$0xff] %v2340_v12  ;;  %v2338_v56 = vmax.f32 %v2318_v9, 0.0  ;;  %v2323_v58 = vadd.f32 %v7059_v13, %v2296_v43  ;;  %v2294_v63 = vadd.f32 %v2263_v4, %v2066_v24 }
 0x1b3   : > { %v5754_v28 = vpop.f32.mrf.mxu0 }
 0x1b4   : > { %2378 = vst [vmem:[#allocation2 + $0x99] sm:$0xff] %v2338_v56  ;;  %v2343_v22 = vmax.f32 %v2323_v58, 0.0  ;;  %v2321_v26 = vadd.f32 %v7059_v13, %v2294_v63  ;;  %v2297_v35 = vadd.f32 %v5754_v28, %v2069_v54 }
 0x1b5   : > { %v2266_v62 = vpop.f32.mrf.mxu0 }
 0x1b6   : > { %2383 = vst [vmem:[#allocation2 + $0xd9] sm:$0xff] %v2343_v22  ;;  %v2341_v10 = vmax.f32 %v2321_v26, 0.0  ;;  %v2324_v0 = vadd.f32 %v7059_v13, %v2297_v35  ;;  %v2295_v50 = vadd.f32 %v2266_v62, %v2067_v60 }
 0x1b8   : > { %2381 = vst [vmem:[#allocation2 + $0xc1] sm:$0xff] %v2341_v10  ;;  %v2344_v16 = vmax.f32 %v2324_v0, 0.0  ;;  %v2322_v37 = vadd.f32 %v7059_v13, %v2295_v50  ;;  %2388 = sbr.rel (%p4880_p7) target bundleno = 448 (0x1c0), region = 48 }
 0x1ba   : > { %2384 = vst [vmem:[#allocation2 + $0xe1] sm:$0xff] %v2344_v16  ;;  %v2342_v38 = vmax.f32 %v2322_v37, 0.0 }
 0x1bc   : > { %2382 = vst [vmem:[#allocation2 + $0xc9] sm:$0xff] %v2342_v38 }
 0x1bd   : > { %v6328_v30 = vmov 0.0  }
 0x1be   : > { %2389 = vst [vmem:[#allocation2] sm:$0xff] %v6328_v30  ;;  %2390 = vst [vmem:[#allocation2 + $0x8] sm:$0xff] %v6328_v30 }
 0x1bf   : > { %2391 = vst [vmem:[#allocation2 + $0x10] sm:$0x3] %v6328_v30 }
 0x1c0 PF: > { %p4881_p8 = scmp.ne.s32.totalorder %s6309_s21, 1 }
 0x1c2   : > { %2395 = sbr.rel (%p4881_p8) target bundleno = 458 (0x1ca), region = 52 }
 0x1c7   : > { %v6329_v25 = vmov 0.0  }
 0x1c8   : > { %2397 = vst [vmem:[#allocation2 + $0xd8] sm:$0xff] %v6329_v25  ;;  %2398 = vst [vmem:[#allocation2 + $0xe0] sm:$0xff] %v6329_v25 }
 0x1c9   : > { %2399 = vst [vmem:[#allocation2 + $0xe8] sm:$0x3] %v6329_v25 }
 0x1ca PF: > { %v6207_v13 = vld [vmem:[%s7753_s3 + $0x78] sm:$0xff]   ;;  %v6208_v49 = vld [vmem:[%s7753_s3 + $0x70] sm:$0xff]   ;;  %v6210_v3 = vld [vmem:[%s7753_s3 + $0x68] sm:$0xff]  }
 0x1cb   : > { %5755 = vmatprep.subr.bf16.mxu1 %v6207_v13  ;;  %v6209_v36 = vld [vmem:[%s7753_s3 + $0xb8] sm:$0xff]   ;;  %v6211_v21 = vld [vmem:[%s7753_s3 + $0xb0] sm:$0xff]   ;;  %v6213_v53 = vld [vmem:[%s7753_s3 + $0xa8] sm:$0xff]  }
 0x1cc   : > { %5756 = vmatpush3.bf16.msra.mxu1 %v6207_v13  ;;  %5819 = vmatprep.subr.bf16.mxu0 %v6209_v36  ;;  %v6212_v6 = vld [vmem:[%s7753_s3 + $0x60] sm:$0xff]   ;;  %v6214_v34 = vld [vmem:[%s7753_s3 + $0x58] sm:$0xff]   ;;  %v2441_v14 = vld [vmem:[#allocation2 + $0x9] sm:$0xff] }
 0x1cd   : > { %5757 = vmatprep.subr.bf16.mxu1 %v6208_v49  ;;  %5820 = vmatpush3.bf16.msra.mxu0 %v6209_v36  ;;  %v6215_v47 = vld [vmem:[%s7753_s3 + $0xa0] sm:$0xff]   ;;  %v6217_v31 = vld [vmem:[%s7753_s3 + $0x98] sm:$0xff]   ;;  %v6216_v46 = vld [vmem:[%s7753_s3 + $0x50] sm:$0xff]  }
 0x1ce   : > { %5821 = vmatprep.subr.bf16.mxu0 %v6211_v21  ;;  %v2440_v15 = vld [vmem:[#allocation2 + $0x1] sm:$0xff]  ;;  %v6219_v39 = vld [vmem:[%s7753_s3 + $0x90] sm:$0xff]   ;;  %v2442_v40 = vld [vmem:[#allocation2 + $0x19] sm:$0xff] }
 0x1cf   : > { %v2456_v51 = vpack.c.bf16 %v2441_v14, %v2440_v15  ;;  %v2771_v1 = vld [vmem:[#allocation2 + $0x2] sm:$0xff]  ;;  %v2772_v42 = vld [vmem:[#allocation2 + $0xa] sm:$0xff]  ;;  %v6222_v5 = vld [vmem:[%s7753_s3 + $0x38] sm:$0xff]  }
 0x1d0   : > { %5758 = vmatpush3.bf16.msra.mxu1 %v6208_v49  ;;  %v6218_v29 = vld [vmem:[%s7753_s3 + $0x48] sm:$0xff]   ;;  %v2787_v32 = vpack.c.bf16 %v2772_v42, %v2771_v1  ;;  %v6220_v7 = vld [vmem:[%s7753_s3 + $0x40] sm:$0xff]   ;;  %v2444_v61 = vld [vmem:[#allocation2 + $0x31] sm:$0xff] }
 0x1d1   : > { %5759 = vmatprep.subr.bf16.mxu1 %v6210_v3  ;;  %5822 = vmatpush3.bf16.msra.mxu0 %v6211_v21  ;;  %v6221_v23 = vld [vmem:[%s7753_s3 + $0x88] sm:$0xff]   ;;  %v6223_v11 = vld [vmem:[%s7753_s3 + $0x80] sm:$0xff]   ;;  %v6225_v52 = vld [vmem:[%s7753_s3 + $0x138] sm:$0xff]  }
 0x1d2   : > { %5823 = vmatprep.subr.bf16.mxu0 %v6213_v53  ;;  %5771 = vmatprep.mubr.bf16.mxu1 %v2456_v51  ;;  %v2443_v45 = vld [vmem:[#allocation2 + $0x21] sm:$0xff]  ;;  %v2445_v17 = vld [vmem:[#allocation2 + $0x39] sm:$0xff]  ;;  %v6224_v48 = vld [vmem:[%s7753_s3 + $0x30] sm:$0xff]  }
 0x1d3   : > { %5835 = vmatprep.mubr.bf16.mxu0 %v2787_v32  ;;  %v2773_v27 = vld [vmem:[#allocation2 + $0x1a] sm:$0xff]  ;;  %v2774_v20 = vld [vmem:[#allocation2 + $0x22] sm:$0xff]  ;;  %v2775_v18 = vld [vmem:[#allocation2 + $0x32] sm:$0xff]  ;;  %v7190_v8 = vpack.c.bf16 %v2443_v45, %v2442_v40  ;;  %v7192_v2 = vpack.c.bf16 %v2445_v17, %v2444_v61 }
 0x1d4   : > { %5760 = vmatpush3.bf16.msra.mxu1 %v6210_v3  ;;  %v2776_v44 = vld [vmem:[#allocation2 + $0x3a] sm:$0xff]  ;;  %v7197_v57 = vpack.c.bf16 %v2774_v20, %v2773_v27  ;;  %v2446_v19 = vld [vmem:[#allocation2 + $0x49] sm:$0xff]  ;;  %v2447_v59 = vld [vmem:[#allocation2 + $0x51] sm:$0xff] }
 0x1d5   : > { %5761 = vmatprep.subr.bf16.mxu1 %v6212_v6  ;;  %5824 = vmatpush3.bf16.msra.mxu0 %v6213_v53  ;;  %v7199_v24 = vpack.c.bf16 %v2776_v44, %v2775_v18  ;;  %v6226_v41 = vld [vmem:[%s7753_s3 + $0x28] sm:$0xff]   ;;  %v6227_v55 = vld [vmem:[%s7753_s3 + $0x130] sm:$0xff]   ;;  %v7214_v56 = vpack.c.bf16 %v2447_v59, %v2446_v19  ;;  %v6228_v28 = vld [vmem:[%s7753_s3 + $0x20] sm:$0xff]  }
 0x1d6   : > { %5825 = vmatprep.subr.bf16.mxu0 %v6215_v47  ;;  %v2777_v12 = vld [vmem:[#allocation2 + $0x4a] sm:$0xff]  ;;  %v2778_v9 = vld [vmem:[#allocation2 + $0x52] sm:$0xff]  ;;  %v2448_v43 = vld [vmem:[#allocation2 + $0x61] sm:$0xff] }
 0x1d7   : > { %v6229_v33 = vld [vmem:[%s7753_s3 + $0x128] sm:$0xff]   ;;  %v7221_v60 = vpack.c.bf16 %v2778_v9, %v2777_v12  ;;  %v2450_v22 = vld [vmem:[#allocation2 + $0x79] sm:$0xff]  ;;  %v2452_v16 = vld [vmem:[#allocation2 + $0x91] sm:$0xff] }
 0x1d8   : > { %5762 = vmatpush3.bf16.msra.mxu1 %v6212_v6  ;;  %v2449_v4 = vld [vmem:[#allocation2 + $0x69] sm:$0xff]  ;;  %v2451_v35 = vld [vmem:[#allocation2 + $0x81] sm:$0xff]  ;;  %v6230_v62 = vld [vmem:[%s7753_s3 + $0x18] sm:$0xff]  }
 0x1d9   : > { %5763 = vmatprep.subr.bf16.mxu1 %v6214_v34  ;;  %5826 = vmatpush3.bf16.msra.mxu0 %v6215_v47  ;;  %v2779_v54 = vld [vmem:[#allocation2 + $0x62] sm:$0xff]  ;;  %v2780_v58 = vld [vmem:[#allocation2 + $0x6a] sm:$0xff]  ;;  %v7216_v63 = vpack.c.bf16 %v2449_v4, %v2448_v43  ;;  %v2781_v0 = vld [vmem:[#allocation2 + $0x7a] sm:$0xff]  ;;  %v7238_v25 = vpack.c.bf16 %v2451_v35, %v2450_v22 }
 0x1da   : > { %5827 = vmatprep.subr.bf16.mxu0 %v6217_v31  ;;  %v7223_v26 = vpack.c.bf16 %v2780_v58, %v2779_v54  ;;  %v6231_v10 = vld [vmem:[%s7753_s3 + $0x120] sm:$0xff]   ;;  %v6233_v37 = vld [vmem:[%s7753_s3 + $0x118] sm:$0xff]   ;;  %v6232_v36 = vld [vmem:[%s7753_s3 + $0x10] sm:$0xff]  }
 0x1db   : > { %v2782_v50 = vld [vmem:[#allocation2 + $0x82] sm:$0xff]  ;;  %v2453_v38 = vld [vmem:[#allocation2 + $0x99] sm:$0xff]  ;;  %v6235_v6 = vld [vmem:[%s7753_s3 + $0x110] sm:$0xff]  }
 0x1dc   : > { %5764 = vmatpush3.bf16.msra.mxu1 %v6214_v34  ;;  %v2783_v30 = vld [vmem:[#allocation2 + $0x92] sm:$0xff]  ;;  %v2784_v13 = vld [vmem:[#allocation2 + $0x9a] sm:$0xff]  ;;  %v7240_v49 = vpack.c.bf16 %v2453_v38, %v2452_v16  ;;  %v7245_v3 = vpack.c.bf16 %v2782_v50, %v2781_v0  ;;  %v2454_v21 = vld [vmem:[#allocation2 + $0xa9] sm:$0xff] }
 0x1dd   : > { %5765 = vmatprep.subr.bf16.mxu1 %v6216_v46  ;;  %5828 = vmatpush3.bf16.msra.mxu0 %v6217_v31  ;;  %v7247_v53 = vpack.c.bf16 %v2784_v13, %v2783_v30  ;;  %v2455_v47 = vld [vmem:[#allocation2 + $0xb1] sm:$0xff]  ;;  %v6234_v34 = vld [vmem:[%s7753_s3 + $0x8] sm:$0xff]   ;;  %v2400_v31 = vld [vmem:[#allocation2] sm:$0xff] }
 0x1de   : > { %5829 = vmatprep.subr.bf16.mxu0 %v6219_v39  ;;  %v2401_v15 = vld [vmem:[#allocation2 + $0x8] sm:$0xff]  ;;  %v7259_v51 = vpack.c.bf16 %v2455_v47, %v2454_v21  ;;  %v6236_v42 = vld [vmem:[%s7753_s3] sm:$0xff]   ;;  %v2402_v32 = vld [vmem:[#allocation2 + $0x18] sm:$0xff] }
 0x1df   : > { %v2785_v14 = vld [vmem:[#allocation2 + $0xaa] sm:$0xff]  ;;  %v2416_v1 = vpack.c.bf16 %v2401_v15, %v2400_v31  ;;  %v6239_v40 = vld [vmem:[%s7753_s3 + $0x100] sm:$0xff]   ;;  %v6241_v27 = vld [vmem:[%s7753_s3 + $0x1b8] sm:$0xff]  }
 0x1e0   : > { %5766 = vmatpush3.bf16.msra.mxu1 %v6216_v46  ;;  %v2786_v46 = vld [vmem:[#allocation2 + $0xb2] sm:$0xff]  ;;  %v2406_v17 = vld [vmem:[#allocation2 + $0x48] sm:$0xff]  ;;  %v2408_v44 = vld [vmem:[#allocation2 + $0x60] sm:$0xff] }
 0x1e1   : > { %5767 = vmatprep.subr.bf16.mxu1 %v6218_v29  ;;  %5830 = vmatpush3.bf16.msra.mxu0 %v6219_v39  ;;  %v6237_v39 = vld [vmem:[%s7753_s3 + $0x108] sm:$0xff]   ;;  %v2404_v45 = vld [vmem:[#allocation2 + $0x30] sm:$0xff]  ;;  %v2411_v12 = vld [vmem:[#allocation2 + $0x80] sm:$0xff] }
 0x1e2   : > { %5831 = vmatprep.subr.bf16.mxu0 %v6221_v23  ;;  %v6240_v61 = vld [vmem:[%s7753_s3 + $0xf0] sm:$0xff]   ;;  %v6242_v18 = vld [vmem:[%s7753_s3 + $0xe8] sm:$0xff]   ;;  %v6247_v9 = vld [vmem:[%s7753_s3 + $0x1a0] sm:$0xff]  }
 0x1e3   : > { %v6245_v59 = vld [vmem:[%s7753_s3 + $0x1a8] sm:$0xff]   ;;  %v6246_v43 = vld [vmem:[%s7753_s3 + $0xd8] sm:$0xff]   ;;  %v2415_v22 = vld [vmem:[#allocation2 + $0xb0] sm:$0xff] }
 0x1e4   : > { %5768 = vmatpush3.bf16.msra.mxu1 %v6218_v29  ;;  %v7267_v29 = vpack.c.bf16 %v2786_v46, %v2785_v14  ;;  %v2413_v4 = vld [vmem:[#allocation2 + $0x98] sm:$0xff]  ;;  %v6251_v35 = vld [vmem:[%s7753_s3 + $0x190] sm:$0xff]   ;;  %v6253_v16 = vld [vmem:[%s7753_s3 + $0x188] sm:$0xff]  }
 0x1e5   : > { %5769 = vmatprep.subr.bf16.mxu1 %v6220_v7  ;;  %5832 = vmatpush3.bf16.msra.mxu0 %v6221_v23  ;;  %v2403_v23 = vld [vmem:[#allocation2 + $0x20] sm:$0xff]  ;;  %v3191_v0 = vld [vmem:[#allocation2 + $0xc9] sm:$0xff]  ;;  %v6257_v13 = vld [vmem:[%s7753_s3 + $0x238] sm:$0xff]  }
 0x1e6   : > { %5833 = vmatprep.subr.bf16.mxu0 %v6223_v11  ;;  %v6255_v30 = vld [vmem:[%s7753_s3 + $0x180] sm:$0xff]   ;;  %v6259_v21 = vld [vmem:[%s7753_s3 + $0x230] sm:$0xff]   ;;  %v6261_v47 = vld [vmem:[%s7753_s3 + $0x228] sm:$0xff]  }
 0x1e7   : > { %v6263_v31 = vld [vmem:[%s7753_s3 + $0x220] sm:$0xff]   ;;  %v6262_v15 = vld [vmem:[%s7753_s3 + $0x158] sm:$0xff]   ;;  %v6264_v46 = vld [vmem:[%s7753_s3 + $0x150] sm:$0xff]  }
 0x1e8   : > { %5770 = vmatpush3.bf16.msra.mxu1 %v6220_v7  ;;  %v6238_v7 = vld [vmem:[%s7753_s3 + $0xf8] sm:$0xff]  }
 0x1e9   : > { %5787 = vmatprep.subr.bf16.mxu1 %v6222_v5  ;;  %5834 = vmatpush3.bf16.msra.mxu0 %v6223_v11  ;;  %v7278_v11 = vpack.c.bf16 %v2403_v23, %v2402_v32  ;;  %v6265_v14 = vld [vmem:[%s7753_s3 + $0x218] sm:$0xff]   ;;  %v6266_v23 = vld [vmem:[%s7753_s3 + $0x148] sm:$0xff]  }
 0x1ea   : > { %5883 = vmatprep.subr.bf16.mxu0 %v6225_v52 }
 0x1eb   : > { %5772 = vmatmul.mubr.bf16.vlgmr.msra.gmra.mxu1 %v7190_v8 }
 0x1ec   : > { %5788 = vmatpush3.bf16.msra.mxu1 %v6222_v5  ;;  %5775 = vmatprep.mubr.bf16.mxu1 %v7192_v2  ;;  %v2405_v5 = vld [vmem:[#allocation2 + $0x38] sm:$0xff] }
 0x1ed   : > { %5789 = vmatprep.subr.bf16.mxu1 %v6224_v48  ;;  %5836 = vmatmul.mubr.bf16.vlgmr.msra.gmra.mxu0 %v7197_v57  ;;  %v7283_v20 = vpack.c.bf16 %v2405_v5, %v2404_v45  ;;  %v6269_v45 = vld [vmem:[%s7753_s3 + $0x208] sm:$0xff]   ;;  %v6268_v5 = vld [vmem:[%s7753_s3 + $0x140] sm:$0xff]  }
 0x1ee   : > { %5884 = vmatpush3.bf16.msra.mxu0 %v6225_v52  ;;  %5839 = vmatprep.mubr.bf16.mxu0 %v7199_v24  ;;  %v2407_v52 = vld [vmem:[#allocation2 + $0x50] sm:$0xff] }
 0x1ef   : > { %5885 = vmatprep.subr.bf16.mxu0 %v6227_v55  ;;  %v7298_v19 = vpack.c.bf16 %v2407_v52, %v2406_v17  ;;  %v7432_v17 = vld [vmem:[%s7755_s5 + $0x30] sm:$0xff]   ;;  %v6274_v52 = vld [vmem:[%s7753_s3 + $0x1e8] sm:$0xff]  }
 0x1f0   : > { %5790 = vmatpush3.bf16.msra.mxu1 %v6224_v48  ;;  %v2409_v48 = vld [vmem:[#allocation2 + $0x68] sm:$0xff] }
 0x1f1   : > { %5791 = vmatprep.subr.bf16.mxu1 %v6226_v41 }
 0x1f2   : > { %5886 = vmatpush3.bf16.msra.mxu0 %v6227_v55  ;;  %v6244_v55 = vld [vmem:[%s7753_s3 + $0xe0] sm:$0xff]  }
 0x1f3   : > { %5776 = vmatmul.mubr.bf16.gmra.mxu1 %v7214_v56  ;;  %5887 = vmatprep.subr.bf16.mxu0 %v6229_v33 }
 0x1f4   : > { %5792 = vmatpush3.bf16.msra.mxu1 %v6226_v41  ;;  %5779 = vmatprep.mubr.bf16.mxu1 %v7216_v63  ;;  %v7303_v41 = vpack.c.bf16 %v2409_v48, %v2408_v44  ;;  %v3392_v44 = vld [vmem:[#allocation2 + $0xc2] sm:$0xff]  ;;  %v3393_v48 = vld [vmem:[#allocation2 + $0xca] sm:$0xff] }
 0x1f5   : > { %5793 = vmatprep.subr.bf16.mxu1 %v6228_v28  ;;  %5840 = vmatmul.mubr.bf16.gmra.mxu0 %v7221_v60 }
 0x1f6   : > { %5888 = vmatpush3.bf16.msra.mxu0 %v6229_v33  ;;  %5843 = vmatprep.mubr.bf16.mxu0 %v7223_v26  ;;  %v2412_v33 = vld [vmem:[#allocation2 + $0x90] sm:$0xff] }
 0x1f7   : > { %5889 = vmatprep.subr.bf16.mxu0 %v6231_v10  ;;  %v7323_v58 = vpack.c.bf16 %v2413_v4, %v2412_v33  ;;  %v5084_v33 = vld [vmem:[%s6437_s20 + $0x39] sm:$0xff] }
 0x1f8   : > { %5794 = vmatpush3.bf16.msra.mxu1 %v6228_v28  ;;  %v6248_v28 = vld [vmem:[%s7753_s3 + $0xd0] sm:$0xff]   ;;  %v6284_v4 = vld [vmem:[%s7753_s3 + $0x1c0] sm:$0xff]  }
 0x1f9   : > { %5795 = vmatprep.subr.bf16.mxu1 %v6230_v62 }
 0x1fa   : > { %5890 = vmatpush3.bf16.msra.mxu0 %v6231_v10  ;;  %v3190_v10 = vld [vmem:[#allocation2 + $0xc1] sm:$0xff] }
 0x1fb   : > { %5780 = vmatmul.mubr.bf16.gmra.mxu1 %v7238_v25  ;;  %5891 = vmatprep.subr.bf16.mxu0 %v6233_v37  ;;  %v7346_v38 = vpack.c.bf16 %v3191_v0, %v3190_v10  ;;  %v5086_v10 = vld [vmem:[%s6437_s20 + $0x51] sm:$0xff] }
 0x1fc   : > { %5796 = vmatpush3.bf16.msra.mxu1 %v6230_v62  ;;  %5783 = vmatprep.mubr.bf16.mxu1 %v7240_v49  ;;  %v6250_v62 = vld [vmem:[%s7753_s3 + $0xc8] sm:$0xff]  }
 0x1fd   : > { %5797 = vmatprep.subr.bf16.mxu1 %v6232_v36  ;;  %5844 = vmatmul.mubr.bf16.gmra.mxu0 %v7245_v3 }
 0x1fe   : > { %5892 = vmatpush3.bf16.msra.mxu0 %v6233_v37  ;;  %5847 = vmatprep.mubr.bf16.mxu0 %v7247_v53  ;;  %v6252_v37 = vld [vmem:[%s7753_s3 + $0xc0] sm:$0xff]  }
 0x1ff   : > { %5893 = vmatprep.subr.bf16.mxu0 %v6235_v6 }
 0x200   : > { %5798 = vmatpush3.bf16.msra.mxu1 %v6232_v36  ;;  %v6256_v36 = vld [vmem:[%s7753_s3 + $0x170] sm:$0xff]  }
 0x201   : > { %5799 = vmatprep.subr.bf16.mxu1 %v6234_v34 }
 0x202   : > { %5894 = vmatpush3.bf16.msra.mxu0 %v6235_v6  ;;  %v6258_v6 = vld [vmem:[%s7753_s3 + $0x168] sm:$0xff]  }
 0x203   : > { %5784 = vmatmul.mubr.bf16.gmra.mxu1 %v7259_v51  ;;  %5895 = vmatprep.subr.bf16.mxu0 %v6237_v39 }
 0x204   : > { %5800 = vmatpush3.bf16.msra.mxu1 %v6234_v34  ;;  %5803 = vmatprep.mubr.bf16.mxu1 %v2416_v1  ;;  %v6260_v34 = vld [vmem:[%s7753_s3 + $0x160] sm:$0xff]   ;;  %v2989_v1 = vld [vmem:[#allocation2 + $0xc8] sm:$0xff] }
 0x205   : > { %5801 = vmatprep.subr.bf16.mxu1 %v6236_v42  ;;  %5848 = vmatmul.mubr.bf16.gmra.mxu0 %v7267_v29 }
 0x206   : > { %5896 = vmatpush3.bf16.msra.mxu0 %v6237_v39  ;;  %5899 = vmatprep.mubr.bf16.mxu0 %v7190_v8  ;;  %v6243_v8 = vld [vmem:[%s7753_s3 + $0x1b0] sm:$0xff]   ;;  %v2988_v39 = vld [vmem:[#allocation2 + $0xc0] sm:$0xff] }
 0x207   : > { %5897 = vmatprep.subr.bf16.mxu0 %v6239_v40  ;;  %v2997_v32 = vpack.c.bf16 %v2989_v1, %v2988_v39  ;;  %v5094_v39 = vld [vmem:[%s6437_s20 + $0xb1] sm:$0xff]  ;;  %v5095_v1 = vld [vmem:[%s6437_s20 + $0xc1] sm:$0xff] }
 0x208   : > { %5802 = vmatpush3.bf16.msra.mxu1 %v6236_v42  ;;  %v6267_v42 = vld [vmem:[%s7753_s3 + $0x210] sm:$0xff]  }
 0x209   : > { %5851 = vmatprep.subr.bf16.mxu1 %v6238_v7 }
 0x20a   : > { %5898 = vmatpush3.bf16.msra.mxu0 %v6239_v40  ;;  %v3596_v40 = vld [vmem:[#allocation2 + $0xe0] sm:$0xff] }
 0x20b   : > { %5804 = vmatmul.mubr.bf16.vlgmr.msra.gmra.mxu1 %v7278_v11  ;;  %5947 = vmatprep.subr.bf16.mxu0 %v6241_v27 }
 0x20c   : > { %5852 = vmatpush3.bf16.msra.mxu1 %v6238_v7  ;;  %5807 = vmatprep.mubr.bf16.mxu1 %v7283_v20  ;;  %v3595_v7 = vld [vmem:[#allocation2 + $0xd8] sm:$0xff] }
 0x20d   : > { %5853 = vmatprep.subr.bf16.mxu1 %v6240_v61  ;;  %5900 = vmatmul.mubr.bf16.vlgmr.msra.gmra.mxu0 %v7192_v2  ;;  %v2410_v2 = vld [vmem:[#allocation2 + $0x78] sm:$0xff] }
 0x20e   : > { %5948 = vmatpush3.bf16.msra.mxu0 %v6241_v27  ;;  %5903 = vmatprep.mubr.bf16.mxu0 %v7214_v56  ;;  %v7318_v54 = vpack.c.bf16 %v2411_v12, %v2410_v2  ;;  %v6249_v56 = vld [vmem:[%s7753_s3 + $0x198] sm:$0xff]   ;;  %v6271_v27 = vld [vmem:[%s7753_s3 + $0x200] sm:$0xff]  }
 0x20f   : > { %5949 = vmatprep.subr.bf16.mxu0 %v6243_v8  ;;  %v3999_v2 = vld [vmem:[#allocation2 + $0xda] sm:$0xff]  ;;  %v4000_v12 = vld [vmem:[#allocation2 + $0xe2] sm:$0xff] }
 0x210   : > { %5854 = vmatpush3.bf16.msra.mxu1 %v6240_v61  ;;  %v7422_v61 = vld [vmem:[%s7755_s5 + $0x38] sm:$0xff]  }
 0x211   : > { %5855 = vmatprep.subr.bf16.mxu1 %v6242_v18 }
 0x212   : > { %5950 = vmatpush3.bf16.msra.mxu0 %v6243_v8  ;;  %v6278_v8 = vld [vmem:[%s7753_s3 + $0x1d8] sm:$0xff]  }
 0x213   : > { %5808 = vmatmul.mubr.bf16.gmra.mxu1 %v7298_v19  ;;  %5951 = vmatprep.subr.bf16.mxu0 %v6245_v59 }
 0x214   : > { %5856 = vmatpush3.bf16.msra.mxu1 %v6242_v18  ;;  %5811 = vmatprep.mubr.bf16.mxu1 %v7303_v41  ;;  %v7456_v18 = vld [vmem:[%s7755_s5 + $0x20] sm:$0xff]  }
 0x215   : > { %5857 = vmatprep.subr.bf16.mxu1 %v6244_v55  ;;  %5904 = vmatmul.mubr.bf16.gmra.mxu0 %v7216_v63  ;;  %v2414_v63 = vld [vmem:[#allocation2 + $0xa8] sm:$0xff] }
 0x216   : > { %5952 = vmatpush3.bf16.msra.mxu0 %v6245_v59  ;;  %5907 = vmatprep.mubr.bf16.mxu0 %v7238_v25  ;;  %v7338_v50 = vpack.c.bf16 %v2415_v22, %v2414_v63  ;;  %v6254_v25 = vld [vmem:[%s7753_s3 + $0x178] sm:$0xff]   ;;  %v3401_v59 = vpack.c.bf16 %v3393_v48, %v3392_v44  ;;  %v3787_v22 = vld [vmem:[#allocation2 + $0x61] sm:$0xff] }
 0x217   : > { %5953 = vmatprep.subr.bf16.mxu0 %v6247_v9  ;;  %v3786_v63 = vld [vmem:[#allocation2 + $0x51] sm:$0xff] }
 0x218   : > { %5858 = vmatpush3.bf16.msra.mxu1 %v6244_v55  ;;  %v3784_v55 = vld [vmem:[#allocation2 + $0x39] sm:$0xff] }
 0x219   : > { %5859 = vmatprep.subr.bf16.mxu1 %v6246_v43 }
 0x21a   : > { %5954 = vmatpush3.bf16.msra.mxu0 %v6247_v9  ;;  %v6285_v9 = vld [vmem:[%s7755_s5 + $0x8] sm:$0xff]  }
 0x21b   : > { %5812 = vmatmul.mubr.bf16.gmra.mxu1 %v7318_v54  ;;  %5955 = vmatprep.subr.bf16.mxu0 %v6249_v56 }
 0x21c   : > { %5860 = vmatpush3.bf16.msra.mxu1 %v6246_v43  ;;  %5815 = vmatprep.mubr.bf16.mxu1 %v7323_v58  ;;  %v5083_v43 = vld [vmem:[%s6437_s20 + $0x31] sm:$0xff] }
 0x21d   : > { %5861 = vmatprep.subr.bf16.mxu1 %v6248_v28  ;;  %5908 = vmatmul.mubr.bf16.gmra.mxu0 %v7240_v49 }
 0x21e   : > { %5956 = vmatpush3.bf16.msra.mxu0 %v6249_v56  ;;  %5911 = vmatprep.mubr.bf16.mxu0 %v7259_v51  ;;  %v4226_v56 = vpack.c.bf16 %v5084_v33, %v5083_v43 }
 0x21f   : > { %5957 = vmatprep.subr.bf16.mxu0 %v6251_v35 }
 0x220   : > { %5862 = vmatpush3.bf16.msra.mxu1 %v6248_v28  ;;  %v3785_v28 = vld [vmem:[#allocation2 + $0x49] sm:$0xff] }
 0x221   : > { %5863 = vmatprep.subr.bf16.mxu1 %v6250_v62  ;;  %v3800_v0 = vpack.c.bf16 %v3786_v63, %v3785_v28 }
 0x222   : > { %5958 = vmatpush3.bf16.msra.mxu0 %v6251_v35  ;;  %v3788_v35 = vld [vmem:[#allocation2 + $0x69] sm:$0xff] }
 0x223   : > { %5816 = vmatmul.mubr.bf16.gmra.mxu1 %v7338_v50  ;;  %5959 = vmatprep.subr.bf16.mxu0 %v6253_v16 }
 0x224   : > { %5864 = vmatpush3.bf16.msra.mxu1 %v6250_v62  ;;  %5867 = vmatprep.mubr.bf16.mxu1 %v7278_v11  ;;  %v3604_v11 = vpack.c.bf16 %v3596_v40, %v3595_v7  ;;  %v5085_v62 = vld [vmem:[%s6437_s20 + $0x49] sm:$0xff]  ;;  %v5097_v7 = vld [vmem:[%s6437_s20 + $0xd9] sm:$0xff]  ;;  %v5098_v40 = vld [vmem:[%s6437_s20 + $0xe1] sm:$0xff] }
 0x225   : > { %5865 = vmatprep.subr.bf16.mxu1 %v6252_v37  ;;  %5912 = vmatmul.mubr.bf16.gmra.mxu0 %v7346_v38 }
 0x226   : > { %5960 = vmatpush3.bf16.msra.mxu0 %v6253_v16  ;;  %5963 = vmatprep.mubr.bf16.mxu0 %v7283_v20  ;;  %v4227_v16 = vpack.c.bf16 %v5086_v10, %v5085_v62 }
 0x227   : > { %5961 = vmatprep.subr.bf16.mxu0 %v6255_v30 }
 0x228   : > { %5866 = vmatpush3.bf16.msra.mxu1 %v6252_v37  ;;  %v3789_v37 = vld [vmem:[#allocation2 + $0x79] sm:$0xff] }
 0x229   : > { %5915 = vmatprep.subr.bf16.mxu1 %v6254_v25 }
 0x22a   : > { %5962 = vmatpush3.bf16.msra.mxu0 %v6255_v30  ;;  %v3790_v30 = vld [vmem:[#allocation2 + $0x81] sm:$0xff] }
 0x22b   : > { %5868 = vmatmul.mubr.bf16.vlgmr.msra.gmra.mxu1 %v7283_v20  ;;  %6011 = vmatprep.subr.bf16.mxu0 %v6257_v13  ;;  %v6270_v20 = vld [vmem:[%s7753_s3 + $0x1f8] sm:$0xff]  }
 0x22c   : > { %5916 = vmatpush3.bf16.msra.mxu1 %v6254_v25  ;;  %5871 = vmatprep.mubr.bf16.mxu1 %v7298_v19  ;;  %v3802_v25 = vpack.c.bf16 %v3790_v30, %v3789_v37 }
 0x22d   : > { %5917 = vmatprep.subr.bf16.mxu1 %v6256_v36  ;;  %5964 = vmatmul.mubr.bf16.vlgmr.msra.gmra.mxu0 %v7298_v19  ;;  %v7480_v19 = vld [vmem:[%s7755_s5 + $0x10] sm:$0xff]  }
 0x22e   : > { %6012 = vmatpush3.bf16.msra.mxu0 %v6257_v13  ;;  %5967 = vmatprep.mubr.bf16.mxu0 %v7303_v41  ;;  %v3797_v13 = vld [vmem:[#allocation2 + $0xd9] sm:$0xff] }
 0x22f   : > { %6013 = vmatprep.subr.bf16.mxu0 %v6259_v21 }
 0x230   : > { %5918 = vmatpush3.bf16.msra.mxu1 %v6256_v36  ;;  %v3798_v36 = vld [vmem:[#allocation2 + $0xe1] sm:$0xff] }
 0x231   : > { %5919 = vmatprep.subr.bf16.mxu1 %v6258_v6 }
 0x232   : > { %6014 = vmatpush3.bf16.msra.mxu0 %v6259_v21  ;;  %v5088_v21 = vld [vmem:[%s6437_s20 + $0x69] sm:$0xff] }
 0x233   : > { %5872 = vmatmul.mubr.bf16.gmra.mxu1 %v7303_v41  ;;  %6015 = vmatprep.subr.bf16.mxu0 %v6261_v47  ;;  %v3783_v41 = vld [vmem:[#allocation2 + $0x31] sm:$0xff] }
 0x234   : > { %5920 = vmatpush3.bf16.msra.mxu1 %v6258_v6  ;;  %5875 = vmatprep.mubr.bf16.mxu1 %v7318_v54  ;;  %v3806_v6 = vpack.c.bf16 %v3798_v36, %v3797_v13 }
 0x235   : > { %5921 = vmatprep.subr.bf16.mxu1 %v6260_v34  ;;  %5968 = vmatmul.mubr.bf16.gmra.mxu0 %v7318_v54  ;;  %v4008_v54 = vpack.c.bf16 %v4000_v12, %v3999_v2 }
 0x236   : > { %6016 = vmatpush3.bf16.msra.mxu0 %v6261_v47  ;;  %5971 = vmatprep.mubr.bf16.mxu0 %v7323_v58 }
 0x237   : > { %6017 = vmatprep.subr.bf16.mxu0 %v6263_v31 }
 0x238   : > { %5922 = vmatpush3.bf16.msra.mxu1 %v6260_v34  ;;  %v5091_v34 = vld [vmem:[%s6437_s20 + $0x91] sm:$0xff] }
 0x239   : > { %5923 = vmatprep.subr.bf16.mxu1 %v6262_v15 }
 0x23a   : > { %6018 = vmatpush3.bf16.msra.mxu0 %v6263_v31  ;;  %v5092_v31 = vld [vmem:[%s6437_s20 + $0x99] sm:$0xff] }
 0x23b   : > { %5876 = vmatmul.mubr.bf16.gmra.mxu1 %v7323_v58  ;;  %6019 = vmatprep.subr.bf16.mxu0 %v6265_v14  ;;  %v6286_v58 = vld [vmem:[%s7755_s5] sm:$0xff]  }
 0x23c   : > { %5924 = vmatpush3.bf16.msra.mxu1 %v6262_v15  ;;  %5879 = vmatprep.mubr.bf16.mxu1 %v7338_v50 }
 0x23d   : > { %5925 = vmatprep.subr.bf16.mxu1 %v6264_v46  ;;  %5972 = vmatmul.mubr.bf16.gmra.mxu0 %v7338_v50  ;;  %v3801_v50 = vpack.c.bf16 %v3788_v35, %v3787_v22 }
 0x23e   : > { %6020 = vmatpush3.bf16.msra.mxu0 %v6265_v14  ;;  %5975 = vmatprep.mubr.bf16.mxu0 %v2997_v32  ;;  %v4230_v14 = vpack.c.bf16 %v5092_v31, %v5091_v34 }
 0x23f   : > { %6021 = vmatprep.subr.bf16.mxu0 %v6267_v42 }
 0x240   : > { %5926 = vmatpush3.bf16.msra.mxu1 %v6264_v46  ;;  %v5093_v46 = vld [vmem:[%s6437_s20 + $0xa9] sm:$0xff] }
 0x241   : > { %5927 = vmatprep.subr.bf16.mxu1 %v6266_v23 }
 0x242   : > { %6022 = vmatpush3.bf16.msra.mxu0 %v6267_v42  ;;  %v5096_v42 = vld [vmem:[%s6437_s20 + $0xc9] sm:$0xff] }
 0x243   : > { %5880 = vmatmul.mubr.bf16.gmra.mxu1 %v2997_v32  ;;  %6023 = vmatprep.subr.bf16.mxu0 %v6269_v45  ;;  %v4231_v32 = vpack.c.bf16 %v5094_v39, %v5093_v46 }
 0x244   : > { %5928 = vmatpush3.bf16.msra.mxu1 %v6266_v23  ;;  %5931 = vmatprep.mubr.bf16.mxu1 %v7197_v57  ;;  %v6272_v57 = vld [vmem:[%s7753_s3 + $0x1f0] sm:$0xff]   ;;  %v4232_v23 = vpack.c.bf16 %v5096_v42, %v5095_v1 }
 0x245   : > { %5929 = vmatprep.subr.bf16.mxu1 %v6268_v5  ;;  %5976 = vmatmul.mubr.bf16.gmra.mxu0 %v3604_v11 }
 0x246   : > { %6024 = vmatpush3.bf16.msra.mxu0 %v6269_v45  ;;  %6027 = vmatprep.mubr.bf16.mxu0 %v7199_v24  ;;  %v4233_v45 = vpack.c.bf16 %v5098_v40, %v5097_v7 }
 0x247   : > { %6025 = vmatprep.subr.bf16.mxu0 %v6271_v27 }
 0x248   : > { %5930 = vmatpush3.bf16.msra.mxu1 %v6268_v5 }
 0x249   : > { %5979 = vmatprep.subr.bf16.mxu1 %v6270_v20 }
 0x24a   : > { %6026 = vmatpush3.bf16.msra.mxu0 %v6271_v27 }
 0x24b   : > { %5932 = vmatmul.mubr.bf16.vlgmr.msra.gmra.mxu1 %v7199_v24  ;;  %6043 = vmatprep.subr.bf16.mxu0 %v7422_v61  ;;  %v7445_v24 = vld [vmem:[%s7755_s5 + $0x28] sm:$0xff]  }
 0x24c   : > { %5980 = vmatpush3.bf16.msra.mxu1 %v6270_v20  ;;  %5935 = vmatprep.mubr.bf16.mxu1 %v7221_v60 }
 0x24d   : > { %5981 = vmatprep.subr.bf16.mxu1 %v6272_v57  ;;  %6028 = vmatmul.mubr.bf16.vlgmr.msra.gmra.mxu0 %v7221_v60  ;;  %v6276_v60 = vld [vmem:[%s7753_s3 + $0x1e0] sm:$0xff]  }
 0x24e   : > { %6044 = vmatpush3.bf16.msra.mxu0 %v7422_v61  ;;  %6031 = vmatprep.mubr.bf16.mxu0 %v7223_v26 }
 0x24f   : > { %6045 = vmatprep.subr.bf16.mxu0 %v7432_v17 }
 0x250   : > { %5982 = vmatpush3.bf16.msra.mxu1 %v6272_v57 }
 0x251   : > { %5983 = vmatprep.subr.bf16.mxu1 %v6274_v52 }
 0x252   : > { %6046 = vmatpush3.bf16.msra.mxu0 %v7432_v17 }
 0x253   : > { %5936 = vmatmul.mubr.bf16.gmra.mxu1 %v7223_v26  ;;  %6047 = vmatprep.subr.bf16.mxu0 %v7445_v24  ;;  %v7469_v26 = vld [vmem:[%s7755_s5 + $0x18] sm:$0xff]  }
 0x254   : > { %5984 = vmatpush3.bf16.msra.mxu1 %v6274_v52  ;;  %5939 = vmatprep.mubr.bf16.mxu1 %v7245_v3 }
 0x255   : > { %5985 = vmatprep.subr.bf16.mxu1 %v6276_v60  ;;  %6032 = vmatmul.mubr.bf16.gmra.mxu0 %v7245_v3  ;;  %v6280_v3 = vld [vmem:[%s7753_s3 + $0x1d0] sm:$0xff]  }
 0x256   : > { %6048 = vmatpush3.bf16.msra.mxu0 %v7445_v24  ;;  %6035 = vmatprep.mubr.bf16.mxu0 %v7247_v53 }
 0x257   : > { %6049 = vmatprep.subr.bf16.mxu0 %v7456_v18 }
 0x258   : > { %5986 = vmatpush3.bf16.msra.mxu1 %v6276_v60 }
 0x259   : > { %5987 = vmatprep.subr.bf16.mxu1 %v6278_v8 }
 0x25a   : > { %6050 = vmatpush3.bf16.msra.mxu0 %v7456_v18 }
 0x25b   : > { %5940 = vmatmul.mubr.bf16.gmra.mxu1 %v7247_v53  ;;  %6051 = vmatprep.subr.bf16.mxu0 %v7469_v26  ;;  %v6282_v53 = vld [vmem:[%s7753_s3 + $0x1c8] sm:$0xff]  }
 0x25c   : > { %5988 = vmatpush3.bf16.msra.mxu1 %v6278_v8  ;;  %5943 = vmatprep.mubr.bf16.mxu1 %v7267_v29 }
 0x25d   : > { %5989 = vmatprep.subr.bf16.mxu1 %v6280_v3  ;;  %6036 = vmatmul.mubr.bf16.gmra.mxu0 %v7267_v29  ;;  %v3799_v29 = vpack.c.bf16 %v3784_v55, %v3783_v41 }
 0x25e   : > { %6052 = vmatpush3.bf16.msra.mxu0 %v7469_v26  ;;  %6039 = vmatprep.mubr.bf16.mxu0 %v3401_v59 }
 0x25f   : > { %6053 = vmatprep.subr.bf16.mxu0 %v7480_v19 }
 0x260   : > { %5990 = vmatpush3.bf16.msra.mxu1 %v6280_v3 }
 0x261   : > { %5991 = vmatprep.subr.bf16.mxu1 %v6282_v53 }
 0x262   : > { %6054 = vmatpush3.bf16.msra.mxu0 %v7480_v19 }
 0x263   : > { %5944 = vmatmul.mubr.bf16.gmra.mxu1 %v3401_v59  ;;  %6055 = vmatprep.subr.bf16.mxu0 %v6285_v9 }
 0x264   : > { %5992 = vmatpush3.bf16.msra.mxu1 %v6282_v53  ;;  %5995 = vmatprep.mubr.bf16.mxu1 %v3799_v29 }
 0x265   : > { %5993 = vmatprep.subr.bf16.mxu1 %v6284_v4  ;;  %6040 = vmatmul.mubr.bf16.gmra.mxu0 %v4008_v54 }
 0x266   : > { %6056 = vmatpush3.bf16.msra.mxu0 %v6285_v9  ;;  %6059 = vmatprep.mubr.bf16.mxu0 %v4226_v56 }
 0x267   : > { %6057 = vmatprep.subr.bf16.mxu0 %v6286_v58 }
 0x268   : > { %5994 = vmatpush3.bf16.msra.mxu1 %v6284_v4 }
 0x269   : > { %6075 = vmatprep.subr.bf16.mxu1 %v7422_v61 }
 0x26a   : > { %6058 = vmatpush3.bf16.msra.mxu0 %v6286_v58 }
 0x26b   : > { %5996 = vmatmul.mubr.bf16.vlgmr.msra.gmra.mxu1 %v3800_v0 }
 0x26c   : > { %6083 = vmatpush3.bf16.msra.mxu1 %v7422_v61  ;;  %5999 = vmatprep.mubr.bf16.mxu1 %v3801_v50 }
 0x26d   : > { %6076 = vmatprep.subr.bf16.mxu1 %v7432_v17  ;;  %6060 = vmatmul.mubr.bf16.vlgmr.msra.gmra.mxu0 %v4227_v16 }
 0x270   : > { %6084 = vmatpush3.bf16.msra.mxu1 %v7432_v17 }
 0x271   : > { %6077 = vmatprep.subr.bf16.mxu1 %v7445_v24 }
 0x273   : > { %6000 = vmatmul.mubr.bf16.gmra.mxu1 %v3802_v25 }
 0x274   : > { %6085 = vmatpush3.bf16.msra.mxu1 %v7445_v24  ;;  %6003 = vmatprep.mubr.bf16.mxu1 %v7240_v49  ;;  %v5087_v49 = vld [vmem:[%s6437_s20 + $0x61] sm:$0xff] }
 0x275   : > { %6078 = vmatprep.subr.bf16.mxu1 %v7456_v18  ;;  %v4228_v47 = vpack.c.bf16 %v5088_v21, %v5087_v49 }
 0x278   : > { %6086 = vmatpush3.bf16.msra.mxu1 %v7456_v18 }
 0x279   : > { %6079 = vmatprep.subr.bf16.mxu1 %v7469_v26 }
 0x27b   : > { %6004 = vmatmul.mubr.bf16.gmra.mxu1 %v7259_v51  ;;  %v5089_v51 = vld [vmem:[%s6437_s20 + $0x79] sm:$0xff] }
 0x27c   : > { %6087 = vmatpush3.bf16.msra.mxu1 %v7469_v26  ;;  %6007 = vmatprep.mubr.bf16.mxu1 %v7346_v38  ;;  %v5090_v38 = vld [vmem:[%s6437_s20 + $0x81] sm:$0xff] }
 0x27d   : > { %6080 = vmatprep.subr.bf16.mxu1 %v7480_v19  ;;  %v4229_v15 = vpack.c.bf16 %v5090_v38, %v5089_v51 }
 0x280   : > { %6088 = vmatpush3.bf16.msra.mxu1 %v7480_v19 }
 0x281   : > { %6081 = vmatprep.subr.bf16.mxu1 %v6285_v9 }
 0x283   : > { %6008 = vmatmul.mubr.bf16.gmra.mxu1 %v3806_v6 }
 0x284   : > { %6089 = vmatpush3.bf16.msra.mxu1 %v6285_v9  ;;  %6063 = vmatprep.mubr.bf16.mxu1 %v4228_v47 }
 0x285   : > { %6082 = vmatprep.subr.bf16.mxu1 %v6286_v58 }
 0x288   : > { %6090 = vmatpush3.bf16.msra.mxu1 %v6286_v58 }
 0x28b   : > { %6064 = vmatmul.mubr.bf16.vlgmr.msra.gmra.mxu1 %v4229_v15 }
 0x28c   : > { %6067 = vmatprep.mubr.bf16.mxu1 %v4230_v14 }
 0x293   : > { %6068 = vmatmul.mubr.bf16.gmra.mxu1 %v4231_v32 }
 0x294   : > { %6071 = vmatprep.mubr.bf16.mxu1 %v4232_v23 }
 0x29b   : > { %6072 = vmatmul.mubr.bf16.gmra.mxu1 %v4233_v45 }
 0x2ab   : > { %v5773_v5 = vpop.f32.mrf.mxu1 }
 0x2ad   : > { %v2563_v11 = vpop.f32.mrf.mxu1  ;;  %v5837_v27 = vpop.f32.mrf.mxu0 }
 0x2af   : > { %v5774_v20 = vpop.f32.mrf.mxu1  ;;  %v2894_v61 = vpop.f32.mrf.mxu0 }
 0x2b1   : > { %v2566_v57 = vpop.f32.mrf.mxu1  ;;  %v5838_v17 = vpop.f32.mrf.mxu0 }
 0x2b3   : > { %v5777_v52 = vpop.f32.mrf.mxu1  ;;  %v2897_v24 = vpop.f32.mrf.mxu0 }
 0x2b5   : > { %v2579_v60 = vpop.f32.mrf.mxu1  ;;  %v5841_v18 = vpop.f32.mrf.mxu0 }
 0x2b7   : > { %v5778_v8 = vpop.f32.mrf.mxu1  ;;  %v2910_v26 = vpop.f32.mrf.mxu0 }
 0x2b9   : > { %v2582_v3 = vpop.f32.mrf.mxu1  ;;  %v5842_v44 = vpop.f32.mrf.mxu0 }
 0x2bb   : > { %v5781_v48 = vpop.f32.mrf.mxu1  ;;  %v2913_v19 = vpop.f32.mrf.mxu0 }
 0x2bd   : > { %v2595_v59 = vpop.f32.mrf.mxu1  ;;  %v5845_v53 = vpop.f32.mrf.mxu0 }
 0x2bf   : > { %v5782_v41 = vpop.f32.mrf.mxu1  ;;  %v2926_v55 = vpop.f32.mrf.mxu0 }
 0x2c1   : > { %v2598_v2 = vpop.f32.mrf.mxu1  ;;  %v5846_v12 = vpop.f32.mrf.mxu0 }
 0x2c3   : > { %v5785_v9 = vpop.f32.mrf.mxu1  ;;  %v2929_v43 = vpop.f32.mrf.mxu0 }
 0x2c5   : > { %v2611_v33 = vpop.f32.mrf.mxu1  ;;  %v5849_v29 = vpop.f32.mrf.mxu0 }
 0x2c7   : > { %v5786_v4 = vpop.f32.mrf.mxu1  ;;  %v2942_v54 = vpop.f32.mrf.mxu0 }
 0x2c9   : > { %v7530_v56 = vpop.f32.mrf.mxu1  ;;  %v7532_v58 = vpop.f32.mrf.mxu0 }
 0x2cb   : > { %v5805_v28 = vpop.f32.mrf.mxu1  ;;  %v7534_v63 = vpop.f32.mrf.mxu0 }
 0x2cc   : > { %v2717_v22 = vadd.f32 %v5805_v28, %v5773_v5 }
 0x2cd   : > { %v2708_v35 = vpop.f32.mrf.mxu1  ;;  %v7536_v62 = vpop.f32.mrf.mxu0 }
 0x2ce   : > { %v2709_v10 = vadd.f32 %v2708_v35, %v2563_v11  ;;  %v2959_v0 = vadd.f32 %v5837_v27, %v2717_v22 }
 0x2cf   : > { %v5806_v50 = vpop.f32.mrf.mxu1  ;;  %v7538_v16 = vpop.f32.mrf.mxu0 }
 0x2d0   : > { %v2720_v37 = vadd.f32 %v5806_v50, %v5774_v20  ;;  %v2957_v30 = vadd.f32 %v2894_v61, %v2709_v10 }
 0x2d1   : > { %v2711_v25 = vpop.f32.mrf.mxu1  ;;  %v7540_v13 = vpop.f32.mrf.mxu0 }
 0x2d2   : > { %v2712_v36 = vadd.f32 %v2711_v25, %v2566_v57  ;;  %v2960_v49 = vadd.f32 %v5838_v17, %v2720_v37 }
 0x2d3   : > { %v5809_v21 = vpop.f32.mrf.mxu1  ;;  %v7542_v6 = vpop.f32.mrf.mxu0 }
 0x2d4   : > { %v2733_v47 = vadd.f32 %v5809_v21, %v5777_v52  ;;  %v2958_v51 = vadd.f32 %v2897_v24, %v2712_v36 }
 0x2d5   : > { %v2724_v38 = vpop.f32.mrf.mxu1  ;;  %v7544_v34 = vpop.f32.mrf.mxu0 }
 0x2d6   : > { %v2725_v31 = vadd.f32 %v2724_v38, %v2579_v60  ;;  %v2963_v15 = vadd.f32 %v5841_v18, %v2733_v47 }
 0x2d7   : > { %v5810_v14 = vpop.f32.mrf.mxu1  ;;  %v7546_v46 = vpop.f32.mrf.mxu0 }
 0x2d8   : > { %v2736_v39 = vadd.f32 %v5810_v14, %v5778_v8  ;;  %v2961_v1 = vadd.f32 %v2910_v26, %v2725_v31 }
 0x2d9   : > { %v2727_v42 = vpop.f32.mrf.mxu1  ;;  %v7548_v32 = vpop.f32.mrf.mxu0 }
 0x2da   : > { %v2728_v23 = vadd.f32 %v2727_v42, %v2582_v3  ;;  %v2964_v7 = vadd.f32 %v5842_v44, %v2736_v39 }
 0x2db   : > { %v5813_v40 = vpop.f32.mrf.mxu1  ;;  %v7550_v45 = vpop.f32.mrf.mxu0 }
 0x2dc   : > { %v2749_v5 = vadd.f32 %v5813_v40, %v5781_v48  ;;  %v2962_v11 = vadd.f32 %v2913_v19, %v2728_v23 }
 0x2dd   : > { %v2740_v27 = vpop.f32.mrf.mxu1  ;;  %v7552_v20 = vpop.f32.mrf.mxu0 }
 0x2de   : > { %v2741_v61 = vadd.f32 %v2740_v27, %v2595_v59  ;;  %v2967_v57 = vadd.f32 %v5845_v53, %v2749_v5 }
 0x2df   : > { %v5814_v17 = vpop.f32.mrf.mxu1  ;;  %v7554_v52 = vpop.f32.mrf.mxu0 }
 0x2e0   : > { %v2752_v24 = vadd.f32 %v5814_v17, %v5782_v41  ;;  %v2965_v60 = vadd.f32 %v2926_v55, %v2741_v61 }
 0x2e1   : > { %v2743_v18 = vpop.f32.mrf.mxu1  ;;  %v7556_v8 = vpop.f32.mrf.mxu0 }
 0x2e2   : > { %v2744_v26 = vadd.f32 %v2743_v18, %v2598_v2  ;;  %v2968_v3 = vadd.f32 %v5846_v12, %v2752_v24 }
 0x2e3   : > { %v5817_v44 = vpop.f32.mrf.mxu1  ;;  %v7558_v28 = vpop.f32.mrf.mxu0 }
 0x2e4   : > { %v2765_v48 = vadd.f32 %v5817_v44, %v5785_v9  ;;  %v2966_v19 = vadd.f32 %v2929_v43, %v2744_v26 }
 0x2e5   : > { %v2756_v22 = vpop.f32.mrf.mxu1  ;;  %v7560_v35 = vpop.f32.mrf.mxu0 }
 0x2e6   : > { %v2757_v59 = vadd.f32 %v2756_v22, %v2611_v33  ;;  %v2971_v53 = vadd.f32 %v5849_v29, %v2765_v48 }
 0x2e7   : > { %v5818_v10 = vpop.f32.mrf.mxu1  ;;  %v7562_v50 = vpop.f32.mrf.mxu0 }
 0x2e8   : > { %v2768_v41 = vadd.f32 %v5818_v10, %v5786_v4  ;;  %v2969_v55 = vadd.f32 %v2942_v54, %v2757_v59 }
 0x2e9   : > { %v2759_v37 = vpop.f32.mrf.mxu1  ;;  %v7564_v25 = vpop.f32.mrf.mxu0 }
 0x2ea   : > { %v2760_v2 = vadd.f32 %v2759_v37, %v7530_v56  ;;  %v2972_v12 = vadd.f32 %v7532_v58, %v2768_v41 }
 0x2eb   : > { %v5869_v36 = vpop.f32.mrf.mxu1  ;;  %v7568_v9 = vpop.f32.mrf.mxu0 }
 0x2ec   : > { %v3162_v43 = vadd.f32 %v5869_v36, %v2959_v0  ;;  %v2970_v21 = vadd.f32 %v7534_v63, %v2760_v2 }
 0x2ed   : > { %v3097_v33 = vpop.f32.mrf.mxu1  ;;  %v7571_v29 = vpop.f32.mrf.mxu0 }
 0x2ee   : > { %v3160_v47 = vadd.f32 %v3097_v33, %v2957_v30  ;;  %v7574_v4 = vadd.f32 %v7536_v62, %v3162_v43 }
 0x2ef   : > { %v5870_v54 = vpop.f32.mrf.mxu1  ;;  %v7576_v38 = vpop.f32.mrf.mxu0 }
 0x2f0   : > { %v3163_v31 = vadd.f32 %v5870_v54, %v2960_v49  ;;  %v7579_v56 = vadd.f32 %v7538_v16, %v3160_v47 }
 0x2f1   : > { %v3100_v58 = vpop.f32.mrf.mxu1  ;;  %v7581_v14 = vpop.f32.mrf.mxu0 }
 0x2f2   : > { %v3161_v0 = vadd.f32 %v3100_v58, %v2958_v51  ;;  %v7584_v63 = vadd.f32 %v7540_v13, %v3163_v31 }
 0x2f3   : > { %v5873_v39 = vpop.f32.mrf.mxu1  ;;  %v7586_v42 = vpop.f32.mrf.mxu0 }
 0x2f4   : > { %v3166_v30 = vadd.f32 %v5873_v39, %v2963_v15  ;;  %v7589_v62 = vadd.f32 %v7542_v6, %v3161_v0 }
 0x2f5   : > { %v3113_v23 = vpop.f32.mrf.mxu1  ;;  %v5969_v40 = vpop.f32.mrf.mxu0 }
 0x2f6   : > { %v3164_v49 = vadd.f32 %v3113_v23, %v2961_v1  ;;  %v3368_v16 = vadd.f32 %v7544_v34, %v3166_v30 }
 0x2f7   : > { %v5874_v5 = vpop.f32.mrf.mxu1  ;;  %v3720_v27 = vpop.f32.mrf.mxu0 }
 0x2f8   : > { %v3167_v61 = vadd.f32 %v5874_v5, %v2964_v7  ;;  %v3366_v51 = vadd.f32 %v7546_v46, %v3164_v49 }
 0x2f9   : > { %v3116_v17 = vpop.f32.mrf.mxu1  ;;  %v5970_v13 = vpop.f32.mrf.mxu0 }
 0x2fa   : > { %v3165_v24 = vadd.f32 %v3116_v17, %v2962_v11  ;;  %v3369_v18 = vadd.f32 %v7548_v32, %v3167_v61 }
 0x2fb   : > { %v5877_v26 = vpop.f32.mrf.mxu1  ;;  %v3723_v15 = vpop.f32.mrf.mxu0 }
 0x2fc   : > { %v3170_v44 = vadd.f32 %v5877_v26, %v2967_v57  ;;  %v3367_v6 = vadd.f32 %v7550_v45, %v3165_v24 }
 0x2fd   : > { %v3129_v48 = vpop.f32.mrf.mxu1  ;;  %v5973_v22 = vpop.f32.mrf.mxu0 }
 0x2fe   : > { %v3168_v1 = vadd.f32 %v3129_v48, %v2965_v60  ;;  %v3372_v34 = vadd.f32 %v7552_v20, %v3170_v44 }
 0x2ff   : > { %v5878_v59 = vpop.f32.mrf.mxu1  ;;  %v3736_v10 = vpop.f32.mrf.mxu0 }
 0x300   : > { %v3171_v7 = vadd.f32 %v5878_v59, %v2968_v3  ;;  %v3370_v46 = vadd.f32 %v7554_v52, %v3168_v1 }
 0x301   : > { %v3132_v41 = vpop.f32.mrf.mxu1  ;;  %v5974_v37 = vpop.f32.mrf.mxu0 }
 0x302   : > { %v3169_v11 = vadd.f32 %v3132_v41, %v2966_v19  ;;  %v3373_v32 = vadd.f32 %v7556_v8, %v3171_v7 }
 0x303   : > { %v5881_v2 = vpop.f32.mrf.mxu1  ;;  %v3739_v36 = vpop.f32.mrf.mxu0 }
 0x304   : > { %v3174_v57 = vadd.f32 %v5881_v2, %v2971_v53  ;;  %v3371_v45 = vadd.f32 %v7558_v28, %v3169_v11 }
 0x305   : > { %v3145_v43 = vpop.f32.mrf.mxu1  ;;  %v5977_v33 = vpop.f32.mrf.mxu0 }
 0x306   : > { %v3172_v60 = vadd.f32 %v3145_v43, %v2969_v55  ;;  %v3376_v20 = vadd.f32 %v7560_v35, %v3174_v57 }
 0x307   : > { %v5882_v47 = vpop.f32.mrf.mxu1  ;;  %v3752_v54 = vpop.f32.mrf.mxu0 }
 0x308   : > { %v3175_v3 = vadd.f32 %v5882_v47, %v2972_v12  ;;  %v3374_v52 = vadd.f32 %v7562_v50, %v3172_v60 }
 0x309   : > { %v3148_v31 = vpop.f32.mrf.mxu1  ;;  %v5978_v58 = vpop.f32.mrf.mxu0 }
 0x30a   : > { %v3173_v19 = vadd.f32 %v3148_v31, %v2970_v21  ;;  %v3377_v8 = vadd.f32 %v7564_v25, %v3175_v3 }
 0x30b   : > { %v5933_v0 = vpop.f32.mrf.mxu1  ;;  %v7602_v39 = vpop.f32.mrf.mxu0 }
 0x30c   : > { %v3375_v28 = vadd.f32 %v7568_v9, %v3173_v19 }
 0x30d   : > { %v3501_v53 = vpop.f32.mrf.mxu1  ;;  %v7605_v30 = vpop.f32.mrf.mxu0 }
 0x30f   : > { %v5934_v55 = vpop.f32.mrf.mxu1  ;;  %v7607_v35 = vpop.f32.mrf.mxu0 }
 0x311   : > { %v3504_v23 = vpop.f32.mrf.mxu1  ;;  %v7609_v12 = vpop.f32.mrf.mxu0 }
 0x313   : > { %v5937_v50 = vpop.f32.mrf.mxu1  ;;  %v7611_v49 = vpop.f32.mrf.mxu0 }
 0x314   : > { %v3570_v21 = vadd.f32 %v5937_v50, %v3368_v16 }
 0x315   : > { %v3517_v5 = vpop.f32.mrf.mxu1  ;;  %v7613_v25 = vpop.f32.mrf.mxu0 }
 0x316   : > { %v3568_v61 = vadd.f32 %v3517_v5, %v3366_v51  ;;  %v7615_v17 = vadd.f32 %v5969_v40, %v3570_v21  ;;  %v3566_v21 = vadd.f32 %v5933_v0, %v7574_v4  ;;  %v3565_v0 = vadd.f32 %v3504_v23, %v7589_v62 }
 0x317   : > { %v5938_v9 = vpop.f32.mrf.mxu1  ;;  %v7617_v24 = vpop.f32.mrf.mxu0 }
 0x318   : > { %v3571_v26 = vadd.f32 %v5938_v9, %v3369_v18  ;;  %v7619_v44 = vadd.f32 %v3720_v27, %v3568_v61 }
 0x319   : > { %v3520_v48 = vpop.f32.mrf.mxu1  ;;  %v7621_v1 = vpop.f32.mrf.mxu0 }
 0x31a   : > { %v3569_v59 = vadd.f32 %v3520_v48, %v3367_v6  ;;  %v7623_v7 = vadd.f32 %v5970_v13, %v3571_v26 }
 0x31b   : > { %v5941_v41 = vpop.f32.mrf.mxu1  ;;  %v7625_v16 = vpop.f32.mrf.mxu0 }
 0x31c   : > { %v3574_v11 = vadd.f32 %v5941_v41, %v3372_v34  ;;  %v7627_v2 = vadd.f32 %v3723_v15, %v3569_v59  ;;  %v3769_v59 = vadd.f32 %v7571_v29, %v3566_v21 }
 0x31d   : > { %v3533_v40 = vpop.f32.mrf.mxu1  ;;  %v7629_v51 = vpop.f32.mrf.mxu0 }
 0x31e   : > { %v3572_v57 = vadd.f32 %v3533_v40, %v3370_v46  ;;  %v7631_v43 = vadd.f32 %v5973_v22, %v3574_v11 }
 0x31f   : > { %v5942_v27 = vpop.f32.mrf.mxu1  ;;  %v7633_v18 = vpop.f32.mrf.mxu0 }
 0x320   : > { %v3575_v60 = vadd.f32 %v5942_v27, %v3373_v32  ;;  %v7635_v47 = vadd.f32 %v3736_v10, %v3572_v57 }
 0x321   : > { %v3536_v13 = vpop.f32.mrf.mxu1  ;;  %v7637_v6 = vpop.f32.mrf.mxu0 }
 0x322   : > { %v3573_v3 = vadd.f32 %v3536_v13, %v3371_v45  ;;  %v7639_v31 = vadd.f32 %v5974_v37, %v3575_v60  ;;  %v3564_v37 = vadd.f32 %v3501_v53, %v7579_v56 }
 0x323   : > { %v5945_v15 = vpop.f32.mrf.mxu1  ;;  %v7641_v34 = vpop.f32.mrf.mxu0 }
 0x324   : > { %v3578_v19 = vadd.f32 %v5945_v15, %v3376_v20  ;;  %v7643_v50 = vadd.f32 %v3739_v36, %v3573_v3  ;;  %v3567_v36 = vadd.f32 %v5934_v55, %v7584_v63  ;;  %v3767_v56 = vadd.f32 %v7576_v38, %v3564_v37  ;;  %v7671_v63 = vld [vmem:[%s7754_s4] ss:$0 sm:$0xff] }
 0x325   : > { %v3549_v22 = vpop.f32.mrf.mxu1  ;;  %v7645_v46 = vpop.f32.mrf.mxu0 }
 0x326   : > { %v3576_v32 = vadd.f32 %v3549_v22, %v3374_v52  ;;  %v7648_v10 = vadd.f32 %v5977_v33, %v3578_v19  ;;  %v3770_v53 = vadd.f32 %v7581_v14, %v3567_v36 }
 0x327   : > { %v5946_v5 = vpop.f32.mrf.mxu1  ;;  %v7650_v61 = vpop.f32.mrf.mxu0 }
 0x328   : > { %v3579_v45 = vadd.f32 %v5946_v5, %v3377_v8  ;;  %v7653_v9 = vadd.f32 %v3752_v54, %v3576_v32 }
 0x329   : > { %v3552_v26 = vpop.f32.mrf.mxu1  ;;  %v7655_v20 = vpop.f32.mrf.mxu0 }
 0x32a   : > { %v3577_v48 = vadd.f32 %v3552_v26, %v3375_v28  ;;  %v7659_v4 = vadd.f32 %v5978_v58, %v3579_v45 }
 0x32b   : > { %v5997_v33 = vpop.f32.mrf.mxu1  ;;  %v7661_v52 = vpop.f32.mrf.mxu0 }
 0x32c   : > { %v3971_v41 = vadd.f32 %v5997_v33, %v3769_v59  ;;  %v7666_v54 = vadd.f32 %v7602_v39, %v3577_v48  ;;  %v3768_v39 = vadd.f32 %v7586_v42, %v3565_v0 }
 0x32d   : > { %v3906_v8 = vpop.f32.mrf.mxu1  ;;  %v6061_v29 = vpop.f32.mrf.mxu0 }
 0x32e   : > { %v4173_v58 = vadd.f32 %v7605_v30, %v3971_v41  ;;  %v3969_v28 = vadd.f32 %v3906_v8, %v3767_v56 }
 0x32f   : > { %v5998_v55 = vpop.f32.mrf.mxu1  ;;  %v4332_v62 = vpop.f32.mrf.mxu0 }
 0x330   : > { %v4171_v23 = vadd.f32 %v7607_v35, %v3969_v28  ;;  %v3972_v38 = vadd.f32 %v5998_v55, %v3770_v53  ;;  %v4196_v11 = vadd.f32 %v7671_v63, %v4173_v58 }
 0x331   : > { %v3909_v40 = vpop.f32.mrf.mxu1  ;;  %v6062_v57 = vpop.f32.mrf.mxu0 }
 0x332   : > { %v4174_v27 = vadd.f32 %v7609_v12, %v3972_v38  ;;  %v3970_v60 = vadd.f32 %v3909_v40, %v3768_v39  ;;  %v4397_v30 = vadd.f32 %v6061_v29, %v4196_v11  ;;  %v4194_v13 = vadd.f32 %v7671_v63, %v4171_v23 }
 0x333   : > { %v6001_v14 = vpop.f32.mrf.mxu1  ;;  %v4335_v22 = vpop.f32.mrf.mxu0 }
 0x334   : > { %v4172_v3 = vadd.f32 %v7611_v49, %v3970_v60  ;;  %v4413_v35 = vmax.f32 %v4397_v30, 0.0  ;;  %v4395_v15 = vadd.f32 %v4332_v62, %v4194_v13  ;;  %v4197_v42 = vadd.f32 %v7671_v63, %v4174_v27 }
 0x335   : > { %v3922_v19 = vpop.f32.mrf.mxu1  ;;  %v3975_v0 = vadd.f32 %v6001_v14, %v7615_v17 }
 0x336   : > { %4429 = vst [vmem:[%s6429_s15 + $0x10] sm:$0xff] %v4413_v35  ;;  %v4411_v21 = vmax.f32 %v4395_v15, 0.0  ;;  %v4195_v12 = vadd.f32 %v7671_v63, %v4172_v3  ;;  %v4398_v32 = vadd.f32 %v6062_v57, %v4197_v42  ;;  %v3973_v56 = vadd.f32 %v3922_v19, %v7619_v44 }
 0x337   : > { %v6002_v5 = vpop.f32.mrf.mxu1  ;;  %v4177_v29 = vadd.f32 %v7613_v25, %v3975_v0 }
 0x338   : > { %4427 = vst [vmem:[%s6429_s15] sm:$0xff] %v4411_v21  ;;  %v4396_v37 = vadd.f32 %v4335_v22, %v4195_v12  ;;  %v4414_v45 = vmax.f32 %v4398_v32, 0.0  ;;  %v3976_v58 = vadd.f32 %v6002_v5, %v7623_v7  ;;  %v4175_v53 = vadd.f32 %v7617_v24, %v3973_v56 }
 0x339   : > { %v3925_v26 = vpop.f32.mrf.mxu1  ;;  %v4200_v17 = vadd.f32 %v7671_v63, %v4177_v29 }
 0x33a   : > { %v4412_v36 = vmax.f32 %v4396_v37, 0.0  ;;  %4430 = vst [vmem:[%s6429_s15 + $0x18] sm:$0xff] %v4414_v45  ;;  %v3974_v55 = vadd.f32 %v3925_v26, %v7627_v2  ;;  %v4178_v23 = vadd.f32 %v7621_v1, %v3976_v58  ;;  %v4198_v7 = vadd.f32 %v7671_v63, %v4175_v53 }
 0x33b   : > { %v6005_v49 = vpop.f32.mrf.mxu1 }
 0x33c   : > { %4428 = vst [vmem:[%s6429_s15 + $0x8] sm:$0xff] %v4412_v36  ;;  %v3979_v38 = vadd.f32 %v6005_v49, %v7631_v43  ;;  %v4176_v44 = vadd.f32 %v7625_v16, %v3974_v55  ;;  %v4201_v43 = vadd.f32 %v7671_v63, %v4178_v23 }
 0x33d   : > { %v3938_v48 = vpop.f32.mrf.mxu1 }
 0x33e   : > { %v3977_v25 = vadd.f32 %v3938_v48, %v7635_v47  ;;  %v4181_v40 = vadd.f32 %v7629_v51, %v3979_v38  ;;  %v4199_v13 = vadd.f32 %v7671_v63, %v4176_v44 }
 0x33f   : > { %v6006_v59 = vpop.f32.mrf.mxu1 }
 0x340   : > { %v3980_v24 = vadd.f32 %v6006_v59, %v7639_v31  ;;  %v4179_v16 = vadd.f32 %v7633_v18, %v3977_v25 }
 0x341   : > { %v3941_v33 = vpop.f32.mrf.mxu1 }
 0x342   : > { %v3978_v27 = vadd.f32 %v3941_v33, %v7643_v50  ;;  %v4182_v31 = vadd.f32 %v7637_v6, %v3980_v24  ;;  %v4204_v50 = vadd.f32 %v7671_v63, %v4181_v40  ;;  %v4202_v6 = vadd.f32 %v7671_v63, %v4179_v16 }
 0x343   : > { %v6009_v41 = vpop.f32.mrf.mxu1 }
 0x344   : > { %v3983_v51 = vadd.f32 %v6009_v41, %v7648_v10  ;;  %v4180_v15 = vadd.f32 %v7641_v34, %v3978_v27  ;;  %v4205_v10 = vadd.f32 %v7671_v63, %v4182_v31 }
 0x345   : > { %v3954_v8 = vpop.f32.mrf.mxu1 }
 0x346   : > { %v3981_v18 = vadd.f32 %v3954_v8, %v7653_v9  ;;  %v4185_v12 = vadd.f32 %v7645_v46, %v3983_v51  ;;  %v4203_v9 = vadd.f32 %v7671_v63, %v4180_v15 }
 0x347   : > { %v6010_v28 = vpop.f32.mrf.mxu1 }
 0x348   : > { %v3984_v32 = vadd.f32 %v6010_v28, %v7659_v4  ;;  %v4183_v45 = vadd.f32 %v7650_v61, %v3981_v18  ;;  %v4208_v33 = vadd.f32 %v7671_v63, %v4185_v12 }
 0x349   : > { %v3957_v62 = vpop.f32.mrf.mxu1 }
 0x34a   : > { %v3982_v26 = vadd.f32 %v3957_v62, %v7666_v54  ;;  %v4186_v46 = vadd.f32 %v7655_v20, %v3984_v32  ;;  %v4206_v56 = vadd.f32 %v7671_v63, %v4183_v45 }
 0x34b   : > { %v6065_v39 = vpop.f32.mrf.mxu1 }
 0x34c   : > { %v4401_v11 = vadd.f32 %v6065_v39, %v4200_v17  ;;  %v4184_v41 = vadd.f32 %v7661_v52, %v3982_v26  ;;  %v4209_v58 = vadd.f32 %v7671_v63, %v4186_v46 }
 0x34d   : > { %v4348_v2 = vpop.f32.mrf.mxu1 }
 0x34e   : > { %v4417_v1 = vmax.f32 %v4401_v11, 0.0  ;;  %v4399_v57 = vadd.f32 %v4348_v2, %v4198_v7  ;;  %v4207_v52 = vadd.f32 %v7671_v63, %v4184_v41 }
 0x34f   : > { %v6066_v60 = vpop.f32.mrf.mxu1 }
 0x350   : > { %4433 = vst [vmem:[%s6429_s15 + $0x30] sm:$0xff] %v4417_v1  ;;  %v4415_v47 = vmax.f32 %v4399_v57, 0.0  ;;  %v4402_v30 = vadd.f32 %v6066_v60, %v4201_v43 }
 0x351   : > { %v4351_v14 = vpop.f32.mrf.mxu1 }
 0x352   : > { %4431 = vst [vmem:[%s6429_s15 + $0x20] sm:$0xff] %v4415_v47  ;;  %v4418_v3 = vmax.f32 %v4402_v30, 0.0  ;;  %v4400_v35 = vadd.f32 %v4351_v14, %v4199_v13 }
 0x353   : > { %v6069_v19 = vpop.f32.mrf.mxu1 }
 0x354   : > { %4434 = vst [vmem:[%s6429_s15 + $0x38] sm:$0xff] %v4418_v3  ;;  %v4416_v42 = vmax.f32 %v4400_v35, 0.0  ;;  %v4405_v22 = vadd.f32 %v6069_v19, %v4204_v50 }
 0x355   : > { %v4364_v21 = vpop.f32.mrf.mxu1 }
 0x356   : > { %4432 = vst [vmem:[%s6429_s15 + $0x28] sm:$0xff] %v4416_v42  ;;  %v4421_v5 = vmax.f32 %v4405_v22, 0.0  ;;  %v4403_v34 = vadd.f32 %v4364_v21, %v4202_v6 }
 0x357   : > { %v6070_v37 = vpop.f32.mrf.mxu1 }
 0x358   : > { %4437 = vst [vmem:[%s6429_s15 + $0x50] sm:$0xff] %v4421_v5  ;;  %v4419_v36 = vmax.f32 %v4403_v34, 0.0  ;;  %v4406_v49 = vadd.f32 %v6070_v37, %v4205_v10 }
 0x359   : > { %v4367_v48 = vpop.f32.mrf.mxu1 }
 0x35a   : > { %4435 = vst [vmem:[%s6429_s15 + $0x40] sm:$0xff] %v4419_v36  ;;  %v4422_v4 = vmax.f32 %v4406_v49, 0.0  ;;  %v4404_v59 = vadd.f32 %v4367_v48, %v4203_v9 }
 0x35b   : > { %v6073_v0 = vpop.f32.mrf.mxu1 }
 0x35c   : > { %4438 = vst [vmem:[%s6429_s15 + $0x58] sm:$0xff] %v4422_v4  ;;  %v4420_v61 = vmax.f32 %v4404_v59, 0.0  ;;  %v4409_v54 = vadd.f32 %v6073_v0, %v4208_v33 }
 0x35d   : > { %v4380_v8 = vpop.f32.mrf.mxu1 }
 0x35e   : > { %4436 = vst [vmem:[%s6429_s15 + $0x48] sm:$0xff] %v4420_v61  ;;  %v4425_v20 = vmax.f32 %v4409_v54, 0.0  ;;  %v4407_v29 = vadd.f32 %v4380_v8, %v4206_v56 }
 0x35f   : > { %v6074_v28 = vpop.f32.mrf.mxu1 }
 0x360   : > { %4441 = vst [vmem:[%s6429_s15 + $0x70] sm:$0xff] %v4425_v20  ;;  %v4423_v53 = vmax.f32 %v4407_v29, 0.0  ;;  %v4410_v55 = vadd.f32 %v6074_v28, %v4209_v58 }
 0x361   : > { %v4383_v62 = vpop.f32.mrf.mxu1 }
 0x362   : > { %4439 = vst [vmem:[%s6429_s15 + $0x60] sm:$0xff] %v4423_v53  ;;  %v4426_v23 = vmax.f32 %v4410_v55, 0.0  ;;  %v4408_v38 = vadd.f32 %v4383_v62, %v4207_v52 }
 0x364   : > { %4442 = vst [vmem:[%s6429_s15 + $0x78] sm:$0xff] %v4426_v23  ;;  %v4424_v17 = vmax.f32 %v4408_v38, 0.0 }
 0x366   : > { %4440 = vst [vmem:[%s6429_s15 + $0x68] sm:$0xff] %v4424_v17 }
 0x367 PF: > { %s16_s25 = sadd.s32 1, %s6325_s25   ;;  %s7785_s21 = smov %s6317_s23 }
 0x368   : > { %p13_p9 = scmp.ge.s32.totalorder %s16_s25, 6   ;;  %s7786_s22 = smov %s6321_s24 }
 0x369   : > { %s7787_s23 = smov %s7790_s26  ;;  %s7788_s24 = smov %s7794_s27 }
 0x36a   :  { %15 = sbr.rel (!%p13_p9) target bundleno = 3 (0x3), region = 104 }

</bundles_post_ra>
